<compile_context>
chip_gen: v6e
topology: v6e:2x2x1
jax: 0.10.0
libtpu: 0.0.40
codegen_flags: <defaults>
</compile_context>

<pallas_src>
import functools

import numpy as np
import jax
import jax.numpy as jnp
from jax import lax
from jax.experimental import pallas as pl
from jax.experimental.pallas import tpu as pltpu


# ------------------------------ geometry -----------------------------------

def _geometry(batch):
    """Per-conv-layer padded-flat-layout geometry for 8x8 -> 4x4 -> 2x2."""
    geo = []
    for (H, W) in [(8, 8), (4, 4), (2, 2)]:
        Wp, Hp = W + 2, H + 2
        hpwp = Hp * Wp
        lout = (H - 1) * Wp + W                   # contiguous span of valid rows
        lall = (batch - 1) * hpwp + lout          # all-batch output slab length
        # The 9 shifted slab reads must exactly tile the padded buffer
        # (VMEM refs have no runtime bounds check -- assert statically).
        assert lall + 2 * (Wp + 1) == batch * hpwp, (H, W, batch)
        geo.append(dict(H=H, W=W, Wp=Wp, hpwp=hpwp, lall=lall))
    return geo


# --------------------------- kernel helpers ---------------------------------

def _conv3x3_taps(xp_ref, w_ref, b_ref, *, wp, lall):
    """3x3 'same' conv + bias + relu, 9 accumulated (rows x Cin)@(Cin x Cout)
    MXU dots over statically shifted slabs of the zero-padded buffer."""
    lo = wp + 1
    acc = None
    for di in range(3):
        for dj in range(3):
            shift = (1 - di) * wp + (1 - dj)
            xs = xp_ref[lo - shift:lo - shift + lall, :]
            t = jnp.dot(xs, w_ref[di * 3 + dj],
                        preferred_element_type=jnp.float32)
            acc = t if acc is None else acc + t
    return jnp.maximum(acc + b_ref[...], 0.0)


def _fill_im2col(xp_ref, col_ref, *, wp, lall, cin):
    """Pack the 9 conv taps along K into a (lall, 9*cin) VMEM slab so the
    whole conv becomes a single MXU dot."""
    lo = wp + 1
    for di in range(3):
        for dj in range(3):
            k = di * 3 + dj
            shift = (1 - di) * wp + (1 - dj)
            col_ref[:, k * cin:(k + 1) * cin] = \
                xp_ref[lo - shift:lo - shift + lall, :]


def _maxpool_stacked(p_mat, y, *, mdst):
    """2x2/stride-2 max-pool: ONE dot over the 4 stacked 0/1 selection planes
    (shape (4*mdst, Lsrc)) followed by a VPU max-tree over sublane-aligned
    mdst-row slices.  Padding rows of the destination come out exactly zero;
    correctness relies on y >= 0 (ReLU)."""
    t = jnp.dot(p_mat, y, preferred_element_type=jnp.float32)
    return jnp.maximum(
        jnp.maximum(t[0:mdst], t[mdst:2 * mdst]),
        jnp.maximum(t[2 * mdst:3 * mdst], t[3 * mdst:4 * mdst]))


# --------------------------- fused Pallas kernel ----------------------------

def _fused_forward_kernel(x_ref,
                          w1_ref, b1_ref, w2_ref, b2_ref, w3_hbm, b3_ref,
                          p1_hbm, p2_ref, p3_ref,
                          fw1_hbm, fb1_ref, fw2_hbm, fb2_ref, fw3_ref, fb3_ref,
                          o_ref,
                          xp1_ref, xp2_ref, xp3_ref, col2_ref, col3_ref,
                          p1_vm, w3_vm, fw1_vm, fw2_vm, dma_sem,
                          *, batch, wp, hpwp, lall, mdst):
    # ---- kick off the late-used-constant DMAs: they overlap conv1/conv2 ----
    cp_p1 = pltpu.make_async_copy(p1_hbm, p1_vm, dma_sem.at[0]); cp_p1.start()
    cp_w3 = pltpu.make_async_copy(w3_hbm, w3_vm, dma_sem.at[1]); cp_w3.start()
    cp_f1 = pltpu.make_async_copy(fw1_hbm, fw1_vm, dma_sem.at[2]); cp_f1.start()
    cp_f2 = pltpu.make_async_copy(fw2_hbm, fw2_vm, dma_sem.at[3]); cp_f2.start()

    # ---- zero-pad the (B*64, 18) input into the flat padded layout ---------
    xp1_ref[...] = jnp.zeros_like(xp1_ref)
    for b in range(batch):
        for h in range(8):                       # 8x8 board, 16 row-slab copies
            dst = b * hpwp[0] + (h + 1) * wp[0] + 1
            src = (b * 8 + h) * 8
            xp1_ref[dst:dst + 8, :] = x_ref[src:src + 8, :]

    # conv1 (8x8, 18->32): 9 accumulated taps (Cin=18 too narrow to pack).
    y1 = _conv3x3_taps(xp1_ref, w1_ref, b1_ref, wp=wp[0], lall=lall[0])

    # pool1 -> padded 6x6x32.
    cp_p1.wait()
    xp2_ref[...] = _maxpool_stacked(p1_vm[...], y1, mdst=mdst[0])

    # conv2 (4x4, 32->64): single packed-K dot (K = 288).
    _fill_im2col(xp2_ref, col2_ref, wp=wp[1], lall=lall[1], cin=32)
    y2 = jnp.maximum(
        jnp.dot(col2_ref[...], w2_ref[...],
                preferred_element_type=jnp.float32) + b2_ref[...], 0.0)

    # pool2 -> padded 4x4x64.
    xp3_ref[...] = _maxpool_stacked(p2_ref[...], y2, mdst=mdst[1])

    # conv3 (2x2, 64->128): single packed-K dot (K = 576).
    _fill_im2col(xp3_ref, col3_ref, wp=wp[2], lall=lall[2], cin=64)
    cp_w3.wait()
    y3 = jnp.maximum(
        jnp.dot(col3_ref[...], w3_vm[...],
                preferred_element_type=jnp.float32) + b3_ref[...], 0.0)

    # pool3 -> (B, 128): Mdst = batch is tiny, keep 4 small dots + max.
    flat = None
    for d in range(4):
        t = jnp.dot(p3_ref[d], y3, preferred_element_type=jnp.float32)
        flat = t if flat is None else jnp.maximum(flat, t)

    # fc1 / fc2 on the MXU.
    cp_f1.wait()
    h = jnp.maximum(
        jnp.dot(flat, fw1_vm[...],
                preferred_element_type=jnp.float32) + fb1_ref[...], 0.0)
    cp_f2.wait()
    h = jnp.maximum(
        jnp.dot(h, fw2_vm[...],
                preferred_element_type=jnp.float32) + fb2_ref[...], 0.0)

    # fc3 (out_features=1): VPU multiply + lane reduction, tanh on the EUP.
    o = jnp.sum(h * fw3_ref[...], axis=1, keepdims=True) + fb3_ref[...]
    o_ref[...] = jnp.tanh(o)


# ------------------------------- forward ------------------------------------

def chess_model_v1_forward(x_nchw, prep):
    batch = x_nchw.shape[0]
    geo = _geometry(batch)

    # NCHW -> NHWC, flattened to (B*64, 18) interior pixel rows (channels on
    # lanes).  Zero-padding happens inside the kernel, so only this tiny
    # transpose remains outside the pallas_call.
    x = jnp.transpose(x_nchw, (0, 2, 3, 1)).reshape(batch * 64, x_nchw.shape[1])

    mdst = (batch * geo[1]["hpwp"], batch * geo[2]["hpwp"])
    assert all(m % 8 == 0 for m in mdst)          # aligned max-tree slices

    inputs = (x,
              prep["w1"], prep["b1"], prep["w2"], prep["b2"],
              prep["w3"], prep["b3"],
              prep["p1"], prep["p2"], prep["p3"],
              prep["fw1"], prep["fb1"], prep["fw2"], prep["fb2"],
              prep["fw3"], prep["fb3"])

    # Inputs used late in the kernel stay in HBM (pl.ANY) and are DMA'd
    # manually so the transfer overlaps conv1/conv2 compute.
    manual = {5, 7, 10, 12}                       # w3, p1, fw1, fw2

    def spec(i, a):
        if i in manual:
            return pl.BlockSpec(memory_space=pl.ANY)
        nd = a.ndim
        return pl.BlockSpec(a.shape, lambda *_, nd=nd: (0,) * nd)

    kernel = functools.partial(
        _fused_forward_kernel,
        batch=batch,
        wp=tuple(g["Wp"] for g in geo),
        hpwp=tuple(g["hpwp"] for g in geo),
        lall=tuple(g["lall"] for g in geo),
        mdst=mdst)

    return pl.pallas_call(
        kernel,
        out_shape=jax.ShapeDtypeStruct((batch, 1), jnp.float32),
        in_specs=[spec(i, a) for i, a in enumerate(inputs)],
        out_specs=pl.BlockSpec((batch, 1), lambda: (0, 0)),
        scratch_shapes=[
            pltpu.VMEM((batch * geo[0]["hpwp"], 18), jnp.float32),  # xp1 padded
            pltpu.VMEM((batch * geo[1]["hpwp"], 32), jnp.float32),  # xp2 padded
            pltpu.VMEM((batch * geo[2]["hpwp"], 64), jnp.float32),  # xp3 padded
            pltpu.VMEM((geo[1]["lall"], 9 * 32), jnp.float32),      # conv2 im2col
            pltpu.VMEM((geo[2]["lall"], 9 * 64), jnp.float32),      # conv3 im2col
            pltpu.VMEM(prep["p1"].shape, jnp.float32),              # p1 landing
            pltpu.VMEM(prep["w3"].shape, jnp.float32),              # w3 landing
            pltpu.VMEM(prep["fw1"].shape, jnp.float32),             # fw1 landing
            pltpu.VMEM(prep["fw2"].shape, jnp.float32),             # fw2 landing
            pltpu.SemaphoreType.DMA((4,)),
        ],
    )(*inputs)


# ------------------------- one-time model preparation -----------------------

def _pool_selection(batch, H, W, next_pad):
    """0/1 selection matrices mapping a conv output slab to the (re-padded)
    pooled activation; one matrix per 2x2 window offset.  Shape (4, Mdst, L)."""
    Wp = W + 2
    hpwp = (H + 2) * Wp
    lall = (batch - 1) * hpwp + (H - 1) * Wp + W
    Ho, Wo = H // 2, W // 2
    if next_pad:
        Wp2 = Wo + 2
        hpwp2 = (Ho + 2) * Wp2
        mdst = batch * hpwp2
    else:
        assert Ho == 1 and Wo == 1
        mdst = batch
    sel = np.zeros((4, mdst, lall), np.float32)
    for d0 in range(2):
        for d1 in range(2):
            for b in range(batch):
                for io in range(Ho):
                    for jo in range(Wo):
                        src = b * hpwp + (2 * io + d0) * Wp + (2 * jo + d1)
                        if next_pad:
                            dst = b * hpwp2 + (io + 1) * Wp2 + (jo + 1)
                        else:
                            dst = b
                        sel[d0 * 2 + d1, dst, src] = 1.0
    return jnp.asarray(sel)


def prepare_model(params, batch):
    """One-time (outside jit) weight re-layout + pooling-selection constants."""
    def conv_w9(w):   # torch (O, I, 3, 3) -> (9, I, O), k = di*3 + dj
        return jnp.transpose(w, (2, 3, 1, 0)).reshape(9, w.shape[1], w.shape[0])

    def conv_wk(w):   # torch (O, I, 3, 3) -> (9*I, O)  packed-K im2col weight
        return conv_w9(w).reshape(9 * w.shape[1], w.shape[0])

    def row(b):
        return b.reshape(1, -1)

    p1 = _pool_selection(batch, 8, 8, True)    # (4, B*36, L1)
    p2 = _pool_selection(batch, 4, 4, True)    # (4, B*16, L2)
    p3 = _pool_selection(batch, 2, 2, False)   # (4, B,    L3)

    return {
        "w1": conv_w9(params["conv1_w"]), "b1": row(params["conv1_b"]),
        "w2": conv_wk(params["conv2_w"]), "b2": row(params["conv2_b"]),
        "w3": conv_wk(params["conv3_w"]), "b3": row(params["conv3_b"]),
        # pool1/pool2 selection planes stacked along M -> one MXU dot per pool.
        "p1": p1.reshape(4 * p1.shape[1], p1.shape[2]),
        "p2": p2.reshape(4 * p2.shape[1], p2.shape[2]),
        "p3": p3,
        "fw1": params["fc1_w"].T, "fb1": row(params["fc1_b"]),
        "fw2": params["fc2_w"].T, "fb2": row(params["fc2_b"]),
        "fw3": params["fc3_w"].reshape(1, 128),
        "fb3": params["fc3_b"].reshape(1, 1),
    }


# --------------------------- deterministic params ---------------------------

def init_params(key):
    ks = jax.random.split(key, 12)

    def w(k, shape, fan_in):
        return jax.random.normal(k, shape, jnp.float32) / float(np.sqrt(fan_in))

    return {  # torch-oriented shapes
        "conv1_w": w(ks[0], (32, 18, 3, 3), 18 * 9), "conv1_b": w(ks[1], (32,), 18 * 9),
        "conv2_w": w(ks[2], (64, 32, 3, 3), 32 * 9), "conv2_b": w(ks[3], (64,), 32 * 9),
        "conv3_w": w(ks[4], (128, 64, 3, 3), 64 * 9), "conv3_b": w(ks[5], (128,), 64 * 9),
        "fc1_w": w(ks[6], (512, 128), 128), "fc1_b": w(ks[7], (512,), 128),
        "fc2_w": w(ks[8], (128, 512), 512), "fc2_b": w(ks[9], (128,), 512),
        "fc3_w": w(ks[10], (1, 128), 128), "fc3_b": w(ks[11], (1,), 128),
    }


# ------------------------- pure-JAX reference check --------------------------

def reference_forward(x, params):
    dn = ("NCHW", "OIHW", "NCHW")
    hi = lax.Precision.HIGHEST

    def conv(v, w, b):
        y = lax.conv_general_dilated(v, w, (1, 1), ((1, 1), (1, 1)),
                                     dimension_numbers=dn, precision=hi)
        return jnp.maximum(y + b[None, :, None, None], 0.0)

    def pool(v):
        return lax.reduce_window(v, -jnp.inf, lax.max,
                                 (1, 1, 2, 2), (1, 1, 2, 2), "VALID")

    y = pool(conv(x, params["conv1_w"], params["conv1_b"]))
    y = pool(conv(y, params["conv2_w"], params["conv2_b"]))
    y = pool(conv(y, params["conv3_w"], params["conv3_b"]))
    y = y.reshape(y.shape[0], 128)
    y = jnp.maximum(jnp.dot(y, params["fc1_w"].T, precision=hi) + params["fc1_b"], 0.0)
    y = jnp.maximum(jnp.dot(y, params["fc2_w"].T, precision=hi) + params["fc2_b"], 0.0)
    return jnp.tanh(jnp.dot(y, params["fc3_w"].T, precision=hi) + params["fc3_b"])


if __name__ == "__main__":
    key = jax.random.PRNGKey(0)
    k_x, k_p = jax.random.split(key)
    # chess board encoding: batch=2, 18 planes, 8x8 board (NCHW, like PyTorch)
    x = jax.random.normal(k_x, (2, 18, 8, 8), jnp.float32)
    params = init_params(k_p)
    prep = prepare_model(params, batch=x.shape[0])      # once, outside jit

    fwd = jax.jit(chess_model_v1_forward)
    out = jax.block_until_ready(fwd(x, prep))
    assert out.shape == (2, 1), out.shape

    ref = jax.block_until_ready(reference_forward(x, params))
    assert jnp.allclose(out, ref, atol=2e-3, rtol=2e-3), (out, ref)
    print("KERNEL_OK")
</pallas_src>

<mosaic_0001>
module attributes {stable_mosaic.version = 11 : i64} {
  func.func @_fused_forward_kernel(%arg0: memref<128x18xf32, #tpu.memory_space<vmem>>, %arg1: memref<9x18x32xf32, #tpu.memory_space<vmem>>, %arg2: memref<1x32xf32, #tpu.memory_space<vmem>>, %arg3: memref<288x64xf32, #tpu.memory_space<vmem>>, %arg4: memref<1x64xf32, #tpu.memory_space<vmem>>, %arg5: memref<576x128xf32, #tpu.memory_space<any>>, %arg6: memref<1x128xf32, #tpu.memory_space<vmem>>, %arg7: memref<288x178xf32, #tpu.memory_space<any>>, %arg8: memref<128x58xf32, #tpu.memory_space<vmem>>, %arg9: memref<4x2x22xf32, #tpu.memory_space<vmem>>, %arg10: memref<128x512xf32, #tpu.memory_space<any>>, %arg11: memref<1x512xf32, #tpu.memory_space<vmem>>, %arg12: memref<512x128xf32, #tpu.memory_space<any>>, %arg13: memref<1x128xf32, #tpu.memory_space<vmem>>, %arg14: memref<1x128xf32, #tpu.memory_space<vmem>>, %arg15: memref<1x1xf32, #tpu.memory_space<vmem>>, %arg16: memref<2x1xf32, #tpu.memory_space<vmem>>, %arg17: memref<200x18xf32, #tpu.memory_space<vmem>>, %arg18: memref<72x32xf32, #tpu.memory_space<vmem>>, %arg19: memref<32x64xf32, #tpu.memory_space<vmem>>, %arg20: memref<58x288xf32, #tpu.memory_space<vmem>>, %arg21: memref<22x576xf32, #tpu.memory_space<vmem>>, %arg22: memref<288x178xf32, #tpu.memory_space<vmem>>, %arg23: memref<576x128xf32, #tpu.memory_space<vmem>>, %arg24: memref<128x512xf32, #tpu.memory_space<vmem>>, %arg25: memref<512x128xf32, #tpu.memory_space<vmem>>, %arg26: memref<4x!tpu.dma_semaphore, #tpu.memory_space<semaphore_mem>>) attributes {dimension_semantics = [], scalar_prefetch = 0 : i64, scratch_operands = 10 : i64, tpu.core_type = #tpu.core_type<tc>} {
    %c0_i32 = arith.constant 0 : i32
    %0 = tpu.memref_slice %arg26[%c0_i32] : memref<4x!tpu.dma_semaphore, #tpu.memory_space<semaphore_mem>> -> memref<1x!tpu.dma_semaphore, #tpu.memory_space<semaphore_mem>>
    %1 = tpu.memref_squeeze %0 : memref<1x!tpu.dma_semaphore, #tpu.memory_space<semaphore_mem>> -> memref<!tpu.dma_semaphore, #tpu.memory_space<semaphore_mem>>
    tpu.enqueue_dma source(%arg7 : memref<288x178xf32, #tpu.memory_space<any>>) target(%arg22 : memref<288x178xf32, #tpu.memory_space<vmem>>) target_semaphore(%1 : memref<!tpu.dma_semaphore, #tpu.memory_space<semaphore_mem>>)
    %c1_i32 = arith.constant 1 : i32
    %2 = tpu.memref_slice %arg26[%c1_i32] : memref<4x!tpu.dma_semaphore, #tpu.memory_space<semaphore_mem>> -> memref<1x!tpu.dma_semaphore, #tpu.memory_space<semaphore_mem>>
    %3 = tpu.memref_squeeze %2 : memref<1x!tpu.dma_semaphore, #tpu.memory_space<semaphore_mem>> -> memref<!tpu.dma_semaphore, #tpu.memory_space<semaphore_mem>>
    tpu.enqueue_dma source(%arg5 : memref<576x128xf32, #tpu.memory_space<any>>) target(%arg23 : memref<576x128xf32, #tpu.memory_space<vmem>>) target_semaphore(%3 : memref<!tpu.dma_semaphore, #tpu.memory_space<semaphore_mem>>)
    %c2_i32 = arith.constant 2 : i32
    %4 = tpu.memref_slice %arg26[%c2_i32] : memref<4x!tpu.dma_semaphore, #tpu.memory_space<semaphore_mem>> -> memref<1x!tpu.dma_semaphore, #tpu.memory_space<semaphore_mem>>
    %5 = tpu.memref_squeeze %4 : memref<1x!tpu.dma_semaphore, #tpu.memory_space<semaphore_mem>> -> memref<!tpu.dma_semaphore, #tpu.memory_space<semaphore_mem>>
    tpu.enqueue_dma source(%arg10 : memref<128x512xf32, #tpu.memory_space<any>>) target(%arg24 : memref<128x512xf32, #tpu.memory_space<vmem>>) target_semaphore(%5 : memref<!tpu.dma_semaphore, #tpu.memory_space<semaphore_mem>>)
    %c3_i32 = arith.constant 3 : i32
    %6 = tpu.memref_slice %arg26[%c3_i32] : memref<4x!tpu.dma_semaphore, #tpu.memory_space<semaphore_mem>> -> memref<1x!tpu.dma_semaphore, #tpu.memory_space<semaphore_mem>>
    %7 = tpu.memref_squeeze %6 : memref<1x!tpu.dma_semaphore, #tpu.memory_space<semaphore_mem>> -> memref<!tpu.dma_semaphore, #tpu.memory_space<semaphore_mem>>
    tpu.enqueue_dma source(%arg12 : memref<512x128xf32, #tpu.memory_space<any>>) target(%arg25 : memref<512x128xf32, #tpu.memory_space<vmem>>) target_semaphore(%7 : memref<!tpu.dma_semaphore, #tpu.memory_space<semaphore_mem>>)
    %cst = arith.constant 0.000000e+00 : f32
    %8 = vector.broadcast %cst : f32 to vector<200x18xf32>
    %c0 = arith.constant 0 : index
    %c0_0 = arith.constant 0 : index
    %9 = vector.load %arg17[%c0, %c0_0] : memref<200x18xf32, #tpu.memory_space<vmem>>, vector<200x18xf32>
    tpu.vector_store %arg17[%c0, %c0_0], %8 {strides = array<i32>} : memref<200x18xf32, #tpu.memory_space<vmem>>, vector<200x18xf32>,
    %c0_1 = arith.constant 0 : index
    %c0_2 = arith.constant 0 : index
    %10 = vector.load %arg0[%c0_1, %c0_2] : memref<128x18xf32, #tpu.memory_space<vmem>>, vector<8x18xf32>
    %c11 = arith.constant 11 : index
    %c0_3 = arith.constant 0 : index
    %11 = vector.load %arg17[%c11, %c0_3] : memref<200x18xf32, #tpu.memory_space<vmem>>, vector<8x18xf32>
    tpu.vector_store %arg17[%c11, %c0_3], %10 {strides = array<i32>} : memref<200x18xf32, #tpu.memory_space<vmem>>, vector<8x18xf32>,
    %c8 = arith.constant 8 : index
    %c0_4 = arith.constant 0 : index
    %12 = vector.load %arg0[%c8, %c0_4] : memref<128x18xf32, #tpu.memory_space<vmem>>, vector<8x18xf32>
    %c21 = arith.constant 21 : index
    %c0_5 = arith.constant 0 : index
    %13 = vector.load %arg17[%c21, %c0_5] : memref<200x18xf32, #tpu.memory_space<vmem>>, vector<8x18xf32>
    tpu.vector_store %arg17[%c21, %c0_5], %12 {strides = array<i32>} : memref<200x18xf32, #tpu.memory_space<vmem>>, vector<8x18xf32>,
    %c16 = arith.constant 16 : index
    %c0_6 = arith.constant 0 : index
    %14 = vector.load %arg0[%c16, %c0_6] : memref<128x18xf32, #tpu.memory_space<vmem>>, vector<8x18xf32>
    %c31 = arith.constant 31 : index
    %c0_7 = arith.constant 0 : index
    %15 = vector.load %arg17[%c31, %c0_7] : memref<200x18xf32, #tpu.memory_space<vmem>>, vector<8x18xf32>
    tpu.vector_store %arg17[%c31, %c0_7], %14 {strides = array<i32>} : memref<200x18xf32, #tpu.memory_space<vmem>>, vector<8x18xf32>,
    %c24 = arith.constant 24 : index
    %c0_8 = arith.constant 0 : index
    %16 = vector.load %arg0[%c24, %c0_8] : memref<128x18xf32, #tpu.memory_space<vmem>>, vector<8x18xf32>
    %c41 = arith.constant 41 : index
    %c0_9 = arith.constant 0 : index
    %17 = vector.load %arg17[%c41, %c0_9] : memref<200x18xf32, #tpu.memory_space<vmem>>, vector<8x18xf32>
    tpu.vector_store %arg17[%c41, %c0_9], %16 {strides = array<i32>} : memref<200x18xf32, #tpu.memory_space<vmem>>, vector<8x18xf32>,
    %c32 = arith.constant 32 : index
    %c0_10 = arith.constant 0 : index
    %18 = vector.load %arg0[%c32, %c0_10] : memref<128x18xf32, #tpu.memory_space<vmem>>, vector<8x18xf32>
    %c51 = arith.constant 51 : index
    %c0_11 = arith.constant 0 : index
    %19 = vector.load %arg17[%c51, %c0_11] : memref<200x18xf32, #tpu.memory_space<vmem>>, vector<8x18xf32>
    tpu.vector_store %arg17[%c51, %c0_11], %18 {strides = array<i32>} : memref<200x18xf32, #tpu.memory_space<vmem>>, vector<8x18xf32>,
    %c40 = arith.constant 40 : index
    %c0_12 = arith.constant 0 : index
    %20 = vector.load %arg0[%c40, %c0_12] : memref<128x18xf32, #tpu.memory_space<vmem>>, vector<8x18xf32>
    %c61 = arith.constant 61 : index
    %c0_13 = arith.constant 0 : index
    %21 = vector.load %arg17[%c61, %c0_13] : memref<200x18xf32, #tpu.memory_space<vmem>>, vector<8x18xf32>
    tpu.vector_store %arg17[%c61, %c0_13], %20 {strides = array<i32>} : memref<200x18xf32, #tpu.memory_space<vmem>>, vector<8x18xf32>,
    %c48 = arith.constant 48 : index
    %c0_14 = arith.constant 0 : index
    %22 = vector.load %arg0[%c48, %c0_14] : memref<128x18xf32, #tpu.memory_space<vmem>>, vector<8x18xf32>
    %c71 = arith.constant 71 : index
    %c0_15 = arith.constant 0 : index
    %23 = vector.load %arg17[%c71, %c0_15] : memref<200x18xf32, #tpu.memory_space<vmem>>, vector<8x18xf32>
    tpu.vector_store %arg17[%c71, %c0_15], %22 {strides = array<i32>} : memref<200x18xf32, #tpu.memory_space<vmem>>, vector<8x18xf32>,
    %c56 = arith.constant 56 : index
    %c0_16 = arith.constant 0 : index
    %24 = vector.load %arg0[%c56, %c0_16] : memref<128x18xf32, #tpu.memory_space<vmem>>, vector<8x18xf32>
    %c81 = arith.constant 81 : index
    %c0_17 = arith.constant 0 : index
    %25 = vector.load %arg17[%c81, %c0_17] : memref<200x18xf32, #tpu.memory_space<vmem>>, vector<8x18xf32>
    tpu.vector_store %arg17[%c81, %c0_17], %24 {strides = array<i32>} : memref<200x18xf32, #tpu.memory_space<vmem>>, vector<8x18xf32>,
    %c64 = arith.constant 64 : index
    %c0_18 = arith.constant 0 : index
    %26 = vector.load %arg0[%c64, %c0_18] : memref<128x18xf32, #tpu.memory_space<vmem>>, vector<8x18xf32>
    %c111 = arith.constant 111 : index
    %c0_19 = arith.constant 0 : index
    %27 = vector.load %arg17[%c111, %c0_19] : memref<200x18xf32, #tpu.memory_space<vmem>>, vector<8x18xf32>
    tpu.vector_store %arg17[%c111, %c0_19], %26 {strides = array<i32>} : memref<200x18xf32, #tpu.memory_space<vmem>>, vector<8x18xf32>,
    %c72 = arith.constant 72 : index
    %c0_20 = arith.constant 0 : index
    %28 = vector.load %arg0[%c72, %c0_20] : memref<128x18xf32, #tpu.memory_space<vmem>>, vector<8x18xf32>
    %c121 = arith.constant 121 : index
    %c0_21 = arith.constant 0 : index
    %29 = vector.load %arg17[%c121, %c0_21] : memref<200x18xf32, #tpu.memory_space<vmem>>, vector<8x18xf32>
    tpu.vector_store %arg17[%c121, %c0_21], %28 {strides = array<i32>} : memref<200x18xf32, #tpu.memory_space<vmem>>, vector<8x18xf32>,
    %c80 = arith.constant 80 : index
    %c0_22 = arith.constant 0 : index
    %30 = vector.load %arg0[%c80, %c0_22] : memref<128x18xf32, #tpu.memory_space<vmem>>, vector<8x18xf32>
    %c131 = arith.constant 131 : index
    %c0_23 = arith.constant 0 : index
    %31 = vector.load %arg17[%c131, %c0_23] : memref<200x18xf32, #tpu.memory_space<vmem>>, vector<8x18xf32>
    tpu.vector_store %arg17[%c131, %c0_23], %30 {strides = array<i32>} : memref<200x18xf32, #tpu.memory_space<vmem>>, vector<8x18xf32>,
    %c88 = arith.constant 88 : index
    %c0_24 = arith.constant 0 : index
    %32 = vector.load %arg0[%c88, %c0_24] : memref<128x18xf32, #tpu.memory_space<vmem>>, vector<8x18xf32>
    %c141 = arith.constant 141 : index
    %c0_25 = arith.constant 0 : index
    %33 = vector.load %arg17[%c141, %c0_25] : memref<200x18xf32, #tpu.memory_space<vmem>>, vector<8x18xf32>
    tpu.vector_store %arg17[%c141, %c0_25], %32 {strides = array<i32>} : memref<200x18xf32, #tpu.memory_space<vmem>>, vector<8x18xf32>,
    %c96 = arith.constant 96 : index
    %c0_26 = arith.constant 0 : index
    %34 = vector.load %arg0[%c96, %c0_26] : memref<128x18xf32, #tpu.memory_space<vmem>>, vector<8x18xf32>
    %c151 = arith.constant 151 : index
    %c0_27 = arith.constant 0 : index
    %35 = vector.load %arg17[%c151, %c0_27] : memref<200x18xf32, #tpu.memory_space<vmem>>, vector<8x18xf32>
    tpu.vector_store %arg17[%c151, %c0_27], %34 {strides = array<i32>} : memref<200x18xf32, #tpu.memory_space<vmem>>, vector<8x18xf32>,
    %c104 = arith.constant 104 : index
    %c0_28 = arith.constant 0 : index
    %36 = vector.load %arg0[%c104, %c0_28] : memref<128x18xf32, #tpu.memory_space<vmem>>, vector<8x18xf32>
    %c161 = arith.constant 161 : index
    %c0_29 = arith.constant 0 : index
    %37 = vector.load %arg17[%c161, %c0_29] : memref<200x18xf32, #tpu.memory_space<vmem>>, vector<8x18xf32>
    tpu.vector_store %arg17[%c161, %c0_29], %36 {strides = array<i32>} : memref<200x18xf32, #tpu.memory_space<vmem>>, vector<8x18xf32>,
    %c112 = arith.constant 112 : index
    %c0_30 = arith.constant 0 : index
    %38 = vector.load %arg0[%c112, %c0_30] : memref<128x18xf32, #tpu.memory_space<vmem>>, vector<8x18xf32>
    %c171 = arith.constant 171 : index
    %c0_31 = arith.constant 0 : index
    %39 = vector.load %arg17[%c171, %c0_31] : memref<200x18xf32, #tpu.memory_space<vmem>>, vector<8x18xf32>
    tpu.vector_store %arg17[%c171, %c0_31], %38 {strides = array<i32>} : memref<200x18xf32, #tpu.memory_space<vmem>>, vector<8x18xf32>,
    %c120 = arith.constant 120 : index
    %c0_32 = arith.constant 0 : index
    %40 = vector.load %arg0[%c120, %c0_32] : memref<128x18xf32, #tpu.memory_space<vmem>>, vector<8x18xf32>
    %c181 = arith.constant 181 : index
    %c0_33 = arith.constant 0 : index
    %41 = vector.load %arg17[%c181, %c0_33] : memref<200x18xf32, #tpu.memory_space<vmem>>, vector<8x18xf32>
    tpu.vector_store %arg17[%c181, %c0_33], %40 {strides = array<i32>} : memref<200x18xf32, #tpu.memory_space<vmem>>, vector<8x18xf32>,
    %c0_34 = arith.constant 0 : index
    %c0_35 = arith.constant 0 : index
    %42 = vector.load %arg17[%c0_34, %c0_35] : memref<200x18xf32, #tpu.memory_space<vmem>>, vector<178x18xf32>
    %c0_36 = arith.constant 0 : index
    %c0_37 = arith.constant 0 : index
    %c0_38 = arith.constant 0 : index
    %43 = vector.load %arg1[%c0_36, %c0_37, %c0_38] : memref<9x18x32xf32, #tpu.memory_space<vmem>>, vector<1x18x32xf32>
    %44 = vector.shape_cast %43 : vector<1x18x32xf32> to vector<18x32xf32>
    %cst_39 = arith.constant dense<0.000000e+00> : vector<178x32xf32>
    %45 = tpu.matmul %42, %44, %cst_39 {dimension_numbers = #tpu.dot_dimension_numbers<[1], [0], [0], [1], [0, 0, 1, 1], [], []>} : vector<178x18xf32>, vector<18x32xf32>, vector<178x32xf32> -> vector<178x32xf32>
    %c1 = arith.constant 1 : index
    %c0_40 = arith.constant 0 : index
    %46 = vector.load %arg17[%c1, %c0_40] : memref<200x18xf32, #tpu.memory_space<vmem>>, vector<178x18xf32>
    %c1_41 = arith.constant 1 : index
    %c0_42 = arith.constant 0 : index
    %c0_43 = arith.constant 0 : index
    %47 = vector.load %arg1[%c1_41, %c0_42, %c0_43] : memref<9x18x32xf32, #tpu.memory_space<vmem>>, vector<1x18x32xf32>
    %48 = vector.shape_cast %47 : vector<1x18x32xf32> to vector<18x32xf32>
    %cst_44 = arith.constant dense<0.000000e+00> : vector<178x32xf32>
    %49 = tpu.matmul %46, %48, %cst_44 {dimension_numbers = #tpu.dot_dimension_numbers<[1], [0], [0], [1], [0, 0, 1, 1], [], []>} : vector<178x18xf32>, vector<18x32xf32>, vector<178x32xf32> -> vector<178x32xf32>
    %50 = arith.addf %45, %49 : vector<178x32xf32>
    %c2 = arith.constant 2 : index
    %c0_45 = arith.constant 0 : index
    %51 = vector.load %arg17[%c2, %c0_45] : memref<200x18xf32, #tpu.memory_space<vmem>>, vector<178x18xf32>
    %c2_46 = arith.constant 2 : index
    %c0_47 = arith.constant 0 : index
    %c0_48 = arith.constant 0 : index
    %52 = vector.load %arg1[%c2_46, %c0_47, %c0_48] : memref<9x18x32xf32, #tpu.memory_space<vmem>>, vector<1x18x32xf32>
    %53 = vector.shape_cast %52 : vector<1x18x32xf32> to vector<18x32xf32>
    %cst_49 = arith.constant dense<0.000000e+00> : vector<178x32xf32>
    %54 = tpu.matmul %51, %53, %cst_49 {dimension_numbers = #tpu.dot_dimension_numbers<[1], [0], [0], [1], [0, 0, 1, 1], [], []>} : vector<178x18xf32>, vector<18x32xf32>, vector<178x32xf32> -> vector<178x32xf32>
    %55 = arith.addf %50, %54 : vector<178x32xf32>
    %c10 = arith.constant 10 : index
    %c0_50 = arith.constant 0 : index
    %56 = vector.load %arg17[%c10, %c0_50] : memref<200x18xf32, #tpu.memory_space<vmem>>, vector<178x18xf32>
    %c3 = arith.constant 3 : index
    %c0_51 = arith.constant 0 : index
    %c0_52 = arith.constant 0 : index
    %57 = vector.load %arg1[%c3, %c0_51, %c0_52] : memref<9x18x32xf32, #tpu.memory_space<vmem>>, vector<1x18x32xf32>
    %58 = vector.shape_cast %57 : vector<1x18x32xf32> to vector<18x32xf32>
    %cst_53 = arith.constant dense<0.000000e+00> : vector<178x32xf32>
    %59 = tpu.matmul %56, %58, %cst_53 {dimension_numbers = #tpu.dot_dimension_numbers<[1], [0], [0], [1], [0, 0, 1, 1], [], []>} : vector<178x18xf32>, vector<18x32xf32>, vector<178x32xf32> -> vector<178x32xf32>
    %60 = arith.addf %55, %59 : vector<178x32xf32>
    %c11_54 = arith.constant 11 : index
    %c0_55 = arith.constant 0 : index
    %61 = vector.load %arg17[%c11_54, %c0_55] : memref<200x18xf32, #tpu.memory_space<vmem>>, vector<178x18xf32>
    %c4 = arith.constant 4 : index
    %c0_56 = arith.constant 0 : index
    %c0_57 = arith.constant 0 : index
    %62 = vector.load %arg1[%c4, %c0_56, %c0_57] : memref<9x18x32xf32, #tpu.memory_space<vmem>>, vector<1x18x32xf32>
    %63 = vector.shape_cast %62 : vector<1x18x32xf32> to vector<18x32xf32>
    %cst_58 = arith.constant dense<0.000000e+00> : vector<178x32xf32>
    %64 = tpu.matmul %61, %63, %cst_58 {dimension_numbers = #tpu.dot_dimension_numbers<[1], [0], [0], [1], [0, 0, 1, 1], [], []>} : vector<178x18xf32>, vector<18x32xf32>, vector<178x32xf32> -> vector<178x32xf32>
    %65 = arith.addf %60, %64 : vector<178x32xf32>
    %c12 = arith.constant 12 : index
    %c0_59 = arith.constant 0 : index
    %66 = vector.load %arg17[%c12, %c0_59] : memref<200x18xf32, #tpu.memory_space<vmem>>, vector<178x18xf32>
    %c5 = arith.constant 5 : index
    %c0_60 = arith.constant 0 : index
    %c0_61 = arith.constant 0 : index
    %67 = vector.load %arg1[%c5, %c0_60, %c0_61] : memref<9x18x32xf32, #tpu.memory_space<vmem>>, vector<1x18x32xf32>
    %68 = vector.shape_cast %67 : vector<1x18x32xf32> to vector<18x32xf32>
    %cst_62 = arith.constant dense<0.000000e+00> : vector<178x32xf32>
    %69 = tpu.matmul %66, %68, %cst_62 {dimension_numbers = #tpu.dot_dimension_numbers<[1], [0], [0], [1], [0, 0, 1, 1], [], []>} : vector<178x18xf32>, vector<18x32xf32>, vector<178x32xf32> -> vector<178x32xf32>
    %70 = arith.addf %65, %69 : vector<178x32xf32>
    %c20 = arith.constant 20 : index
    %c0_63 = arith.constant 0 : index
    %71 = vector.load %arg17[%c20, %c0_63] : memref<200x18xf32, #tpu.memory_space<vmem>>, vector<178x18xf32>
    %c6 = arith.constant 6 : index
    %c0_64 = arith.constant 0 : index
    %c0_65 = arith.constant 0 : index
    %72 = vector.load %arg1[%c6, %c0_64, %c0_65] : memref<9x18x32xf32, #tpu.memory_space<vmem>>, vector<1x18x32xf32>
    %73 = vector.shape_cast %72 : vector<1x18x32xf32> to vector<18x32xf32>
    %cst_66 = arith.constant dense<0.000000e+00> : vector<178x32xf32>
    %74 = tpu.matmul %71, %73, %cst_66 {dimension_numbers = #tpu.dot_dimension_numbers<[1], [0], [0], [1], [0, 0, 1, 1], [], []>} : vector<178x18xf32>, vector<18x32xf32>, vector<178x32xf32> -> vector<178x32xf32>
    %75 = arith.addf %70, %74 : vector<178x32xf32>
    %c21_67 = arith.constant 21 : index
    %c0_68 = arith.constant 0 : index
    %76 = vector.load %arg17[%c21_67, %c0_68] : memref<200x18xf32, #tpu.memory_space<vmem>>, vector<178x18xf32>
    %c7 = arith.constant 7 : index
    %c0_69 = arith.constant 0 : index
    %c0_70 = arith.constant 0 : index
    %77 = vector.load %arg1[%c7, %c0_69, %c0_70] : memref<9x18x32xf32, #tpu.memory_space<vmem>>, vector<1x18x32xf32>
    %78 = vector.shape_cast %77 : vector<1x18x32xf32> to vector<18x32xf32>
    %cst_71 = arith.constant dense<0.000000e+00> : vector<178x32xf32>
    %79 = tpu.matmul %76, %78, %cst_71 {dimension_numbers = #tpu.dot_dimension_numbers<[1], [0], [0], [1], [0, 0, 1, 1], [], []>} : vector<178x18xf32>, vector<18x32xf32>, vector<178x32xf32> -> vector<178x32xf32>
    %80 = arith.addf %75, %79 : vector<178x32xf32>
    %c22 = arith.constant 22 : index
    %c0_72 = arith.constant 0 : index
    %81 = vector.load %arg17[%c22, %c0_72] : memref<200x18xf32, #tpu.memory_space<vmem>>, vector<178x18xf32>
    %c8_73 = arith.constant 8 : index
    %c0_74 = arith.constant 0 : index
    %c0_75 = arith.constant 0 : index
    %82 = vector.load %arg1[%c8_73, %c0_74, %c0_75] : memref<9x18x32xf32, #tpu.memory_space<vmem>>, vector<1x18x32xf32>
    %83 = vector.shape_cast %82 : vector<1x18x32xf32> to vector<18x32xf32>
    %cst_76 = arith.constant dense<0.000000e+00> : vector<178x32xf32>
    %84 = tpu.matmul %81, %83, %cst_76 {dimension_numbers = #tpu.dot_dimension_numbers<[1], [0], [0], [1], [0, 0, 1, 1], [], []>} : vector<178x18xf32>, vector<18x32xf32>, vector<178x32xf32> -> vector<178x32xf32>
    %85 = arith.addf %80, %84 : vector<178x32xf32>
    %c0_77 = arith.constant 0 : index
    %c0_78 = arith.constant 0 : index
    %86 = vector.load %arg2[%c0_77, %c0_78] : memref<1x32xf32, #tpu.memory_space<vmem>>, vector<1x32xf32>
    %87 = vector.broadcast %86 : vector<1x32xf32> to vector<178x32xf32>
    %88 = arith.addf %85, %87 : vector<178x32xf32>
    %cst_79 = arith.constant 0.000000e+00 : f32
    %89 = vector.broadcast %cst_79 : f32 to vector<178x32xf32>
    %90 = arith.maximumf %88, %89 : vector<178x32xf32>
    %c0_i32_80 = arith.constant 0 : i32
    %91 = tpu.memref_slice %arg26[%c0_i32_80] : memref<4x!tpu.dma_semaphore, #tpu.memory_space<semaphore_mem>> -> memref<1x!tpu.dma_semaphore, #tpu.memory_space<semaphore_mem>>
    %92 = tpu.memref_squeeze %91 : memref<1x!tpu.dma_semaphore, #tpu.memory_space<semaphore_mem>> -> memref<!tpu.dma_semaphore, #tpu.memory_space<semaphore_mem>>
    tpu.wait_dma2 semaphore(%92 : memref<!tpu.dma_semaphore, #tpu.memory_space<semaphore_mem>>) src(%arg7 : memref<288x178xf32, #tpu.memory_space<any>>) dst(%arg22 : memref<288x178xf32, #tpu.memory_space<vmem>>)
    %c0_81 = arith.constant 0 : index
    %c0_82 = arith.constant 0 : index
    %93 = vector.load %arg22[%c0_81, %c0_82] : memref<288x178xf32, #tpu.memory_space<vmem>>, vector<288x178xf32>
    %cst_83 = arith.constant dense<0.000000e+00> : vector<288x32xf32>
    %94 = tpu.matmul %93, %90, %cst_83 {dimension_numbers = #tpu.dot_dimension_numbers<[1], [0], [0], [1], [0, 0, 1, 1], [], []>} : vector<288x178xf32>, vector<178x32xf32>, vector<288x32xf32> -> vector<288x32xf32>
    %95 = vector.extract_strided_slice %94 {offsets = [0, 0], sizes = [72, 32], strides = [1, 1]} : vector<288x32xf32> to vector<72x32xf32>
    %96 = vector.extract_strided_slice %94 {offsets = [72, 0], sizes = [72, 32], strides = [1, 1]} : vector<288x32xf32> to vector<72x32xf32>
    %97 = arith.maximumf %95, %96 : vector<72x32xf32>
    %98 = vector.extract_strided_slice %94 {offsets = [144, 0], sizes = [72, 32], strides = [1, 1]} : vector<288x32xf32> to vector<72x32xf32>
    %99 = vector.extract_strided_slice %94 {offsets = [216, 0], sizes = [72, 32], strides = [1, 1]} : vector<288x32xf32> to vector<72x32xf32>
    %100 = arith.maximumf %98, %99 : vector<72x32xf32>
    %101 = arith.maximumf %97, %100 : vector<72x32xf32>
    %c0_84 = arith.constant 0 : index
    %c0_85 = arith.constant 0 : index
    %102 = vector.load %arg18[%c0_84, %c0_85] : memref<72x32xf32, #tpu.memory_space<vmem>>, vector<72x32xf32>
    tpu.vector_store %arg18[%c0_84, %c0_85], %101 {strides = array<i32>} : memref<72x32xf32, #tpu.memory_space<vmem>>, vector<72x32xf32>,
    %c0_86 = arith.constant 0 : index
    %c0_87 = arith.constant 0 : index
    %103 = vector.load %arg18[%c0_86, %c0_87] : memref<72x32xf32, #tpu.memory_space<vmem>>, vector<58x32xf32>
    %c0_88 = arith.constant 0 : index
    %c0_89 = arith.constant 0 : index
    %104 = vector.load %arg20[%c0_88, %c0_89] : memref<58x288xf32, #tpu.memory_space<vmem>>, vector<58x32xf32>
    tpu.vector_store %arg20[%c0_88, %c0_89], %103 {strides = array<i32>} : memref<58x288xf32, #tpu.memory_space<vmem>>, vector<58x32xf32>,
    %c1_90 = arith.constant 1 : index
    %c0_91 = arith.constant 0 : index
    %105 = vector.load %arg18[%c1_90, %c0_91] : memref<72x32xf32, #tpu.memory_space<vmem>>, vector<58x32xf32>
    %c0_92 = arith.constant 0 : index
    %c32_93 = arith.constant 32 : index
    %106 = vector.load %arg20[%c0_92, %c32_93] : memref<58x288xf32, #tpu.memory_space<vmem>>, vector<58x32xf32>
    tpu.vector_store %arg20[%c0_92, %c32_93], %105 {strides = array<i32>} : memref<58x288xf32, #tpu.memory_space<vmem>>, vector<58x32xf32>,
    %c2_94 = arith.constant 2 : index
    %c0_95 = arith.constant 0 : index
    %107 = vector.load %arg18[%c2_94, %c0_95] : memref<72x32xf32, #tpu.memory_space<vmem>>, vector<58x32xf32>
    %c0_96 = arith.constant 0 : index
    %c64_97 = arith.constant 64 : index
    %108 = vector.load %arg20[%c0_96, %c64_97] : memref<58x288xf32, #tpu.memory_space<vmem>>, vector<58x32xf32>
    tpu.vector_store %arg20[%c0_96, %c64_97], %107 {strides = array<i32>} : memref<58x288xf32, #tpu.memory_space<vmem>>, vector<58x32xf32>,
    %c6_98 = arith.constant 6 : index
    %c0_99 = arith.constant 0 : index
    %109 = vector.load %arg18[%c6_98, %c0_99] : memref<72x32xf32, #tpu.memory_space<vmem>>, vector<58x32xf32>
    %c0_100 = arith.constant 0 : index
    %c96_101 = arith.constant 96 : index
    %110 = vector.load %arg20[%c0_100, %c96_101] : memref<58x288xf32, #tpu.memory_space<vmem>>, vector<58x32xf32>
    tpu.vector_store %arg20[%c0_100, %c96_101], %109 {strides = array<i32>} : memref<58x288xf32, #tpu.memory_space<vmem>>, vector<58x32xf32>,
    %c7_102 = arith.constant 7 : index
    %c0_103 = arith.constant 0 : index
    %111 = vector.load %arg18[%c7_102, %c0_103] : memref<72x32xf32, #tpu.memory_space<vmem>>, vector<58x32xf32>
    %c0_104 = arith.constant 0 : index
    %c128 = arith.constant 128 : index
    %112 = vector.load %arg20[%c0_104, %c128] : memref<58x288xf32, #tpu.memory_space<vmem>>, vector<58x32xf32>
    tpu.vector_store %arg20[%c0_104, %c128], %111 {strides = array<i32>} : memref<58x288xf32, #tpu.memory_space<vmem>>, vector<58x32xf32>,
    %c8_105 = arith.constant 8 : index
    %c0_106 = arith.constant 0 : index
    %113 = vector.load %arg18[%c8_105, %c0_106] : memref<72x32xf32, #tpu.memory_space<vmem>>, vector<58x32xf32>
    %c0_107 = arith.constant 0 : index
    %c160 = arith.constant 160 : index
    %114 = vector.load %arg20[%c0_107, %c160] : memref<58x288xf32, #tpu.memory_space<vmem>>, vector<58x32xf32>
    tpu.vector_store %arg20[%c0_107, %c160], %113 {strides = array<i32>} : memref<58x288xf32, #tpu.memory_space<vmem>>, vector<58x32xf32>,
    %c12_108 = arith.constant 12 : index
    %c0_109 = arith.constant 0 : index
    %115 = vector.load %arg18[%c12_108, %c0_109] : memref<72x32xf32, #tpu.memory_space<vmem>>, vector<58x32xf32>
    %c0_110 = arith.constant 0 : index
    %c192 = arith.constant 192 : index
    %116 = vector.load %arg20[%c0_110, %c192] : memref<58x288xf32, #tpu.memory_space<vmem>>, vector<58x32xf32>
    tpu.vector_store %arg20[%c0_110, %c192], %115 {strides = array<i32>} : memref<58x288xf32, #tpu.memory_space<vmem>>, vector<58x32xf32>,
    %c13 = arith.constant 13 : index
    %c0_111 = arith.constant 0 : index
    %117 = vector.load %arg18[%c13, %c0_111] : memref<72x32xf32, #tpu.memory_space<vmem>>, vector<58x32xf32>
    %c0_112 = arith.constant 0 : index
    %c224 = arith.constant 224 : index
    %118 = vector.load %arg20[%c0_112, %c224] : memref<58x288xf32, #tpu.memory_space<vmem>>, vector<58x32xf32>
    tpu.vector_store %arg20[%c0_112, %c224], %117 {strides = array<i32>} : memref<58x288xf32, #tpu.memory_space<vmem>>, vector<58x32xf32>,
    %c14 = arith.constant 14 : index
    %c0_113 = arith.constant 0 : index
    %119 = vector.load %arg18[%c14, %c0_113] : memref<72x32xf32, #tpu.memory_space<vmem>>, vector<58x32xf32>
    %c0_114 = arith.constant 0 : index
    %c256 = arith.constant 256 : index
    %120 = vector.load %arg20[%c0_114, %c256] : memref<58x288xf32, #tpu.memory_space<vmem>>, vector<58x32xf32>
    tpu.vector_store %arg20[%c0_114, %c256], %119 {strides = array<i32>} : memref<58x288xf32, #tpu.memory_space<vmem>>, vector<58x32xf32>,
    %c0_115 = arith.constant 0 : index
    %c0_116 = arith.constant 0 : index
    %121 = vector.load %arg20[%c0_115, %c0_116] : memref<58x288xf32, #tpu.memory_space<vmem>>, vector<58x288xf32>
    %c0_117 = arith.constant 0 : index
    %c0_118 = arith.constant 0 : index
    %122 = vector.load %arg3[%c0_117, %c0_118] : memref<288x64xf32, #tpu.memory_space<vmem>>, vector<288x64xf32>
    %cst_119 = arith.constant dense<0.000000e+00> : vector<58x64xf32>
    %123 = tpu.matmul %121, %122, %cst_119 {dimension_numbers = #tpu.dot_dimension_numbers<[1], [0], [0], [1], [0, 0, 1, 1], [], []>} : vector<58x288xf32>, vector<288x64xf32>, vector<58x64xf32> -> vector<58x64xf32>
    %c0_120 = arith.constant 0 : index
    %c0_121 = arith.constant 0 : index
    %124 = vector.load %arg4[%c0_120, %c0_121] : memref<1x64xf32, #tpu.memory_space<vmem>>, vector<1x64xf32>
    %125 = vector.broadcast %124 : vector<1x64xf32> to vector<58x64xf32>
    %126 = arith.addf %123, %125 : vector<58x64xf32>
    %cst_122 = arith.constant 0.000000e+00 : f32
    %127 = vector.broadcast %cst_122 : f32 to vector<58x64xf32>
    %128 = arith.maximumf %126, %127 : vector<58x64xf32>
    %c0_123 = arith.constant 0 : index
    %c0_124 = arith.constant 0 : index
    %129 = vector.load %arg8[%c0_123, %c0_124] : memref<128x58xf32, #tpu.memory_space<vmem>>, vector<128x58xf32>
    %cst_125 = arith.constant dense<0.000000e+00> : vector<128x64xf32>
    %130 = tpu.matmul %129, %128, %cst_125 {dimension_numbers = #tpu.dot_dimension_numbers<[1], [0], [0], [1], [0, 0, 1, 1], [], []>} : vector<128x58xf32>, vector<58x64xf32>, vector<128x64xf32> -> vector<128x64xf32>
    %131 = vector.extract_strided_slice %130 {offsets = [0, 0], sizes = [32, 64], strides = [1, 1]} : vector<128x64xf32> to vector<32x64xf32>
    %132 = vector.extract_strided_slice %130 {offsets = [32, 0], sizes = [32, 64], strides = [1, 1]} : vector<128x64xf32> to vector<32x64xf32>
    %133 = arith.maximumf %131, %132 : vector<32x64xf32>
    %134 = vector.extract_strided_slice %130 {offsets = [64, 0], sizes = [32, 64], strides = [1, 1]} : vector<128x64xf32> to vector<32x64xf32>
    %135 = vector.extract_strided_slice %130 {offsets = [96, 0], sizes = [32, 64], strides = [1, 1]} : vector<128x64xf32> to vector<32x64xf32>
    %136 = arith.maximumf %134, %135 : vector<32x64xf32>
    %137 = arith.maximumf %133, %136 : vector<32x64xf32>
    %c0_126 = arith.constant 0 : index
    %c0_127 = arith.constant 0 : index
    %138 = vector.load %arg19[%c0_126, %c0_127] : memref<32x64xf32, #tpu.memory_space<vmem>>, vector<32x64xf32>
    tpu.vector_store %arg19[%c0_126, %c0_127], %137 {strides = array<i32>} : memref<32x64xf32, #tpu.memory_space<vmem>>, vector<32x64xf32>,
    %c0_128 = arith.constant 0 : index
    %c0_129 = arith.constant 0 : index
    %139 = vector.load %arg19[%c0_128, %c0_129] : memref<32x64xf32, #tpu.memory_space<vmem>>, vector<22x64xf32>
    %c0_130 = arith.constant 0 : index
    %c0_131 = arith.constant 0 : index
    %140 = vector.load %arg21[%c0_130, %c0_131] : memref<22x576xf32, #tpu.memory_space<vmem>>, vector<22x64xf32>
    tpu.vector_store %arg21[%c0_130, %c0_131], %139 {strides = array<i32>} : memref<22x576xf32, #tpu.memory_space<vmem>>, vector<22x64xf32>,
    %c1_132 = arith.constant 1 : index
    %c0_133 = arith.constant 0 : index
    %141 = vector.load %arg19[%c1_132, %c0_133] : memref<32x64xf32, #tpu.memory_space<vmem>>, vector<22x64xf32>
    %c0_134 = arith.constant 0 : index
    %c64_135 = arith.constant 64 : index
    %142 = vector.load %arg21[%c0_134, %c64_135] : memref<22x576xf32, #tpu.memory_space<vmem>>, vector<22x64xf32>
    tpu.vector_store %arg21[%c0_134, %c64_135], %141 {strides = array<i32>} : memref<22x576xf32, #tpu.memory_space<vmem>>, vector<22x64xf32>,
    %c2_136 = arith.constant 2 : index
    %c0_137 = arith.constant 0 : index
    %143 = vector.load %arg19[%c2_136, %c0_137] : memref<32x64xf32, #tpu.memory_space<vmem>>, vector<22x64xf32>
    %c0_138 = arith.constant 0 : index
    %c128_139 = arith.constant 128 : index
    %144 = vector.load %arg21[%c0_138, %c128_139] : memref<22x576xf32, #tpu.memory_space<vmem>>, vector<22x64xf32>
    tpu.vector_store %arg21[%c0_138, %c128_139], %143 {strides = array<i32>} : memref<22x576xf32, #tpu.memory_space<vmem>>, vector<22x64xf32>,
    %c4_140 = arith.constant 4 : index
    %c0_141 = arith.constant 0 : index
    %145 = vector.load %arg19[%c4_140, %c0_141] : memref<32x64xf32, #tpu.memory_space<vmem>>, vector<22x64xf32>
    %c0_142 = arith.constant 0 : index
    %c192_143 = arith.constant 192 : index
    %146 = vector.load %arg21[%c0_142, %c192_143] : memref<22x576xf32, #tpu.memory_space<vmem>>, vector<22x64xf32>
    tpu.vector_store %arg21[%c0_142, %c192_143], %145 {strides = array<i32>} : memref<22x576xf32, #tpu.memory_space<vmem>>, vector<22x64xf32>,
    %c5_144 = arith.constant 5 : index
    %c0_145 = arith.constant 0 : index
    %147 = vector.load %arg19[%c5_144, %c0_145] : memref<32x64xf32, #tpu.memory_space<vmem>>, vector<22x64xf32>
    %c0_146 = arith.constant 0 : index
    %c256_147 = arith.constant 256 : index
    %148 = vector.load %arg21[%c0_146, %c256_147] : memref<22x576xf32, #tpu.memory_space<vmem>>, vector<22x64xf32>
    tpu.vector_store %arg21[%c0_146, %c256_147], %147 {strides = array<i32>} : memref<22x576xf32, #tpu.memory_space<vmem>>, vector<22x64xf32>,
    %c6_148 = arith.constant 6 : index
    %c0_149 = arith.constant 0 : index
    %149 = vector.load %arg19[%c6_148, %c0_149] : memref<32x64xf32, #tpu.memory_space<vmem>>, vector<22x64xf32>
    %c0_150 = arith.constant 0 : index
    %c320 = arith.constant 320 : index
    %150 = vector.load %arg21[%c0_150, %c320] : memref<22x576xf32, #tpu.memory_space<vmem>>, vector<22x64xf32>
    tpu.vector_store %arg21[%c0_150, %c320], %149 {strides = array<i32>} : memref<22x576xf32, #tpu.memory_space<vmem>>, vector<22x64xf32>,
    %c8_151 = arith.constant 8 : index
    %c0_152 = arith.constant 0 : index
    %151 = vector.load %arg19[%c8_151, %c0_152] : memref<32x64xf32, #tpu.memory_space<vmem>>, vector<22x64xf32>
    %c0_153 = arith.constant 0 : index
    %c384 = arith.constant 384 : index
    %152 = vector.load %arg21[%c0_153, %c384] : memref<22x576xf32, #tpu.memory_space<vmem>>, vector<22x64xf32>
    tpu.vector_store %arg21[%c0_153, %c384], %151 {strides = array<i32>} : memref<22x576xf32, #tpu.memory_space<vmem>>, vector<22x64xf32>,
    %c9 = arith.constant 9 : index
    %c0_154 = arith.constant 0 : index
    %153 = vector.load %arg19[%c9, %c0_154] : memref<32x64xf32, #tpu.memory_space<vmem>>, vector<22x64xf32>
    %c0_155 = arith.constant 0 : index
    %c448 = arith.constant 448 : index
    %154 = vector.load %arg21[%c0_155, %c448] : memref<22x576xf32, #tpu.memory_space<vmem>>, vector<22x64xf32>
    tpu.vector_store %arg21[%c0_155, %c448], %153 {strides = array<i32>} : memref<22x576xf32, #tpu.memory_space<vmem>>, vector<22x64xf32>,
    %c10_156 = arith.constant 10 : index
    %c0_157 = arith.constant 0 : index
    %155 = vector.load %arg19[%c10_156, %c0_157] : memref<32x64xf32, #tpu.memory_space<vmem>>, vector<22x64xf32>
    %c0_158 = arith.constant 0 : index
    %c512 = arith.constant 512 : index
    %156 = vector.load %arg21[%c0_158, %c512] : memref<22x576xf32, #tpu.memory_space<vmem>>, vector<22x64xf32>
    tpu.vector_store %arg21[%c0_158, %c512], %155 {strides = array<i32>} : memref<22x576xf32, #tpu.memory_space<vmem>>, vector<22x64xf32>,
    %c1_i32_159 = arith.constant 1 : i32
    %157 = tpu.memref_slice %arg26[%c1_i32_159] : memref<4x!tpu.dma_semaphore, #tpu.memory_space<semaphore_mem>> -> memref<1x!tpu.dma_semaphore, #tpu.memory_space<semaphore_mem>>
    %158 = tpu.memref_squeeze %157 : memref<1x!tpu.dma_semaphore, #tpu.memory_space<semaphore_mem>> -> memref<!tpu.dma_semaphore, #tpu.memory_space<semaphore_mem>>
    tpu.wait_dma2 semaphore(%158 : memref<!tpu.dma_semaphore, #tpu.memory_space<semaphore_mem>>) src(%arg5 : memref<576x128xf32, #tpu.memory_space<any>>) dst(%arg23 : memref<576x128xf32, #tpu.memory_space<vmem>>)
    %c0_160 = arith.constant 0 : index
    %c0_161 = arith.constant 0 : index
    %159 = vector.load %arg21[%c0_160, %c0_161] : memref<22x576xf32, #tpu.memory_space<vmem>>, vector<22x576xf32>
    %c0_162 = arith.constant 0 : index
    %c0_163 = arith.constant 0 : index
    %160 = vector.load %arg23[%c0_162, %c0_163] : memref<576x128xf32, #tpu.memory_space<vmem>>, vector<576x128xf32>
    %cst_164 = arith.constant dense<0.000000e+00> : vector<22x128xf32>
    %161 = tpu.matmul %159, %160, %cst_164 {dimension_numbers = #tpu.dot_dimension_numbers<[1], [0], [0], [1], [0, 0, 1, 1], [], []>} : vector<22x576xf32>, vector<576x128xf32>, vector<22x128xf32> -> vector<22x128xf32>
    %c0_165 = arith.constant 0 : index
    %c0_166 = arith.constant 0 : index
    %162 = vector.load %arg6[%c0_165, %c0_166] : memref<1x128xf32, #tpu.memory_space<vmem>>, vector<1x128xf32>
    %163 = vector.broadcast %162 : vector<1x128xf32> to vector<22x128xf32>
    %164 = arith.addf %161, %163 : vector<22x128xf32>
    %cst_167 = arith.constant 0.000000e+00 : f32
    %165 = vector.broadcast %cst_167 : f32 to vector<22x128xf32>
    %166 = arith.maximumf %164, %165 : vector<22x128xf32>
    %c0_168 = arith.constant 0 : index
    %c0_169 = arith.constant 0 : index
    %c0_170 = arith.constant 0 : index
    %167 = vector.load %arg9[%c0_168, %c0_169, %c0_170] : memref<4x2x22xf32, #tpu.memory_space<vmem>>, vector<1x2x22xf32>
    %168 = vector.shape_cast %167 : vector<1x2x22xf32> to vector<2x22xf32>
    %cst_171 = arith.constant dense<0.000000e+00> : vector<2x128xf32>
    %169 = tpu.matmul %168, %166, %cst_171 {dimension_numbers = #tpu.dot_dimension_numbers<[1], [0], [0], [1], [0, 0, 1, 1], [], []>} : vector<2x22xf32>, vector<22x128xf32>, vector<2x128xf32> -> vector<2x128xf32>
    %c1_172 = arith.constant 1 : index
    %c0_173 = arith.constant 0 : index
    %c0_174 = arith.constant 0 : index
    %170 = vector.load %arg9[%c1_172, %c0_173, %c0_174] : memref<4x2x22xf32, #tpu.memory_space<vmem>>, vector<1x2x22xf32>
    %171 = vector.shape_cast %170 : vector<1x2x22xf32> to vector<2x22xf32>
    %cst_175 = arith.constant dense<0.000000e+00> : vector<2x128xf32>
    %172 = tpu.matmul %171, %166, %cst_175 {dimension_numbers = #tpu.dot_dimension_numbers<[1], [0], [0], [1], [0, 0, 1, 1], [], []>} : vector<2x22xf32>, vector<22x128xf32>, vector<2x128xf32> -> vector<2x128xf32>
    %173 = arith.maximumf %169, %172 : vector<2x128xf32>
    %c2_176 = arith.constant 2 : index
    %c0_177 = arith.constant 0 : index
    %c0_178 = arith.constant 0 : index
    %174 = vector.load %arg9[%c2_176, %c0_177, %c0_178] : memref<4x2x22xf32, #tpu.memory_space<vmem>>, vector<1x2x22xf32>
    %175 = vector.shape_cast %174 : vector<1x2x22xf32> to vector<2x22xf32>
    %cst_179 = arith.constant dense<0.000000e+00> : vector<2x128xf32>
    %176 = tpu.matmul %175, %166, %cst_179 {dimension_numbers = #tpu.dot_dimension_numbers<[1], [0], [0], [1], [0, 0, 1, 1], [], []>} : vector<2x22xf32>, vector<22x128xf32>, vector<2x128xf32> -> vector<2x128xf32>
    %177 = arith.maximumf %173, %176 : vector<2x128xf32>
    %c3_180 = arith.constant 3 : index
    %c0_181 = arith.constant 0 : index
    %c0_182 = arith.constant 0 : index
    %178 = vector.load %arg9[%c3_180, %c0_181, %c0_182] : memref<4x2x22xf32, #tpu.memory_space<vmem>>, vector<1x2x22xf32>
    %179 = vector.shape_cast %178 : vector<1x2x22xf32> to vector<2x22xf32>
    %cst_183 = arith.constant dense<0.000000e+00> : vector<2x128xf32>
    %180 = tpu.matmul %179, %166, %cst_183 {dimension_numbers = #tpu.dot_dimension_numbers<[1], [0], [0], [1], [0, 0, 1, 1], [], []>} : vector<2x22xf32>, vector<22x128xf32>, vector<2x128xf32> -> vector<2x128xf32>
    %181 = arith.maximumf %177, %180 : vector<2x128xf32>
    %c2_i32_184 = arith.constant 2 : i32
    %182 = tpu.memref_slice %arg26[%c2_i32_184] : memref<4x!tpu.dma_semaphore, #tpu.memory_space<semaphore_mem>> -> memref<1x!tpu.dma_semaphore, #tpu.memory_space<semaphore_mem>>
    %183 = tpu.memref_squeeze %182 : memref<1x!tpu.dma_semaphore, #tpu.memory_space<semaphore_mem>> -> memref<!tpu.dma_semaphore, #tpu.memory_space<semaphore_mem>>
    tpu.wait_dma2 semaphore(%183 : memref<!tpu.dma_semaphore, #tpu.memory_space<semaphore_mem>>) src(%arg10 : memref<128x512xf32, #tpu.memory_space<any>>) dst(%arg24 : memref<128x512xf32, #tpu.memory_space<vmem>>)
    %c0_185 = arith.constant 0 : index
    %c0_186 = arith.constant 0 : index
    %184 = vector.load %arg24[%c0_185, %c0_186] : memref<128x512xf32, #tpu.memory_space<vmem>>, vector<128x512xf32>
    %cst_187 = arith.constant dense<0.000000e+00> : vector<2x512xf32>
    %185 = tpu.matmul %181, %184, %cst_187 {dimension_numbers = #tpu.dot_dimension_numbers<[1], [0], [0], [1], [0, 0, 1, 1], [], []>} : vector<2x128xf32>, vector<128x512xf32>, vector<2x512xf32> -> vector<2x512xf32>
    %c0_188 = arith.constant 0 : index
    %c0_189 = arith.constant 0 : index
    %186 = vector.load %arg11[%c0_188, %c0_189] : memref<1x512xf32, #tpu.memory_space<vmem>>, vector<1x512xf32>
    %187 = vector.broadcast %186 : vector<1x512xf32> to vector<2x512xf32>
    %188 = arith.addf %185, %187 : vector<2x512xf32>
    %cst_190 = arith.constant 0.000000e+00 : f32
    %189 = vector.broadcast %cst_190 : f32 to vector<2x512xf32>
    %190 = arith.maximumf %188, %189 : vector<2x512xf32>
    %c3_i32_191 = arith.constant 3 : i32
    %191 = tpu.memref_slice %arg26[%c3_i32_191] : memref<4x!tpu.dma_semaphore, #tpu.memory_space<semaphore_mem>> -> memref<1x!tpu.dma_semaphore, #tpu.memory_space<semaphore_mem>>
    %192 = tpu.memref_squeeze %191 : memref<1x!tpu.dma_semaphore, #tpu.memory_space<semaphore_mem>> -> memref<!tpu.dma_semaphore, #tpu.memory_space<semaphore_mem>>
    tpu.wait_dma2 semaphore(%192 : memref<!tpu.dma_semaphore, #tpu.memory_space<semaphore_mem>>) src(%arg12 : memref<512x128xf32, #tpu.memory_space<any>>) dst(%arg25 : memref<512x128xf32, #tpu.memory_space<vmem>>)
    %c0_192 = arith.constant 0 : index
    %c0_193 = arith.constant 0 : index
    %193 = vector.load %arg25[%c0_192, %c0_193] : memref<512x128xf32, #tpu.memory_space<vmem>>, vector<512x128xf32>
    %cst_194 = arith.constant dense<0.000000e+00> : vector<2x128xf32>
    %194 = tpu.matmul %190, %193, %cst_194 {dimension_numbers = #tpu.dot_dimension_numbers<[1], [0], [0], [1], [0, 0, 1, 1], [], []>} : vector<2x512xf32>, vector<512x128xf32>, vector<2x128xf32> -> vector<2x128xf32>
    %c0_195 = arith.constant 0 : index
    %c0_196 = arith.constant 0 : index
    %195 = vector.load %arg13[%c0_195, %c0_196] : memref<1x128xf32, #tpu.memory_space<vmem>>, vector<1x128xf32>
    %196 = vector.broadcast %195 : vector<1x128xf32> to vector<2x128xf32>
    %197 = arith.addf %194, %196 : vector<2x128xf32>
    %cst_197 = arith.constant 0.000000e+00 : f32
    %198 = vector.broadcast %cst_197 : f32 to vector<2x128xf32>
    %199 = arith.maximumf %197, %198 : vector<2x128xf32>
    %c0_198 = arith.constant 0 : index
    %c0_199 = arith.constant 0 : index
    %200 = vector.load %arg14[%c0_198, %c0_199] : memref<1x128xf32, #tpu.memory_space<vmem>>, vector<1x128xf32>
    %201 = vector.broadcast %200 : vector<1x128xf32> to vector<2x128xf32>
    %202 = arith.mulf %199, %201 : vector<2x128xf32>
    %cst_200 = arith.constant dense<0.000000e+00> : vector<2xf32>
    %203 = vector.multi_reduction <add>, %202, %cst_200 [1] : vector<2x128xf32> to vector<2xf32>
    %204 = vector.shape_cast %203 : vector<2xf32> to vector<2x1xf32>
    %c0_201 = arith.constant 0 : index
    %c0_202 = arith.constant 0 : index
    %205 = vector.load %arg15[%c0_201, %c0_202] : memref<1x1xf32, #tpu.memory_space<vmem>>, vector<1x1xf32>
    %206 = vector.broadcast %205 : vector<1x1xf32> to vector<2x1xf32>
    %207 = arith.addf %204, %206 : vector<2x1xf32>
    %208 = math.tanh %207 : vector<2x1xf32>
    %c0_203 = arith.constant 0 : index
    %c0_204 = arith.constant 0 : index
    %209 = vector.load %arg16[%c0_203, %c0_204] : memref<2x1xf32, #tpu.memory_space<vmem>>, vector<2x1xf32>
    tpu.vector_store %arg16[%c0_203, %c0_204], %208 {strides = array<i32>} : memref<2x1xf32, #tpu.memory_space<vmem>>, vector<2x1xf32>,
    return
  }
}

</mosaic_0001>

<bundles_post_ra>
// kernel: chess_model_v1_forward.1
= control target key start
LH: loop header
LB: loop body
LE: loop exit
PB: predicated region body
PF: predicated region fallthrough
CT: control target
= control target key end

     0   :  { %s10898_s0 = inlined_call_operand.vmem [shape: f32[128,18], index: 0, kind: input, shape index: {}]   ;;  %s10899_s1 = inlined_call_operand.hbm [shape: f32[9,18,32], index: 1, kind: input, shape index: {}]   ;;  %s10900_s2 = inlined_call_operand.vmem [shape: f32[1,32], index: 2, kind: input, shape index: {}]   ;;  %s10901_s3 = inlined_call_operand.vmem [shape: f32[288,64], index: 3, kind: input, shape index: {}]   ;;  %s10902_s4 = inlined_call_operand.vmem [shape: f32[1,64], index: 4, kind: input, shape index: {}]   ;;  %s10903_s5 = inlined_call_operand.vmem [shape: f32[576,128], index: 5, kind: input, shape index: {}]   ;;  %s10904_s6 = inlined_call_operand.vmem [shape: f32[1,128], index: 6, kind: input, shape index: {}]   ;;  %s10905_s7 = inlined_call_operand.vmem [shape: f32[288,178], index: 7, kind: input, shape index: {}]   ;;  %s10906_s8 = inlined_call_operand.vmem [shape: f32[128,58], index: 8, kind: input, shape index: {}]   ;;  %s10907_s9 = inlined_call_operand.vmem [shape: f32[4,2,22], index: 9, kind: input, shape index: {}]   ;;  %s10908_s10 = inlined_call_operand.vmem [shape: f32[128,512], index: 10, kind: input, shape index: {}]   ;;  %s10909_s11 = inlined_call_operand.vmem [shape: f32[1,512], index: 11, kind: input, shape index: {}]   ;;  %s10910_s12 = inlined_call_operand.hbm [shape: f32[512,128], index: 12, kind: input, shape index: {}]   ;;  %s10911_s13 = inlined_call_operand.vmem [shape: f32[1,128], index: 13, kind: input, shape index: {}]   ;;  %s10912_s14 = inlined_call_operand.vmem [shape: f32[1,128], index: 14, kind: input, shape index: {}]   ;;  %s10913_s15 = inlined_call_operand.<no memory space> [shape: f32[1,1], index: 15, kind: input, shape index: {}]   ;;  %s10914_s16 = inlined_call_operand.vmem [shape: f32[2,1], index: 16, kind: output, shape index: {}]  }
   0x1   :  { %10918 = sst [smem:[#allocation224_spill]] %s10898_s0  ;;  %v21_v0 = vstv %s10913_s15 }
   0x2   :  { %22 = vst [vmem:[#allocation12] sm:$0x1] %v21_v0 }
   0x3   :  { %23 = vsyncpa [#allocation14], 0  ;;  %s7703_s23 = smov [#allocation13]  }
   0x4   :  { %s31_s24 = sshll.u32 %s7703_s23, 4  ;;  %s32_s24 = int_to_ptr.vmem [resolvable:$true] %s31_s24 }
   0x5   :  { %s7661_s25 = scalar_lea.vmem %s32_s24, 3456  ;;  %p7666_p1 = scmp.lt.s32.totalorder %s32_s24, %s32_s24 }
   0x6   :  { %p7662_p0 = scmp.ne.s32.totalorder %s32_s24, %s7661_s25  ;;  %p7667_p2 = scmp.lt.s32.totalorder %s7661_s25, %s7661_s25 }
   0x8   :  { %p7668_p3 = por %p7667_p2, %p7666_p1 }
   0xa   :  { %p7669_p4 = pnand %p7668_p3, %p7662_p0 }
   0xc   :  { %7672 = shalt.err (!%p7669_p4)
}
   0xd   :  { %s7704_s26 = smov 128   ;;  %s7705_s27 = smov 8  }
   0xe   :  { %37 = dma.hbm_to_vmem [thread:$0]  %s10899_s1, 3456, %s32_s24, [#allocation14], %s7704_s26, %s7704_s26, %s7705_s27  }
   0xf   :  { %7693 = dma.done.wait [#allocation14], 3456  }
  0x10   :  { %7694 = vsyncadd [#allocation14], 4294963840  ;;  %v7806_v1 = vld [vmem:[%s10905_s7] sm:$0xff]  ;;  %v7811_v2 = vld [vmem:[%s10905_s7 + $0x8] sm:$0xff] }
  0x11   :  { %v7816_v3 = vld [vmem:[%s10905_s7 + $0x10] sm:$0xff]  ;;  %v7821_v4 = vld [vmem:[%s10905_s7 + $0x18] sm:$0xff]  ;;  %v7826_v5 = vld [vmem:[%s10905_s7 + $0x20] sm:$0xff] }
  0x12   :  { %v7831_v6 = vld [vmem:[%s10905_s7 + $0x28] sm:$0xff]  ;;  %v7836_v7 = vld [vmem:[%s10905_s7 + $0x30] sm:$0xff]  ;;  %v7841_v8 = vld [vmem:[%s10905_s7 + $0x38] sm:$0xff] }
  0x13   :  { %v7846_v9 = vld [vmem:[%s10905_s7 + $0x40] sm:$0xff]  ;;  %v7851_v10 = vld [vmem:[%s10905_s7 + $0x48] sm:$0xff]  ;;  %v7856_v11 = vld [vmem:[%s10905_s7 + $0x50] sm:$0xff] }
  0x14   :  { %10919 = vst [vmem:[#allocation27_spill] sm:$0xff] %v7856_v11  ;;  %v7861_v12 = vld [vmem:[%s10905_s7 + $0x58] sm:$0xff]  ;;  %v7866_v13 = vld [vmem:[%s10905_s7 + $0x60] sm:$0xff]  ;;  %v7871_v14 = vld [vmem:[%s10905_s7 + $0x68] sm:$0xff] }
  0x15   :  { %10920 = vst [vmem:[#allocation28_spill] sm:$0xff] %v7866_v13  ;;  %10921 = vst [vmem:[#allocation29_spill] sm:$0xff] %v7871_v14  ;;  %v7876_v15 = vld [vmem:[%s10905_s7 + $0x70] sm:$0xff]  ;;  %v7881_v16 = vld [vmem:[%s10905_s7 + $0x78] sm:$0xff] }
  0x16   :  { %10922 = vst [vmem:[#allocation30_spill] sm:$0xff] %v7876_v15  ;;  %10923 = vst [vmem:[#allocation31_spill] sm:$0xff] %v7881_v16  ;;  %v7886_v17 = vld [vmem:[%s10905_s7 + $0x80] sm:$0xff]  ;;  %v7891_v18 = vld [vmem:[%s10905_s7 + $0x88] sm:$0xff] }
  0x17   :  { %10924 = vst [vmem:[#allocation32_spill] sm:$0xff] %v7886_v17  ;;  %10925 = vst [vmem:[#allocation33_spill] sm:$0xff] %v7891_v18  ;;  %v7896_v19 = vld [vmem:[%s10905_s7 + $0x90] sm:$0xff]  ;;  %v7901_v20 = vld [vmem:[%s10905_s7 + $0x98] sm:$0xff] }
  0x18   :  { %10926 = vst [vmem:[#allocation34_spill] sm:$0xff] %v7896_v19  ;;  %10927 = vst [vmem:[#allocation35_spill] sm:$0xff] %v7901_v20  ;;  %v7906_v21 = vld [vmem:[%s10905_s7 + $0xa0] sm:$0xff]  ;;  %v7911_v22 = vld [vmem:[%s10905_s7 + $0xa8] sm:$0xff] }
  0x19   :  { %10928 = vst [vmem:[#allocation36_spill] sm:$0xff] %v7906_v21  ;;  %10929 = vst [vmem:[#allocation37_spill] sm:$0xff] %v7911_v22  ;;  %v7916_v23 = vld [vmem:[%s10905_s7 + $0xb0] sm:$0xff]  ;;  %v7921_v24 = vld [vmem:[%s10905_s7 + $0xb8] sm:$0xff] }
  0x1a   :  { %10930 = vst [vmem:[#allocation38_spill] sm:$0xff] %v7916_v23  ;;  %10931 = vst [vmem:[#allocation39_spill] sm:$0xff] %v7921_v24  ;;  %v7926_v25 = vld [vmem:[%s10905_s7 + $0xc0] sm:$0xff]  ;;  %v7931_v26 = vld [vmem:[%s10905_s7 + $0xc8] sm:$0xff] }
  0x1b   :  { %10932 = vst [vmem:[#allocation40_spill] sm:$0xff] %v7926_v25  ;;  %10933 = vst [vmem:[#allocation41_spill] sm:$0xff] %v7931_v26  ;;  %v7936_v27 = vld [vmem:[%s10905_s7 + $0xd0] sm:$0xff]  ;;  %v7941_v28 = vld [vmem:[%s10905_s7 + $0xd8] sm:$0xff] }
  0x1c   :  { %10934 = vst [vmem:[#allocation42_spill] sm:$0xff] %v7936_v27  ;;  %10935 = vst [vmem:[#allocation43_spill] sm:$0xff] %v7941_v28  ;;  %v7946_v29 = vld [vmem:[%s10905_s7 + $0xe0] sm:$0xff]  ;;  %v7951_v30 = vld [vmem:[%s10905_s7 + $0xe8] sm:$0xff] }
  0x1d   :  { %10936 = vst [vmem:[#allocation44_spill] sm:$0xff] %v7946_v29  ;;  %10937 = vst [vmem:[#allocation45_spill] sm:$0xff] %v7951_v30  ;;  %v7956_v31 = vld [vmem:[%s10905_s7 + $0xf0] sm:$0xff]  ;;  %v7961_v32 = vld [vmem:[%s10905_s7 + $0xf8] sm:$0xff] }
  0x1e   :  { %10938 = vst [vmem:[#allocation46_spill] sm:$0xff] %v7956_v31  ;;  %10939 = vst [vmem:[#allocation47_spill] sm:$0xff] %v7961_v32  ;;  %v7966_v33 = vld [vmem:[%s10905_s7 + $0x100] sm:$0xff]  ;;  %v7971_v34 = vld [vmem:[%s10905_s7 + $0x108] sm:$0xff] }
  0x1f   :  { %10940 = vst [vmem:[#allocation48_spill] sm:$0xff] %v7966_v33  ;;  %10941 = vst [vmem:[#allocation49_spill] sm:$0xff] %v7971_v34  ;;  %v7976_v35 = vld [vmem:[%s10905_s7 + $0x110] sm:$0xff]  ;;  %v7981_v36 = vld [vmem:[%s10905_s7 + $0x118] sm:$0xff] }
  0x20   :  { %10942 = vst [vmem:[#allocation50_spill] sm:$0xff] %v7976_v35  ;;  %10943 = vst [vmem:[#allocation51_spill] sm:$0xff] %v7981_v36  ;;  %v7986_v37 = vld [vmem:[%s10905_s7 + $0x120] sm:$0xff]  ;;  %v7991_v38 = vld [vmem:[%s10905_s7 + $0x128] sm:$0xff] }
  0x21   :  { %10944 = vst [vmem:[#allocation52_spill] sm:$0xff] %v7986_v37  ;;  %10945 = vst [vmem:[#allocation53_spill] sm:$0xff] %v7991_v38  ;;  %v7996_v39 = vld [vmem:[%s10905_s7 + $0x130] sm:$0xff]  ;;  %v8001_v40 = vld [vmem:[%s10905_s7 + $0x138] sm:$0xff] }
  0x22   :  { %10946 = vst [vmem:[#allocation54_spill] sm:$0xff] %v7996_v39  ;;  %10947 = vst [vmem:[#allocation55_spill] sm:$0xff] %v8001_v40  ;;  %v8006_v41 = vld [vmem:[%s10905_s7 + $0x140] sm:$0xff]  ;;  %v8011_v42 = vld [vmem:[%s10905_s7 + $0x148] sm:$0xff] }
  0x23   :  { %10948 = vst [vmem:[#allocation56_spill] sm:$0xff] %v8006_v41  ;;  %10949 = vst [vmem:[#allocation57_spill] sm:$0xff] %v8011_v42  ;;  %v8016_v43 = vld [vmem:[%s10905_s7 + $0x150] sm:$0xff]  ;;  %v8021_v44 = vld [vmem:[%s10905_s7 + $0x158] sm:$0xff] }
  0x24   :  { %10950 = vst [vmem:[#allocation58_spill] sm:$0xff] %v8016_v43  ;;  %10951 = vst [vmem:[#allocation59_spill] sm:$0xff] %v8021_v44  ;;  %v8026_v45 = vld [vmem:[%s10905_s7 + $0x160] sm:$0xff]  ;;  %v8031_v46 = vld [vmem:[%s10905_s7 + $0x168] sm:$0xff] }
  0x25   :  { %10952 = vst [vmem:[#allocation60_spill] sm:$0xff] %v8026_v45  ;;  %10953 = vst [vmem:[#allocation61_spill] sm:$0xff] %v8031_v46  ;;  %v8036_v47 = vld [vmem:[%s10905_s7 + $0x170] sm:$0xff]  ;;  %v8041_v48 = vld [vmem:[%s10905_s7 + $0x178] sm:$0xff] }
  0x26   :  { %10954 = vst [vmem:[#allocation62_spill] sm:$0xff] %v8036_v47  ;;  %10955 = vst [vmem:[#allocation63_spill] sm:$0xff] %v8041_v48  ;;  %v8046_v49 = vld [vmem:[%s10905_s7 + $0x180] sm:$0xff]  ;;  %v8051_v50 = vld [vmem:[%s10905_s7 + $0x188] sm:$0xff] }
  0x27   :  { %10956 = vst [vmem:[#allocation64_spill] sm:$0xff] %v8046_v49  ;;  %10957 = vst [vmem:[#allocation65_spill] sm:$0xff] %v8051_v50  ;;  %v8056_v51 = vld [vmem:[%s10905_s7 + $0x190] sm:$0xff]  ;;  %v8061_v52 = vld [vmem:[%s10905_s7 + $0x198] sm:$0xff] }
  0x28   :  { %10958 = vst [vmem:[#allocation66_spill] sm:$0xff] %v8056_v51  ;;  %10959 = vst [vmem:[#allocation67_spill] sm:$0xff] %v8061_v52  ;;  %v8066_v53 = vld [vmem:[%s10905_s7 + $0x1a0] sm:$0xff]  ;;  %v8071_v54 = vld [vmem:[%s10905_s7 + $0x1a8] sm:$0xff] }
  0x29   :  { %10960 = vst [vmem:[#allocation68_spill] sm:$0xff] %v8066_v53  ;;  %10961 = vst [vmem:[#allocation69_spill] sm:$0xff] %v8071_v54  ;;  %v8076_v55 = vld [vmem:[%s10905_s7 + $0x1b0] sm:$0xff]  ;;  %v8081_v56 = vld [vmem:[%s10905_s7 + $0x1b8] sm:$0xff] }
  0x2a   :  { %10962 = vst [vmem:[#allocation70_spill] sm:$0xff] %v8076_v55  ;;  %10963 = vst [vmem:[#allocation71_spill] sm:$0xff] %v8081_v56  ;;  %v8086_v57 = vld [vmem:[%s10905_s7 + $0x1c0] sm:$0xff]  ;;  %v8091_v58 = vld [vmem:[%s10905_s7 + $0x1c8] sm:$0xff] }
  0x2b   :  { %10964 = vst [vmem:[#allocation72_spill] sm:$0xff] %v8086_v57  ;;  %10965 = vst [vmem:[#allocation73_spill] sm:$0xff] %v8091_v58  ;;  %v8096_v59 = vld [vmem:[%s10905_s7 + $0x1d0] sm:$0xff]  ;;  %v8101_v60 = vld [vmem:[%s10905_s7 + $0x1d8] sm:$0xff] }
  0x2c   :  { %10966 = vst [vmem:[#allocation74_spill] sm:$0xff] %v8096_v59  ;;  %10967 = vst [vmem:[#allocation75_spill] sm:$0xff] %v8101_v60  ;;  %v8106_v61 = vld [vmem:[%s10905_s7 + $0x1e0] sm:$0xff]  ;;  %v8111_v62 = vld [vmem:[%s10905_s7 + $0x1e8] sm:$0xff] }
  0x2d   :  { %10968 = vst [vmem:[#allocation76_spill] sm:$0xff] %v8106_v61  ;;  %10969 = vst [vmem:[#allocation77_spill] sm:$0xff] %v8111_v62  ;;  %v8116_v63 = vld [vmem:[%s10905_s7 + $0x1f0] sm:$0xff]  ;;  %v8121_v0 = vld [vmem:[%s10905_s7 + $0x1f8] sm:$0xff] }
  0x2e   :  { %10970 = vst [vmem:[#allocation78_spill] sm:$0xff] %v8116_v63  ;;  %10971 = vst [vmem:[#allocation79_spill] sm:$0xff] %v8121_v0  ;;  %v8126_v59 = vld [vmem:[%s10905_s7 + $0x200] sm:$0xff]  ;;  %v8131_v61 = vld [vmem:[%s10905_s7 + $0x208] sm:$0xff] }
  0x2f   :  { %10972 = vst [vmem:[#allocation80_spill] sm:$0xff] %v8126_v59  ;;  %10973 = vst [vmem:[#allocation81_spill] sm:$0xff] %v8131_v61  ;;  %v8136_v62 = vld [vmem:[%s10905_s7 + $0x210] sm:$0xff]  ;;  %v8141_v63 = vld [vmem:[%s10905_s7 + $0x218] sm:$0xff] }
  0x30   :  { %10974 = vst [vmem:[#allocation82_spill] sm:$0xff] %v8136_v62  ;;  %10975 = vst [vmem:[#allocation83_spill] sm:$0xff] %v8141_v63  ;;  %v8146_v0 = vld [vmem:[%s10905_s7 + $0x220] sm:$0xff]  ;;  %v8151_v59 = vld [vmem:[%s10905_s7 + $0x228] sm:$0xff] }
  0x31   :  { %10976 = vst [vmem:[#allocation84_spill] sm:$0xff] %v8146_v0  ;;  %10977 = vst [vmem:[#allocation85_spill] sm:$0xff] %v8151_v59  ;;  %v8156_v61 = vld [vmem:[%s10905_s7 + $0x230] sm:$0xff]  ;;  %v8161_v62 = vld [vmem:[%s10905_s7 + $0x238] sm:$0xff] }
  0x32   :  { %10978 = vst [vmem:[#allocation86_spill] sm:$0xff] %v8156_v61  ;;  %10979 = vst [vmem:[#allocation87_spill] sm:$0xff] %v8161_v62 }
  0x33   :  { %245 = vsyncadd [#allocation11], 9216  ;;  %v8166_v0 = vld [vmem:[%s10903_s5] sm:$0xff]  ;;  %v8171_v59 = vld [vmem:[%s10903_s5 + $0x8] sm:$0xff] }
  0x34   :  { %10980 = vst [vmem:[#allocation88_spill] sm:$0xff] %v8166_v0  ;;  %10981 = vst [vmem:[#allocation89_spill] sm:$0xff] %v8171_v59  ;;  %v8176_v61 = vld [vmem:[%s10903_s5 + $0x10] sm:$0xff]  ;;  %v8181_v62 = vld [vmem:[%s10903_s5 + $0x18] sm:$0xff] }
  0x35   :  { %10982 = vst [vmem:[#allocation90_spill] sm:$0xff] %v8176_v61  ;;  %10983 = vst [vmem:[#allocation91_spill] sm:$0xff] %v8181_v62  ;;  %v8186_v63 = vld [vmem:[%s10903_s5 + $0x20] sm:$0xff]  ;;  %v8191_v0 = vld [vmem:[%s10903_s5 + $0x28] sm:$0xff] }
  0x36   :  { %10984 = vst [vmem:[#allocation92_spill] sm:$0xff] %v8186_v63  ;;  %10985 = vst [vmem:[#allocation93_spill] sm:$0xff] %v8191_v0  ;;  %v8196_v59 = vld [vmem:[%s10903_s5 + $0x30] sm:$0xff]  ;;  %v8201_v61 = vld [vmem:[%s10903_s5 + $0x38] sm:$0xff] }
  0x37   :  { %10986 = vst [vmem:[#allocation94_spill] sm:$0xff] %v8196_v59  ;;  %10987 = vst [vmem:[#allocation95_spill] sm:$0xff] %v8201_v61  ;;  %v8206_v62 = vld [vmem:[%s10903_s5 + $0x40] sm:$0xff]  ;;  %v8211_v63 = vld [vmem:[%s10903_s5 + $0x48] sm:$0xff] }
  0x38   :  { %10988 = vst [vmem:[#allocation96_spill] sm:$0xff] %v8206_v62  ;;  %10989 = vst [vmem:[#allocation97_spill] sm:$0xff] %v8211_v63  ;;  %v8216_v0 = vld [vmem:[%s10903_s5 + $0x50] sm:$0xff]  ;;  %v8221_v59 = vld [vmem:[%s10903_s5 + $0x58] sm:$0xff] }
  0x39   :  { %10990 = vst [vmem:[#allocation98_spill] sm:$0xff] %v8216_v0  ;;  %10991 = vst [vmem:[#allocation99_spill] sm:$0xff] %v8221_v59  ;;  %v8226_v61 = vld [vmem:[%s10903_s5 + $0x60] sm:$0xff]  ;;  %v8231_v62 = vld [vmem:[%s10903_s5 + $0x68] sm:$0xff] }
  0x3a   :  { %10992 = vst [vmem:[#allocation100_spill] sm:$0xff] %v8226_v61  ;;  %10993 = vst [vmem:[#allocation101_spill] sm:$0xff] %v8231_v62  ;;  %v8236_v63 = vld [vmem:[%s10903_s5 + $0x70] sm:$0xff]  ;;  %v8241_v0 = vld [vmem:[%s10903_s5 + $0x78] sm:$0xff] }
  0x3b   :  { %10994 = vst [vmem:[#allocation102_spill] sm:$0xff] %v8236_v63  ;;  %10995 = vst [vmem:[#allocation103_spill] sm:$0xff] %v8241_v0  ;;  %v8246_v59 = vld [vmem:[%s10903_s5 + $0x80] sm:$0xff]  ;;  %v8251_v61 = vld [vmem:[%s10903_s5 + $0x88] sm:$0xff] }
  0x3c   :  { %10996 = vst [vmem:[#allocation104_spill] sm:$0xff] %v8246_v59  ;;  %10997 = vst [vmem:[#allocation105_spill] sm:$0xff] %v8251_v61  ;;  %v8256_v62 = vld [vmem:[%s10903_s5 + $0x90] sm:$0xff]  ;;  %v8261_v63 = vld [vmem:[%s10903_s5 + $0x98] sm:$0xff] }
  0x3d   :  { %10998 = vst [vmem:[#allocation106_spill] sm:$0xff] %v8256_v62  ;;  %10999 = vst [vmem:[#allocation107_spill] sm:$0xff] %v8261_v63  ;;  %v8266_v0 = vld [vmem:[%s10903_s5 + $0xa0] sm:$0xff]  ;;  %v8271_v59 = vld [vmem:[%s10903_s5 + $0xa8] sm:$0xff] }
  0x3e   :  { %11000 = vst [vmem:[#allocation108_spill] sm:$0xff] %v8266_v0  ;;  %11001 = vst [vmem:[#allocation109_spill] sm:$0xff] %v8271_v59  ;;  %v8276_v61 = vld [vmem:[%s10903_s5 + $0xb0] sm:$0xff]  ;;  %v8281_v62 = vld [vmem:[%s10903_s5 + $0xb8] sm:$0xff] }
  0x3f   :  { %11002 = vst [vmem:[#allocation110_spill] sm:$0xff] %v8276_v61  ;;  %11003 = vst [vmem:[#allocation111_spill] sm:$0xff] %v8281_v62  ;;  %v8286_v63 = vld [vmem:[%s10903_s5 + $0xc0] sm:$0xff]  ;;  %v8291_v0 = vld [vmem:[%s10903_s5 + $0xc8] sm:$0xff] }
  0x40   :  { %11004 = vst [vmem:[#allocation112_spill] sm:$0xff] %v8286_v63  ;;  %11005 = vst [vmem:[#allocation113_spill] sm:$0xff] %v8291_v0  ;;  %v8296_v59 = vld [vmem:[%s10903_s5 + $0xd0] sm:$0xff]  ;;  %v8301_v61 = vld [vmem:[%s10903_s5 + $0xd8] sm:$0xff] }
  0x41   :  { %11006 = vst [vmem:[#allocation114_spill] sm:$0xff] %v8296_v59  ;;  %11007 = vst [vmem:[#allocation115_spill] sm:$0xff] %v8301_v61  ;;  %v8306_v62 = vld [vmem:[%s10903_s5 + $0xe0] sm:$0xff]  ;;  %v8311_v63 = vld [vmem:[%s10903_s5 + $0xe8] sm:$0xff] }
  0x42   :  { %11008 = vst [vmem:[#allocation116_spill] sm:$0xff] %v8306_v62  ;;  %11009 = vst [vmem:[#allocation117_spill] sm:$0xff] %v8311_v63  ;;  %v8316_v0 = vld [vmem:[%s10903_s5 + $0xf0] sm:$0xff]  ;;  %v8321_v59 = vld [vmem:[%s10903_s5 + $0xf8] sm:$0xff] }
  0x43   :  { %11010 = vst [vmem:[#allocation118_spill] sm:$0xff] %v8316_v0  ;;  %11011 = vst [vmem:[#allocation119_spill] sm:$0xff] %v8321_v59  ;;  %v8326_v61 = vld [vmem:[%s10903_s5 + $0x100] sm:$0xff]  ;;  %v8331_v62 = vld [vmem:[%s10903_s5 + $0x108] sm:$0xff] }
  0x44   :  { %11012 = vst [vmem:[#allocation120_spill] sm:$0xff] %v8326_v61  ;;  %11013 = vst [vmem:[#allocation121_spill] sm:$0xff] %v8331_v62  ;;  %v8336_v63 = vld [vmem:[%s10903_s5 + $0x110] sm:$0xff]  ;;  %v8341_v0 = vld [vmem:[%s10903_s5 + $0x118] sm:$0xff] }
  0x45   :  { %11014 = vst [vmem:[#allocation122_spill] sm:$0xff] %v8336_v63  ;;  %11015 = vst [vmem:[#allocation123_spill] sm:$0xff] %v8341_v0  ;;  %v8346_v59 = vld [vmem:[%s10903_s5 + $0x120] sm:$0xff]  ;;  %v8351_v61 = vld [vmem:[%s10903_s5 + $0x128] sm:$0xff] }
  0x46   :  { %11016 = vst [vmem:[#allocation124_spill] sm:$0xff] %v8346_v59  ;;  %11017 = vst [vmem:[#allocation125_spill] sm:$0xff] %v8351_v61  ;;  %v8356_v62 = vld [vmem:[%s10903_s5 + $0x130] sm:$0xff]  ;;  %v8361_v63 = vld [vmem:[%s10903_s5 + $0x138] sm:$0xff] }
  0x47   :  { %11018 = vst [vmem:[#allocation126_spill] sm:$0xff] %v8356_v62  ;;  %11019 = vst [vmem:[#allocation127_spill] sm:$0xff] %v8361_v63  ;;  %v8366_v0 = vld [vmem:[%s10903_s5 + $0x140] sm:$0xff]  ;;  %v8371_v59 = vld [vmem:[%s10903_s5 + $0x148] sm:$0xff] }
  0x48   :  { %11020 = vst [vmem:[#allocation128_spill] sm:$0xff] %v8366_v0  ;;  %11021 = vst [vmem:[#allocation129_spill] sm:$0xff] %v8371_v59  ;;  %v8376_v61 = vld [vmem:[%s10903_s5 + $0x150] sm:$0xff]  ;;  %v8381_v62 = vld [vmem:[%s10903_s5 + $0x158] sm:$0xff] }
  0x49   :  { %11022 = vst [vmem:[#allocation130_spill] sm:$0xff] %v8376_v61  ;;  %11023 = vst [vmem:[#allocation131_spill] sm:$0xff] %v8381_v62  ;;  %v8386_v63 = vld [vmem:[%s10903_s5 + $0x160] sm:$0xff]  ;;  %v8391_v0 = vld [vmem:[%s10903_s5 + $0x168] sm:$0xff] }
  0x4a   :  { %11024 = vst [vmem:[#allocation132_spill] sm:$0xff] %v8386_v63  ;;  %11025 = vst [vmem:[#allocation133_spill] sm:$0xff] %v8391_v0  ;;  %v8396_v59 = vld [vmem:[%s10903_s5 + $0x170] sm:$0xff]  ;;  %v8401_v61 = vld [vmem:[%s10903_s5 + $0x178] sm:$0xff] }
  0x4b   :  { %11026 = vst [vmem:[#allocation134_spill] sm:$0xff] %v8396_v59  ;;  %11027 = vst [vmem:[#allocation135_spill] sm:$0xff] %v8401_v61  ;;  %v8406_v62 = vld [vmem:[%s10903_s5 + $0x180] sm:$0xff]  ;;  %v8411_v63 = vld [vmem:[%s10903_s5 + $0x188] sm:$0xff] }
  0x4c   :  { %11028 = vst [vmem:[#allocation136_spill] sm:$0xff] %v8406_v62  ;;  %11029 = vst [vmem:[#allocation137_spill] sm:$0xff] %v8411_v63  ;;  %v8416_v0 = vld [vmem:[%s10903_s5 + $0x190] sm:$0xff]  ;;  %v8421_v59 = vld [vmem:[%s10903_s5 + $0x198] sm:$0xff] }
  0x4d   :  { %11030 = vst [vmem:[#allocation138_spill] sm:$0xff] %v8416_v0  ;;  %11031 = vst [vmem:[#allocation139_spill] sm:$0xff] %v8421_v59  ;;  %v8426_v61 = vld [vmem:[%s10903_s5 + $0x1a0] sm:$0xff]  ;;  %v8431_v62 = vld [vmem:[%s10903_s5 + $0x1a8] sm:$0xff] }
  0x4e   :  { %11032 = vst [vmem:[#allocation140_spill] sm:$0xff] %v8426_v61  ;;  %11033 = vst [vmem:[#allocation141_spill] sm:$0xff] %v8431_v62  ;;  %v8436_v63 = vld [vmem:[%s10903_s5 + $0x1b0] sm:$0xff]  ;;  %v8441_v0 = vld [vmem:[%s10903_s5 + $0x1b8] sm:$0xff] }
  0x4f   :  { %11034 = vst [vmem:[#allocation142_spill] sm:$0xff] %v8436_v63  ;;  %11035 = vst [vmem:[#allocation143_spill] sm:$0xff] %v8441_v0  ;;  %v8446_v59 = vld [vmem:[%s10903_s5 + $0x1c0] sm:$0xff]  ;;  %v8451_v61 = vld [vmem:[%s10903_s5 + $0x1c8] sm:$0xff] }
  0x50   :  { %11036 = vst [vmem:[#allocation144_spill] sm:$0xff] %v8446_v59  ;;  %11037 = vst [vmem:[#allocation145_spill] sm:$0xff] %v8451_v61  ;;  %v8456_v62 = vld [vmem:[%s10903_s5 + $0x1d0] sm:$0xff]  ;;  %v8461_v63 = vld [vmem:[%s10903_s5 + $0x1d8] sm:$0xff] }
  0x51   :  { %11038 = vst [vmem:[#allocation146_spill] sm:$0xff] %v8456_v62  ;;  %11039 = vst [vmem:[#allocation147_spill] sm:$0xff] %v8461_v63  ;;  %v8466_v0 = vld [vmem:[%s10903_s5 + $0x1e0] sm:$0xff]  ;;  %v8471_v59 = vld [vmem:[%s10903_s5 + $0x1e8] sm:$0xff] }
  0x52   :  { %11040 = vst [vmem:[#allocation148_spill] sm:$0xff] %v8466_v0  ;;  %11041 = vst [vmem:[#allocation149_spill] sm:$0xff] %v8471_v59  ;;  %v8476_v61 = vld [vmem:[%s10903_s5 + $0x1f0] sm:$0xff]  ;;  %v8481_v62 = vld [vmem:[%s10903_s5 + $0x1f8] sm:$0xff] }
  0x53   :  { %11042 = vst [vmem:[#allocation150_spill] sm:$0xff] %v8476_v61  ;;  %11043 = vst [vmem:[#allocation151_spill] sm:$0xff] %v8481_v62  ;;  %v8486_v63 = vld [vmem:[%s10903_s5 + $0x200] sm:$0xff]  ;;  %v8491_v0 = vld [vmem:[%s10903_s5 + $0x208] sm:$0xff] }
  0x54   :  { %11044 = vst [vmem:[#allocation152_spill] sm:$0xff] %v8486_v63  ;;  %11045 = vst [vmem:[#allocation153_spill] sm:$0xff] %v8491_v0  ;;  %v8496_v59 = vld [vmem:[%s10903_s5 + $0x210] sm:$0xff]  ;;  %v8501_v61 = vld [vmem:[%s10903_s5 + $0x218] sm:$0xff] }
  0x55   :  { %11046 = vst [vmem:[#allocation154_spill] sm:$0xff] %v8496_v59  ;;  %11047 = vst [vmem:[#allocation155_spill] sm:$0xff] %v8501_v61  ;;  %v8506_v62 = vld [vmem:[%s10903_s5 + $0x220] sm:$0xff]  ;;  %v8511_v63 = vld [vmem:[%s10903_s5 + $0x228] sm:$0xff] }
  0x56   :  { %11048 = vst [vmem:[#allocation156_spill] sm:$0xff] %v8506_v62  ;;  %11049 = vst [vmem:[#allocation157_spill] sm:$0xff] %v8511_v63  ;;  %v8516_v0 = vld [vmem:[%s10903_s5 + $0x230] sm:$0xff]  ;;  %v8521_v59 = vld [vmem:[%s10903_s5 + $0x238] sm:$0xff] }
  0x57   :  { %11050 = vst [vmem:[#allocation158_spill] sm:$0xff] %v8516_v0  ;;  %11051 = vst [vmem:[#allocation159_spill] sm:$0xff] %v8521_v59 }
  0x58   :  { %431 = vsyncadd [#allocation11 + $0x1], 9216  ;;  %v8526_v61 = vld [vmem:[%s10908_s10] sm:$0xff]  ;;  %v8531_v62 = vld [vmem:[%s10908_s10 + $0x8] sm:$0xff]  ;;  %vm794_vm0 = vcmask 1041408   ;;  %v10916_v57 = vmov 0.0  }
  0x59   :  { %11052 = vst [vmem:[#allocation160_spill] sm:$0xff] %v8526_v61  ;;  %11053 = vst [vmem:[#allocation161_spill] sm:$0xff] %v8531_v62  ;;  %v8536_v63 = vld [vmem:[%s10908_s10 + $0x10] sm:$0xff]  ;;  %v8541_v0 = vld [vmem:[%s10908_s10 + $0x18] sm:$0xff]  ;;  %6846 = vmatprep.subr.mxu0 %v10916_v57  ;;  %6921 = vmatprep.subr.mxu1 %v10916_v57  ;;  %vm614_vm1 = vcmask 146432   ;;  %s11116_s18 = sld [smem:[#allocation224_spill]] }
  0x5a   :  { %11054 = vst [vmem:[#allocation162_spill] sm:$0xff] %v8536_v63  ;;  %11055 = vst [vmem:[#allocation163_spill] sm:$0xff] %v8541_v0  ;;  %v8546_v59 = vld [vmem:[%s10908_s10 + $0x20] sm:$0xff]  ;;  %v8551_v61 = vld [vmem:[%s10908_s10 + $0x28] sm:$0xff]  ;;  %v11117_v56 = vmov 0.0   ;;  %vm7707_vm2 = vmmov 0  }
  0x5b   :  { %11056 = vst [vmem:[#allocation164_spill] sm:$0xff] %v8546_v59  ;;  %11057 = vst [vmem:[#allocation165_spill] sm:$0xff] %v8551_v61  ;;  %v8556_v62 = vld [vmem:[%s10908_s10 + $0x30] sm:$0xff]  ;;  %v8561_v63 = vld [vmem:[%s10908_s10 + $0x38] sm:$0xff]  ;;  %6852 = vmatprep.mubr.msk.f32.mxu0 %vm7707_vm2, %v11117_v56  ;;  %6927 = vmatprep.mubr.msk.f32.mxu1 %vm7707_vm2, %v11117_v56 }
  0x5c   :  { %11058 = vst [vmem:[#allocation166_spill] sm:$0xff] %v8556_v62  ;;  %11059 = vst [vmem:[#allocation167_spill] sm:$0xff] %v8561_v63  ;;  %v8566_v0 = vld [vmem:[%s10908_s10 + $0x40] sm:$0xff]  ;;  %v8571_v59 = vld [vmem:[%s10908_s10 + $0x48] sm:$0xff] }
  0x5d   :  { %11060 = vst [vmem:[#allocation168_spill] sm:$0xff] %v8566_v0  ;;  %11061 = vst [vmem:[#allocation169_spill] sm:$0xff] %v8571_v59  ;;  %v8576_v61 = vld [vmem:[%s10908_s10 + $0x50] sm:$0xff]  ;;  %v8581_v62 = vld [vmem:[%s10908_s10 + $0x58] sm:$0xff] }
  0x5e   :  { %11062 = vst [vmem:[#allocation170_spill] sm:$0xff] %v8576_v61  ;;  %11063 = vst [vmem:[#allocation171_spill] sm:$0xff] %v8581_v62  ;;  %v8586_v63 = vld [vmem:[%s10908_s10 + $0x60] sm:$0xff]  ;;  %v8591_v0 = vld [vmem:[%s10908_s10 + $0x68] sm:$0xff] }
  0x5f   :  { %11064 = vst [vmem:[#allocation172_spill] sm:$0xff] %v8586_v63  ;;  %11065 = vst [vmem:[#allocation173_spill] sm:$0xff] %v8591_v0  ;;  %v8596_v59 = vld [vmem:[%s10908_s10 + $0x70] sm:$0xff]  ;;  %v8601_v61 = vld [vmem:[%s10908_s10 + $0x78] sm:$0xff] }
  0x60   :  { %11066 = vst [vmem:[#allocation174_spill] sm:$0xff] %v8596_v59  ;;  %11067 = vst [vmem:[#allocation175_spill] sm:$0xff] %v8601_v61  ;;  %v8606_v62 = vld [vmem:[%s10908_s10 + $0x80] sm:$0xff]  ;;  %v8611_v63 = vld [vmem:[%s10908_s10 + $0x88] sm:$0xff] }
  0x61   :  { %11068 = vst [vmem:[#allocation176_spill] sm:$0xff] %v8606_v62  ;;  %11069 = vst [vmem:[#allocation177_spill] sm:$0xff] %v8611_v63  ;;  %v8616_v0 = vld [vmem:[%s10908_s10 + $0x90] sm:$0xff]  ;;  %v8621_v59 = vld [vmem:[%s10908_s10 + $0x98] sm:$0xff] }
  0x62   :  { %11070 = vst [vmem:[#allocation178_spill] sm:$0xff] %v8616_v0  ;;  %11071 = vst [vmem:[#allocation179_spill] sm:$0xff] %v8621_v59  ;;  %v8626_v61 = vld [vmem:[%s10908_s10 + $0xa0] sm:$0xff]  ;;  %v8631_v62 = vld [vmem:[%s10908_s10 + $0xa8] sm:$0xff] }
  0x63   :  { %11072 = vst [vmem:[#allocation180_spill] sm:$0xff] %v8626_v61  ;;  %11073 = vst [vmem:[#allocation181_spill] sm:$0xff] %v8631_v62  ;;  %v8636_v63 = vld [vmem:[%s10908_s10 + $0xb0] sm:$0xff]  ;;  %v8641_v0 = vld [vmem:[%s10908_s10 + $0xb8] sm:$0xff] }
  0x64   :  { %11074 = vst [vmem:[#allocation182_spill] sm:$0xff] %v8636_v63  ;;  %11075 = vst [vmem:[#allocation183_spill] sm:$0xff] %v8641_v0  ;;  %v8646_v59 = vld [vmem:[%s10908_s10 + $0xc0] sm:$0xff]  ;;  %v8651_v61 = vld [vmem:[%s10908_s10 + $0xc8] sm:$0xff] }
  0x65   :  { %11076 = vst [vmem:[#allocation184_spill] sm:$0xff] %v8646_v59  ;;  %11077 = vst [vmem:[#allocation185_spill] sm:$0xff] %v8651_v61  ;;  %v8656_v62 = vld [vmem:[%s10908_s10 + $0xd0] sm:$0xff]  ;;  %v8661_v63 = vld [vmem:[%s10908_s10 + $0xd8] sm:$0xff] }
  0x66   :  { %11078 = vst [vmem:[#allocation186_spill] sm:$0xff] %v8656_v62  ;;  %11079 = vst [vmem:[#allocation187_spill] sm:$0xff] %v8661_v63  ;;  %v8666_v0 = vld [vmem:[%s10908_s10 + $0xe0] sm:$0xff]  ;;  %v8671_v59 = vld [vmem:[%s10908_s10 + $0xe8] sm:$0xff] }
  0x67   :  { %11080 = vst [vmem:[#allocation188_spill] sm:$0xff] %v8666_v0  ;;  %11081 = vst [vmem:[#allocation189_spill] sm:$0xff] %v8671_v59  ;;  %v8676_v61 = vld [vmem:[%s10908_s10 + $0xf0] sm:$0xff]  ;;  %v8681_v62 = vld [vmem:[%s10908_s10 + $0xf8] sm:$0xff] }
  0x68   :  { %11082 = vst [vmem:[#allocation190_spill] sm:$0xff] %v8676_v61  ;;  %11083 = vst [vmem:[#allocation191_spill] sm:$0xff] %v8681_v62  ;;  %v8686_v63 = vld [vmem:[%s10908_s10 + $0x100] sm:$0xff]  ;;  %v8691_v0 = vld [vmem:[%s10908_s10 + $0x108] sm:$0xff] }
  0x69   :  { %11084 = vst [vmem:[#allocation192_spill] sm:$0xff] %v8686_v63  ;;  %11085 = vst [vmem:[#allocation193_spill] sm:$0xff] %v8691_v0  ;;  %v8696_v59 = vld [vmem:[%s10908_s10 + $0x110] sm:$0xff]  ;;  %v8701_v61 = vld [vmem:[%s10908_s10 + $0x118] sm:$0xff] }
  0x6a   :  { %11086 = vst [vmem:[#allocation194_spill] sm:$0xff] %v8696_v59  ;;  %11087 = vst [vmem:[#allocation195_spill] sm:$0xff] %v8701_v61  ;;  %v8706_v62 = vld [vmem:[%s10908_s10 + $0x120] sm:$0xff]  ;;  %v8711_v63 = vld [vmem:[%s10908_s10 + $0x128] sm:$0xff] }
  0x6b   :  { %11088 = vst [vmem:[#allocation196_spill] sm:$0xff] %v8706_v62  ;;  %11089 = vst [vmem:[#allocation197_spill] sm:$0xff] %v8711_v63  ;;  %v8716_v0 = vld [vmem:[%s10908_s10 + $0x130] sm:$0xff]  ;;  %v8721_v59 = vld [vmem:[%s10908_s10 + $0x138] sm:$0xff] }
  0x6c   :  { %11090 = vst [vmem:[#allocation198_spill] sm:$0xff] %v8716_v0  ;;  %11091 = vst [vmem:[#allocation199_spill] sm:$0xff] %v8721_v59  ;;  %v8726_v61 = vld [vmem:[%s10908_s10 + $0x140] sm:$0xff]  ;;  %v8731_v62 = vld [vmem:[%s10908_s10 + $0x148] sm:$0xff] }
  0x6d   :  { %11092 = vst [vmem:[#allocation200_spill] sm:$0xff] %v8726_v61  ;;  %11093 = vst [vmem:[#allocation201_spill] sm:$0xff] %v8731_v62  ;;  %v8736_v63 = vld [vmem:[%s10908_s10 + $0x150] sm:$0xff]  ;;  %v8741_v0 = vld [vmem:[%s10908_s10 + $0x158] sm:$0xff] }
  0x6e   :  { %11094 = vst [vmem:[#allocation202_spill] sm:$0xff] %v8736_v63  ;;  %11095 = vst [vmem:[#allocation203_spill] sm:$0xff] %v8741_v0  ;;  %v8746_v59 = vld [vmem:[%s10908_s10 + $0x160] sm:$0xff]  ;;  %v8751_v61 = vld [vmem:[%s10908_s10 + $0x168] sm:$0xff] }
  0x6f   :  { %11096 = vst [vmem:[#allocation204_spill] sm:$0xff] %v8746_v59  ;;  %11097 = vst [vmem:[#allocation205_spill] sm:$0xff] %v8751_v61  ;;  %v8756_v62 = vld [vmem:[%s10908_s10 + $0x170] sm:$0xff]  ;;  %v8761_v63 = vld [vmem:[%s10908_s10 + $0x178] sm:$0xff] }
  0x70   :  { %11098 = vst [vmem:[#allocation206_spill] sm:$0xff] %v8756_v62  ;;  %11099 = vst [vmem:[#allocation207_spill] sm:$0xff] %v8761_v63  ;;  %v8766_v0 = vld [vmem:[%s10908_s10 + $0x180] sm:$0xff]  ;;  %v8771_v59 = vld [vmem:[%s10908_s10 + $0x188] sm:$0xff] }
  0x71   :  { %11100 = vst [vmem:[#allocation208_spill] sm:$0xff] %v8766_v0  ;;  %11101 = vst [vmem:[#allocation209_spill] sm:$0xff] %v8771_v59  ;;  %v8776_v61 = vld [vmem:[%s10908_s10 + $0x190] sm:$0xff]  ;;  %v8781_v62 = vld [vmem:[%s10908_s10 + $0x198] sm:$0xff] }
  0x72   :  { %11102 = vst [vmem:[#allocation210_spill] sm:$0xff] %v8776_v61  ;;  %11103 = vst [vmem:[#allocation211_spill] sm:$0xff] %v8781_v62  ;;  %v8786_v63 = vld [vmem:[%s10908_s10 + $0x1a0] sm:$0xff]  ;;  %v8791_v0 = vld [vmem:[%s10908_s10 + $0x1a8] sm:$0xff] }
  0x73   :  { %11104 = vst [vmem:[#allocation212_spill] sm:$0xff] %v8786_v63  ;;  %11105 = vst [vmem:[#allocation213_spill] sm:$0xff] %v8791_v0  ;;  %v8796_v59 = vld [vmem:[%s10908_s10 + $0x1b0] sm:$0xff]  ;;  %v8801_v61 = vld [vmem:[%s10908_s10 + $0x1b8] sm:$0xff] }
  0x74   :  { %11106 = vst [vmem:[#allocation214_spill] sm:$0xff] %v8796_v59  ;;  %11107 = vst [vmem:[#allocation215_spill] sm:$0xff] %v8801_v61  ;;  %v8806_v62 = vld [vmem:[%s10908_s10 + $0x1c0] sm:$0xff]  ;;  %v8811_v63 = vld [vmem:[%s10908_s10 + $0x1c8] sm:$0xff] }
  0x75   :  { %11108 = vst [vmem:[#allocation216_spill] sm:$0xff] %v8806_v62  ;;  %11109 = vst [vmem:[#allocation217_spill] sm:$0xff] %v8811_v63  ;;  %v8816_v0 = vld [vmem:[%s10908_s10 + $0x1d0] sm:$0xff]  ;;  %v8821_v59 = vld [vmem:[%s10908_s10 + $0x1d8] sm:$0xff] }
  0x76   :  { %11110 = vst [vmem:[#allocation218_spill] sm:$0xff] %v8816_v0  ;;  %11111 = vst [vmem:[#allocation219_spill] sm:$0xff] %v8821_v59  ;;  %v8826_v61 = vld [vmem:[%s10908_s10 + $0x1e0] sm:$0xff]  ;;  %v8831_v62 = vld [vmem:[%s10908_s10 + $0x1e8] sm:$0xff] }
  0x77   :  { %11112 = vst [vmem:[#allocation220_spill] sm:$0xff] %v8826_v61  ;;  %11113 = vst [vmem:[#allocation221_spill] sm:$0xff] %v8831_v62  ;;  %v8836_v63 = vld [vmem:[%s10908_s10 + $0x1f0] sm:$0xff]  ;;  %v8841_v0 = vld [vmem:[%s10908_s10 + $0x1f8] sm:$0xff] }
  0x78   :  { %11114 = vst [vmem:[#allocation222_spill] sm:$0xff] %v8836_v63  ;;  %11115 = vst [vmem:[#allocation223_spill] sm:$0xff] %v8841_v0  ;;  %v724_v59 = vld [vmem:[#allocation13 + $0x28] sm:$0x3]  ;;  %v697_v60 = vld [vmem:[#allocation13 + $0x10] sm:$0x3] }
  0x79   :  { %v723_v61 = vld [vmem:[#allocation13 + $0x20] sm:$0xff]  ;;  %v696_v62 = vld [vmem:[#allocation13 + $0x8] sm:$0xff]  ;;  %6847 = vmatpush3.msk.msra.mxu0 %vm794_vm0, %v724_v59  ;;  %6922 = vmatpush3.msk.msra.mxu1 %vm794_vm0, %v697_v60  ;;  %v722_v63 = vld [vmem:[#allocation13 + $0x18] sm:$0xff]  ;;  %615 = vst.msk [vmem:[#allocation2] sm:$0xff] %vm614_vm1, %v10916_v57 }
  0x7a   :  { %616 = vst.msk [vmem:[#allocation2 + $0x8] sm:$0xff] %vm614_vm1, %v10916_v57  ;;  %617 = vst.msk [vmem:[#allocation2 + $0x10] sm:$0xff] %vm614_vm1, %v10916_v57  ;;  %v640_v59 = vld [vmem:[%s11116_s18] sm:$0xff]  ;;  %6848 = vmatprep.subr.mxu0 %v10916_v57  ;;  %6923 = vmatprep.subr.mxu1 %v10916_v57  ;;  %v642_v60 = vld [vmem:[%s11116_s18 + $0x8] sm:$0xff] }
  0x7b   :  { %618 = vst.msk [vmem:[#allocation2 + $0x18] sm:$0xff] %vm614_vm1, %v10916_v57  ;;  %619 = vst.msk [vmem:[#allocation2 + $0x20] sm:$0xff] %vm614_vm1, %v10916_v57  ;;  %v644_v0 = vld [vmem:[%s11116_s18 + $0x10] sm:$0xff]  ;;  %v646_v58 = vld [vmem:[%s11116_s18 + $0x18] sm:$0xff]  ;;  %6849 = vmatpush3.msra.mxu0 %v723_v61  ;;  %6924 = vmatpush3.msra.mxu1 %v696_v62 }
  0x7c   :  { %620 = vst.msk [vmem:[#allocation2 + $0x28] sm:$0xff] %vm614_vm1, %v10916_v57  ;;  %621 = vst.msk [vmem:[#allocation2 + $0x30] sm:$0xff] %vm614_vm1, %v10916_v57  ;;  %v695_v55 = vld [vmem:[#allocation13] sm:$0xff]  ;;  %6850 = vmatprep.subr.mxu0 %v11117_v56  ;;  %6925 = vmatprep.subr.mxu1 %v11117_v56  ;;  %v654_v61 = vld [vmem:[%s11116_s18 + $0x38] sm:$0xff] }
  0x7d   :  { %622 = vst.msk [vmem:[#allocation2 + $0x38] sm:$0xff] %vm614_vm1, %v10916_v57  ;;  %623 = vst.msk [vmem:[#allocation2 + $0x40] sm:$0xff] %vm614_vm1, %v10916_v57  ;;  %v656_v62 = vld [vmem:[%s11116_s18 + $0x40] sm:$0xff]  ;;  %6851 = vmatpush3.msra.mxu0 %v722_v63  ;;  %6926 = vmatpush3.msra.mxu1 %v695_v55  ;;  %v662_v63 = vld [vmem:[%s11116_s18 + $0x58] sm:$0xff] }
  0x7e   :  { %624 = vst.msk [vmem:[#allocation2 + $0x48] sm:$0xff] %vm614_vm1, %v10916_v57  ;;  %625 = vst.msk [vmem:[#allocation2 + $0x50] sm:$0xff] %vm614_vm1, %v10916_v57  ;;  %6996 = vmatprep.subr.mxu0 %v11117_v56  ;;  %v1256_v55 = vld [vmem:[#allocation13 + $0x40] sm:$0x3]  ;;  %7071 = vmatprep.subr.mxu1 %v11117_v56 }
  0x7f   :  { %626 = vst.msk [vmem:[#allocation2 + $0x58] sm:$0xff] %vm614_vm1, %v10916_v57  ;;  %627 = vst.msk [vmem:[#allocation2 + $0x60] sm:$0xff] %vm614_vm1, %v10916_v57 }
  0x80   :  { %628 = vst.msk [vmem:[#allocation2 + $0x68] sm:$0xff] %vm614_vm1, %v10916_v57  ;;  %629 = vst.msk [vmem:[#allocation2 + $0x70] sm:$0xff] %vm614_vm1, %v10916_v57 }
  0x81   :  { %630 = vst.msk [vmem:[#allocation2 + $0x78] sm:$0xff] %vm614_vm1, %v10916_v57  ;;  %631 = vst.msk [vmem:[#allocation2 + $0x80] sm:$0xff] %vm614_vm1, %v10916_v57 }
  0x82   :  { %632 = vst.msk [vmem:[#allocation2 + $0x88] sm:$0xff] %vm614_vm1, %v10916_v57  ;;  %633 = vst.msk [vmem:[#allocation2 + $0x90] sm:$0xff] %vm614_vm1, %v10916_v57 }
  0x83   :  { %634 = vst.msk [vmem:[#allocation2 + $0x98] sm:$0xff] %vm614_vm1, %v10916_v57  ;;  %635 = vst.msk [vmem:[#allocation2 + $0xa0] sm:$0xff] %vm614_vm1, %v10916_v57 }
  0x84   :  { %636 = vst.msk [vmem:[#allocation2 + $0xa8] sm:$0xff] %vm614_vm1, %v10916_v57  ;;  %637 = vst.msk [vmem:[#allocation2 + $0xb0] sm:$0xff] %vm614_vm1, %v10916_v57 }
  0x85   :  { %638 = vst.msk [vmem:[#allocation2 + $0xb8] sm:$0xff] %vm614_vm1, %v10916_v57  ;;  %639 = vst.msk [vmem:[#allocation2 + $0xc0] sm:$0xff] %vm614_vm1, %v10916_v57  ;;  %v650_v57 = vld [vmem:[%s11116_s18 + $0x28] sm:$0xff] }
  0x86   :  { %641 = vst.msk [vmem:[#allocation2 + $0xb] sm:$0xff] %vm614_vm1, %v640_v59  ;;  %643 = vst.msk [vmem:[#allocation2 + $0x15] sm:$0xff] %vm614_vm1, %v642_v60  ;;  %v648_v59 = vld [vmem:[%s11116_s18 + $0x20] sm:$0xff] }
  0x87   :  { %645 = vst.msk [vmem:[#allocation2 + $0x1f] sm:$0xff] %vm614_vm1, %v644_v0  ;;  %647 = vst.msk [vmem:[#allocation2 + $0x29] sm:$0xff] %vm614_vm1, %v646_v58  ;;  %v652_v58 = vld [vmem:[%s11116_s18 + $0x30] sm:$0xff]  ;;  %v664_v60 = vld [vmem:[%s11116_s18 + $0x60] sm:$0xff] }
  0x88   :  { %649 = vst.msk [vmem:[#allocation2 + $0x33] sm:$0xff] %vm614_vm1, %v648_v59  ;;  %651 = vst.msk [vmem:[#allocation2 + $0x3d] sm:$0xff] %vm614_vm1, %v650_v57  ;;  %v658_v57 = vld [vmem:[%s11116_s18 + $0x48] sm:$0xff]  ;;  %v660_v0 = vld [vmem:[%s11116_s18 + $0x50] sm:$0xff] }
  0x89   :  { %653 = vst.msk [vmem:[#allocation2 + $0x47] sm:$0xff] %vm614_vm1, %v652_v58  ;;  %655 = vst.msk [vmem:[#allocation2 + $0x51] sm:$0xff] %vm614_vm1, %v654_v61  ;;  %v666_v59 = vld [vmem:[%s11116_s18 + $0x68] sm:$0xff]  ;;  %v668_v58 = vld [vmem:[%s11116_s18 + $0x70] sm:$0xff] }
  0x8a   :  { %657 = vst.msk [vmem:[#allocation2 + $0x6f] sm:$0xff] %vm614_vm1, %v656_v62  ;;  %659 = vst.msk [vmem:[#allocation2 + $0x79] sm:$0xff] %vm614_vm1, %v658_v57  ;;  %v698_v61 = vld [vmem:[#allocation2 + $0x1] sm:$0xff] }
  0x8b   :  { %661 = vst.msk [vmem:[#allocation2 + $0x83] sm:$0xff] %vm614_vm1, %v660_v0  ;;  %663 = vst.msk [vmem:[#allocation2 + $0x8d] sm:$0xff] %vm614_vm1, %v662_v63  ;;  %v672_v62 = vld [vmem:[#allocation2] sm:$0xff]  ;;  %6853 = vmatmul.mubr.msk.f32.vlgmr.msra.gmra.mxu0 %vm614_vm1, %v698_v61 }
  0x8c   :  { %665 = vst.msk [vmem:[#allocation2 + $0x97] sm:$0xff] %vm614_vm1, %v664_v60  ;;  %667 = vst.msk [vmem:[#allocation2 + $0xa1] sm:$0xff] %vm614_vm1, %v666_v59  ;;  %6928 = vmatmul.mubr.msk.f32.vlgmr.msra.gmra.mxu1 %vm614_vm1, %v672_v62  ;;  %v1255_v57 = vld [vmem:[#allocation13 + $0x38] sm:$0xff]  ;;  %6997 = vmatpush3.msk.msra.mxu0 %vm794_vm0, %v1256_v55  ;;  %v1254_v59 = vld [vmem:[#allocation13 + $0x30] sm:$0xff] }
  0x8d   :  { %669 = vst.msk [vmem:[#allocation2 + $0xab] sm:$0xff] %vm614_vm1, %v668_v58  ;;  %v1558_v0 = vld [vmem:[#allocation13 + $0x58] sm:$0x3]  ;;  %6855 = vmatprep.mubr.msk.f32.mxu0 %vm7707_vm2, %v11117_v56  ;;  %v699_v63 = vld [vmem:[#allocation2 + $0x9] sm:$0xff]  ;;  %6930 = vmatprep.mubr.msk.f32.mxu1 %vm7707_vm2, %v11117_v56  ;;  %v1557_v58 = vld [vmem:[#allocation13 + $0x50] sm:$0xff] }
  0x8e   :  { %v673_v60 = vld [vmem:[#allocation2 + $0x8] sm:$0xff]  ;;  %6998 = vmatprep.subr.mxu0 %v11117_v56  ;;  %7072 = vmatpush3.msk.msra.mxu1 %vm794_vm0, %v1558_v0  ;;  %v700_v55 = vld [vmem:[#allocation2 + $0x11] sm:$0xff]  ;;  %v701_v62 = vld [vmem:[#allocation2 + $0x19] sm:$0xff] }
  0x8f   :  { %6999 = vmatpush3.msra.mxu0 %v1255_v57  ;;  %v674_v61 = vld [vmem:[#allocation2 + $0x10] sm:$0xff]  ;;  %7073 = vmatprep.subr.mxu1 %v11117_v56  ;;  %v675_v57 = vld [vmem:[#allocation2 + $0x18] sm:$0xff]  ;;  %v702_v0 = vld [vmem:[#allocation2 + $0x21] sm:$0xff] }
  0x90   :  { %6856 = vmatmul.mubr.msk.f32.gmra.mxu0 %vm614_vm1, %v699_v63  ;;  %6931 = vmatmul.mubr.msk.f32.gmra.mxu1 %vm614_vm1, %v673_v60  ;;  %v676_v63 = vld [vmem:[#allocation2 + $0x20] sm:$0xff]  ;;  %v1556_v60 = vld [vmem:[#allocation13 + $0x48] sm:$0xff] }
  0x91   :  { %6858 = vmatprep.mubr.msk.f32.mxu0 %vm7707_vm2, %v11117_v56  ;;  %6933 = vmatprep.mubr.msk.f32.mxu1 %vm7707_vm2, %v11117_v56 }
  0x92   :  { %7000 = vmatprep.subr.mxu0 %v11117_v56  ;;  %7074 = vmatpush3.msra.mxu1 %v1557_v58  ;;  %v677_v58 = vld [vmem:[#allocation2 + $0x28] sm:$0xff] }
  0x93   :  { %7001 = vmatpush3.msra.mxu0 %v1254_v59  ;;  %7075 = vmatprep.subr.mxu1 %v11117_v56  ;;  %v703_v59 = vld [vmem:[#allocation2 + $0x29] sm:$0xff] }
  0x94   :  { %6859 = vmatmul.mubr.msk.f32.gmra.mxu0 %vm614_vm1, %v700_v55  ;;  %6934 = vmatmul.mubr.msk.f32.gmra.mxu1 %vm614_vm1, %v674_v61 }
  0x95   :  { %6861 = vmatprep.mubr.msk.f32.mxu0 %vm7707_vm2, %v11117_v56  ;;  %6936 = vmatprep.mubr.msk.f32.mxu1 %vm7707_vm2, %v11117_v56 }
  0x96   :  { %7146 = vmatprep.subr.mxu0 %v11117_v56  ;;  %7076 = vmatpush3.msra.mxu1 %v1556_v60 }
  0x97   :  { %7221 = vmatprep.subr.mxu1 %v11117_v56 }
  0x98   :  { %6862 = vmatmul.mubr.msk.f32.gmra.mxu0 %vm614_vm1, %v701_v62  ;;  %6937 = vmatmul.mubr.msk.f32.gmra.mxu1 %vm614_vm1, %v675_v57 }
  0x99   :  { %6864 = vmatprep.mubr.msk.f32.mxu0 %vm7707_vm2, %v11117_v56  ;;  %6939 = vmatprep.mubr.msk.f32.mxu1 %vm7707_vm2, %v11117_v56 }
  0x9c   :  { %6865 = vmatmul.mubr.msk.f32.gmra.mxu0 %vm614_vm1, %v702_v0  ;;  %6940 = vmatmul.mubr.msk.f32.gmra.mxu1 %vm614_vm1, %v676_v63 }
  0x9d   :  { %6867 = vmatprep.mubr.msk.f32.mxu0 %vm7707_vm2, %v11117_v56  ;;  %6942 = vmatprep.mubr.msk.f32.mxu1 %vm7707_vm2, %v11117_v56 }
  0xa0   :  { %6868 = vmatmul.mubr.msk.f32.gmra.mxu0 %vm614_vm1, %v703_v59  ;;  %6943 = vmatmul.mubr.msk.f32.gmra.mxu1 %vm614_vm1, %v677_v58 }
  0xa1   :  { %601 = vsyncadd [#allocation11 + $0x2], 8192  ;;  %6870 = vmatprep.mubr.msk.f32.mxu0 %vm7707_vm2, %v11117_v56  ;;  %6945 = vmatprep.mubr.msk.f32.mxu1 %vm7707_vm2, %v11117_v56  ;;  %v704_v55 = vld [vmem:[#allocation2 + $0x31] sm:$0xff]  ;;  %v705_v62 = vld [vmem:[#allocation2 + $0x39] sm:$0xff] }
  0xa2   :  { %v678_v61 = vld [vmem:[#allocation2 + $0x30] sm:$0xff]  ;;  %v679_v57 = vld [vmem:[#allocation2 + $0x38] sm:$0xff]  ;;  %v706_v0 = vld [vmem:[#allocation2 + $0x41] sm:$0xff] }
  0xa3   :  { %v680_v63 = vld [vmem:[#allocation2 + $0x40] sm:$0xff]  ;;  %v707_v60 = vld [vmem:[#allocation2 + $0x49] sm:$0xff]  ;;  %v708_v58 = vld [vmem:[#allocation2 + $0x51] sm:$0xff] }
  0xa4   :  { %6871 = vmatmul.mubr.msk.f32.gmra.mxu0 %vm614_vm1, %v704_v55  ;;  %6946 = vmatmul.mubr.msk.f32.gmra.mxu1 %vm614_vm1, %v678_v61  ;;  %v681_v59 = vld [vmem:[#allocation2 + $0x48] sm:$0xff]  ;;  %v682_v55 = vld [vmem:[#allocation2 + $0x50] sm:$0xff]  ;;  %v709_v61 = vld [vmem:[#allocation2 + $0x59] sm:$0xff] }
  0xa5   :  { %6873 = vmatprep.mubr.msk.f32.mxu0 %vm7707_vm2, %v11117_v56  ;;  %6948 = vmatprep.mubr.msk.f32.mxu1 %vm7707_vm2, %v11117_v56  ;;  %v1837_v53 = vld [vmem:[#allocation2 + $0x23] sm:$0xff]  ;;  %v3068_v11 = vld [vmem:[#allocation13 + $0xd0] sm:$0x3] }
  0xa6   :  { %v9294_v54 = vld [vmem:[#allocation2 + $0x24] sm:$0xff] }
  0xa8   :  { %6874 = vmatmul.mubr.msk.f32.gmra.mxu0 %vm614_vm1, %v705_v62  ;;  %6949 = vmatmul.mubr.msk.f32.gmra.mxu1 %vm614_vm1, %v679_v57  ;;  %v683_v62 = vld [vmem:[#allocation2 + $0x58] sm:$0xff] }
  0xa9   :  { %6876 = vmatprep.mubr.msk.f32.mxu0 %vm7707_vm2, %v11117_v56  ;;  %6951 = vmatprep.mubr.msk.f32.mxu1 %vm7707_vm2, %v11117_v56  ;;  %v670_v57 = vld [vmem:[%s11116_s18 + $0x78] sm:$0xff]  ;;  %s7708_s18 = smov [#allocation10]  }
  0xaa   :  { %671 = vst.msk [vmem:[#allocation2 + $0xb5] sm:$0xff] %vm614_vm1, %v670_v57  ;;  %v714_v57 = vld [vmem:[#allocation2 + $0x81] sm:$0xff]  ;;  %s610_s5 = sshll.u32 %s7708_s18, 4  ;;  %s611_s5 = int_to_ptr.vmem [resolvable:$true] %s610_s5 }
  0xab   :  { %s7681_s7 = scalar_lea.vmem %s611_s5, 8192  ;;  %p7686_p6 = scmp.lt.s32.totalorder %s611_s5, %s611_s5 }
  0xac   :  { %6877 = vmatmul.mubr.msk.f32.gmra.mxu0 %vm614_vm1, %v706_v0  ;;  %6952 = vmatmul.mubr.msk.f32.gmra.mxu1 %vm614_vm1, %v680_v63  ;;  %v710_v0 = vld [vmem:[#allocation2 + $0x61] sm:$0xff]  ;;  %p7682_p5 = scmp.ne.s32.totalorder %s611_s5, %s7681_s7  ;;  %p7687_p7 = scmp.lt.s32.totalorder %s7681_s7, %s7681_s7 }
  0xad   :  { %6879 = vmatprep.mubr.msk.f32.mxu0 %vm7707_vm2, %v11117_v56  ;;  %6954 = vmatprep.mubr.msk.f32.mxu1 %vm7707_vm2, %v11117_v56  ;;  %v684_v63 = vld [vmem:[#allocation2 + $0x60] sm:$0xff] }
  0xae   :  { %p7688_p8 = por %p7687_p7, %p7686_p6 }
  0xb0   :  { %6880 = vmatmul.mubr.msk.f32.gmra.mxu0 %vm614_vm1, %v707_v60  ;;  %6955 = vmatmul.mubr.msk.f32.gmra.mxu1 %vm614_vm1, %v681_v59  ;;  %v711_v60 = vld [vmem:[#allocation2 + $0x69] sm:$0xff]  ;;  %p7689_p9 = pnand %p7688_p8, %p7682_p5 }
  0xb1   :  { %6882 = vmatprep.mubr.msk.f32.mxu0 %vm7707_vm2, %v11117_v56  ;;  %6957 = vmatprep.mubr.msk.f32.mxu1 %vm7707_vm2, %v11117_v56  ;;  %v685_v59 = vld [vmem:[#allocation2 + $0x68] sm:$0xff] }
  0xb4   :  { %6883 = vmatmul.mubr.msk.f32.gmra.mxu0 %vm614_vm1, %v708_v58  ;;  %6958 = vmatmul.mubr.msk.f32.gmra.mxu1 %vm614_vm1, %v682_v55  ;;  %v712_v58 = vld [vmem:[#allocation2 + $0x71] sm:$0xff] }
  0xb5   :  { %6885 = vmatprep.mubr.msk.f32.mxu0 %vm7707_vm2, %v11117_v56  ;;  %6960 = vmatprep.mubr.msk.f32.mxu1 %vm7707_vm2, %v11117_v56  ;;  %v686_v55 = vld [vmem:[#allocation2 + $0x70] sm:$0xff] }
  0xb8   :  { %6886 = vmatmul.mubr.msk.f32.gmra.mxu0 %vm614_vm1, %v709_v61  ;;  %6961 = vmatmul.mubr.msk.f32.gmra.mxu1 %vm614_vm1, %v683_v62  ;;  %v713_v61 = vld [vmem:[#allocation2 + $0x79] sm:$0xff] }
  0xb9   :  { %6888 = vmatprep.mubr.msk.f32.mxu0 %vm7707_vm2, %v11117_v56  ;;  %6963 = vmatprep.mubr.msk.f32.mxu1 %vm7707_vm2, %v11117_v56  ;;  %v687_v62 = vld [vmem:[#allocation2 + $0x78] sm:$0xff] }
  0xbc   :  { %6889 = vmatmul.mubr.msk.f32.gmra.mxu0 %vm614_vm1, %v710_v0  ;;  %6964 = vmatmul.mubr.msk.f32.gmra.mxu1 %vm614_vm1, %v684_v63  ;;  %v688_v0 = vld [vmem:[#allocation2 + $0x80] sm:$0xff]  ;;  %v715_v63 = vld [vmem:[#allocation2 + $0x89] sm:$0xff] }
  0xbd   :  { %6891 = vmatprep.mubr.msk.f32.mxu0 %vm7707_vm2, %v11117_v56  ;;  %6966 = vmatprep.mubr.msk.f32.mxu1 %vm7707_vm2, %v11117_v56 }
  0xc0   :  { %6892 = vmatmul.mubr.msk.f32.gmra.mxu0 %vm614_vm1, %v711_v60  ;;  %6967 = vmatmul.mubr.msk.f32.gmra.mxu1 %vm614_vm1, %v685_v59  ;;  %v689_v60 = vld [vmem:[#allocation2 + $0x88] sm:$0xff]  ;;  %v716_v59 = vld [vmem:[#allocation2 + $0x91] sm:$0xff] }
  0xc1   :  { %6894 = vmatprep.mubr.msk.f32.mxu0 %vm7707_vm2, %v11117_v56  ;;  %6969 = vmatprep.mubr.msk.f32.mxu1 %vm7707_vm2, %v11117_v56 }
  0xc4   :  { %6895 = vmatmul.mubr.msk.f32.gmra.mxu0 %vm614_vm1, %v712_v58  ;;  %6970 = vmatmul.mubr.msk.f32.gmra.mxu1 %vm614_vm1, %v686_v55  ;;  %v690_v58 = vld [vmem:[#allocation2 + $0x90] sm:$0xff]  ;;  %v717_v55 = vld [vmem:[#allocation2 + $0x99] sm:$0xff] }
  0xc5   :  { %6897 = vmatprep.mubr.msk.f32.mxu0 %vm7707_vm2, %v11117_v56  ;;  %6972 = vmatprep.mubr.msk.f32.mxu1 %vm7707_vm2, %v11117_v56 }
  0xc8   :  { %6898 = vmatmul.mubr.msk.f32.gmra.mxu0 %vm614_vm1, %v713_v61  ;;  %6973 = vmatmul.mubr.msk.f32.gmra.mxu1 %vm614_vm1, %v687_v62  ;;  %v691_v61 = vld [vmem:[#allocation2 + $0x98] sm:$0xff]  ;;  %v718_v62 = vld [vmem:[#allocation2 + $0xa1] sm:$0xff] }
  0xc9   :  { %6900 = vmatprep.mubr.msk.f32.mxu0 %vm7707_vm2, %v11117_v56  ;;  %6975 = vmatprep.mubr.msk.f32.mxu1 %vm7707_vm2, %v11117_v56 }
  0xcc   :  { %6901 = vmatmul.mubr.msk.f32.gmra.mxu0 %vm614_vm1, %v714_v57  ;;  %6976 = vmatmul.mubr.msk.f32.gmra.mxu1 %vm614_vm1, %v688_v0  ;;  %v692_v57 = vld [vmem:[#allocation2 + $0xa0] sm:$0xff]  ;;  %v719_v0 = vld [vmem:[#allocation2 + $0xa9] sm:$0xff] }
  0xcd   :  { %6903 = vmatprep.mubr.msk.f32.mxu0 %vm7707_vm2, %v11117_v56  ;;  %6978 = vmatprep.mubr.msk.f32.mxu1 %vm7707_vm2, %v11117_v56 }
  0xd0   :  { %6904 = vmatmul.mubr.msk.f32.gmra.mxu0 %vm614_vm1, %v715_v63  ;;  %6979 = vmatmul.mubr.msk.f32.gmra.mxu1 %vm614_vm1, %v689_v60  ;;  %v693_v63 = vld [vmem:[#allocation2 + $0xa8] sm:$0xff]  ;;  %v720_v60 = vld [vmem:[#allocation2 + $0xb1] sm:$0x3] }
  0xd1   :  { %6906 = vmatprep.mubr.msk.f32.mxu0 %vm7707_vm2, %v11117_v56  ;;  %6981 = vmatprep.mubr.msk.f32.mxu1 %vm7707_vm2, %v11117_v56 }
  0xd4   :  { %6907 = vmatmul.mubr.msk.f32.gmra.mxu0 %vm614_vm1, %v716_v59  ;;  %6982 = vmatmul.mubr.msk.f32.gmra.mxu1 %vm614_vm1, %v690_v58  ;;  %v694_v59 = vld [vmem:[#allocation2 + $0xb0] sm:$0x3]  ;;  %v1230_v58 = vld [vmem:[#allocation2 + $0x2] sm:$0xff] }
  0xd5   :  { %6909 = vmatprep.mubr.msk.f32.mxu0 %vm7707_vm2, %v11117_v56  ;;  %6984 = vmatprep.mubr.msk.f32.mxu1 %vm7707_vm2, %v11117_v56 }
  0xd8   :  { %6910 = vmatmul.mubr.msk.f32.gmra.mxu0 %vm614_vm1, %v717_v55  ;;  %6985 = vmatmul.mubr.msk.f32.gmra.mxu1 %vm614_vm1, %v691_v61  ;;  %v1532_v55 = vld [vmem:[#allocation2 + $0xa] sm:$0xff]  ;;  %v1860_v61 = vld [vmem:[#allocation13 + $0x70] sm:$0x3] }
  0xd9   :  { %6912 = vmatprep.mubr.msk.f32.mxu0 %vm7707_vm2, %v11117_v56  ;;  %6987 = vmatprep.mubr.msk.f32.mxu1 %vm7707_vm2, %v11117_v56 }
  0xdc   :  { %6913 = vmatmul.mubr.msk.f32.gmra.mxu0 %vm614_vm1, %v718_v62  ;;  %6988 = vmatmul.mubr.msk.f32.gmra.mxu1 %vm614_vm1, %v692_v57  ;;  %v1859_v62 = vld [vmem:[#allocation13 + $0x68] sm:$0xff] }
  0xdd   :  { %6915 = vmatprep.mubr.msk.f32.mxu0 %vm7707_vm2, %v11117_v56  ;;  %6990 = vmatprep.mubr.msk.f32.mxu1 %vm7707_vm2, %v11117_v56  ;;  %v2162_v57 = vld [vmem:[#allocation13 + $0x88] sm:$0x3] }
  0xe0   :  { %6916 = vmatmul.mubr.msk.f32.gmra.mxu0 %vm614_vm1, %v719_v0  ;;  %6991 = vmatmul.mubr.msk.f32.gmra.mxu1 %vm614_vm1, %v693_v63  ;;  %v1533_v0 = vld [vmem:[#allocation2 + $0x12] sm:$0xff]  ;;  %v1858_v63 = vld [vmem:[#allocation13 + $0x60] sm:$0xff] }
  0xe1   :  { %6918 = vmatprep.mubr.msk.f32.mxu0 %vm7707_vm2, %v11117_v56  ;;  %6993 = vmatprep.mubr.msk.f32.mxu1 %vm7707_vm2, %v11117_v56 }
  0xe4   :  { %6919 = vmatmul.mubr.msk.f32.gmra.mxu0 %vm614_vm1, %v720_v60  ;;  %6994 = vmatmul.mubr.msk.f32.gmra.mxu1 %vm614_vm1, %v694_v59  ;;  %v2161_v60 = vld [vmem:[#allocation13 + $0x80] sm:$0xff]  ;;  %v1534_v59 = vld [vmem:[#allocation2 + $0x1a] sm:$0xff] }
  0xe5   :  { %7002 = vmatprep.mubr.msk.f32.mxu0 %vm7707_vm2, %v11117_v56  ;;  %7077 = vmatprep.mubr.msk.f32.mxu1 %vm7707_vm2, %v11117_v56 }
  0xe8   :  { %7003 = vmatmul.mubr.msk.f32.vlgmr.msra.gmra.mxu0 %vm614_vm1, %v1230_v58  ;;  %7078 = vmatmul.mubr.msk.f32.vlgmr.msra.gmra.mxu1 %vm614_vm1, %v1532_v55  ;;  %v2160_v58 = vld [vmem:[#allocation13 + $0x78] sm:$0xff] }
  0xe9   :  { %7147 = vmatpush3.msk.msra.mxu0 %vm794_vm0, %v1860_v61  ;;  %7005 = vmatprep.mubr.msk.f32.mxu0 %vm7707_vm2, %v11117_v56  ;;  %v1536_v61 = vld [vmem:[#allocation2 + $0x2a] sm:$0xff] }
  0xea   :  { %7080 = vmatprep.mubr.msk.f32.mxu1 %vm7707_vm2, %v11117_v56  ;;  %7148 = vmatprep.subr.mxu0 %v11117_v56 }
  0xeb   :  { %7149 = vmatpush3.msra.mxu0 %v1859_v62  ;;  %7222 = vmatpush3.msk.msra.mxu1 %vm794_vm0, %v2162_v57  ;;  %v1537_v62 = vld [vmem:[#allocation2 + $0x32] sm:$0xff]  ;;  %v1538_v57 = vld [vmem:[#allocation2 + $0x3a] sm:$0xff] }
  0xec   :  { %7006 = vmatmul.mubr.msk.f32.gmra.mxu0 %vm614_vm1, %v1532_v55  ;;  %7081 = vmatmul.mubr.msk.f32.gmra.mxu1 %vm614_vm1, %v1533_v0  ;;  %v1535_v55 = vld [vmem:[#allocation2 + $0x22] sm:$0xff] }
  0xed   :  { %7008 = vmatprep.mubr.msk.f32.mxu0 %vm7707_vm2, %v11117_v56  ;;  %7083 = vmatprep.mubr.msk.f32.mxu1 %vm7707_vm2, %v11117_v56 }
  0xee   :  { %7150 = vmatprep.subr.mxu0 %v11117_v56  ;;  %7223 = vmatprep.subr.mxu1 %v11117_v56 }
  0xef   :  { %7151 = vmatpush3.msra.mxu0 %v1858_v63  ;;  %7224 = vmatpush3.msra.mxu1 %v2161_v60  ;;  %v1540_v63 = vld [vmem:[#allocation2 + $0x4a] sm:$0xff]  ;;  %v1541_v60 = vld [vmem:[#allocation2 + $0x52] sm:$0xff] }
  0xf0   :  { %7009 = vmatmul.mubr.msk.f32.gmra.mxu0 %vm614_vm1, %v1533_v0  ;;  %7084 = vmatmul.mubr.msk.f32.gmra.mxu1 %vm614_vm1, %v1534_v59  ;;  %v1539_v0 = vld [vmem:[#allocation2 + $0x42] sm:$0xff] }
  0xf1   :  { %7011 = vmatprep.mubr.msk.f32.mxu0 %vm7707_vm2, %v11117_v56  ;;  %7086 = vmatprep.mubr.msk.f32.mxu1 %vm7707_vm2, %v11117_v56 }
  0xf2   :  { %7296 = vmatprep.subr.mxu0 %v11117_v56  ;;  %7225 = vmatprep.subr.mxu1 %v11117_v56 }
  0xf3   :  { %7226 = vmatpush3.msra.mxu1 %v2160_v58  ;;  %v1543_v58 = vld [vmem:[#allocation2 + $0x62] sm:$0xff] }
  0xf4   :  { %7012 = vmatmul.mubr.msk.f32.gmra.mxu0 %vm614_vm1, %v1534_v59  ;;  %7087 = vmatmul.mubr.msk.f32.gmra.mxu1 %vm614_vm1, %v1535_v55  ;;  %v1542_v59 = vld [vmem:[#allocation2 + $0x5a] sm:$0xff] }
  0xf5   :  { %7014 = vmatprep.mubr.msk.f32.mxu0 %vm7707_vm2, %v11117_v56  ;;  %7089 = vmatprep.mubr.msk.f32.mxu1 %vm7707_vm2, %v11117_v56 }
  0xf6   :  { %7371 = vmatprep.subr.mxu1 %v11117_v56 }
  0xf8   :  { %7015 = vmatmul.mubr.msk.f32.gmra.mxu0 %vm614_vm1, %v1535_v55  ;;  %7090 = vmatmul.mubr.msk.f32.gmra.mxu1 %vm614_vm1, %v1536_v61  ;;  %v1544_v55 = vld [vmem:[#allocation2 + $0x6a] sm:$0xff] }
  0xf9   :  { %7017 = vmatprep.mubr.msk.f32.mxu0 %vm7707_vm2, %v11117_v56  ;;  %7092 = vmatprep.mubr.msk.f32.mxu1 %vm7707_vm2, %v11117_v56 }
  0xfc   :  { %7018 = vmatmul.mubr.msk.f32.gmra.mxu0 %vm614_vm1, %v1536_v61  ;;  %7093 = vmatmul.mubr.msk.f32.gmra.mxu1 %vm614_vm1, %v1537_v62  ;;  %v1545_v61 = vld [vmem:[#allocation2 + $0x72] sm:$0xff] }
  0xfd   :  { %7020 = vmatprep.mubr.msk.f32.mxu0 %vm7707_vm2, %v11117_v56  ;;  %7095 = vmatprep.mubr.msk.f32.mxu1 %vm7707_vm2, %v11117_v56 }
 0x100   :  { %7021 = vmatmul.mubr.msk.f32.gmra.mxu0 %vm614_vm1, %v1537_v62  ;;  %7096 = vmatmul.mubr.msk.f32.gmra.mxu1 %vm614_vm1, %v1538_v57  ;;  %v1546_v62 = vld [vmem:[#allocation2 + $0x7a] sm:$0xff] }
 0x101   :  { %7023 = vmatprep.mubr.msk.f32.mxu0 %vm7707_vm2, %v11117_v56  ;;  %7098 = vmatprep.mubr.msk.f32.mxu1 %vm7707_vm2, %v11117_v56 }
 0x104   :  { %7024 = vmatmul.mubr.msk.f32.gmra.mxu0 %vm614_vm1, %v1538_v57  ;;  %7099 = vmatmul.mubr.msk.f32.gmra.mxu1 %vm614_vm1, %v1539_v0  ;;  %v1547_v57 = vld [vmem:[#allocation2 + $0x82] sm:$0xff] }
 0x105   :  { %7026 = vmatprep.mubr.msk.f32.mxu0 %vm7707_vm2, %v11117_v56  ;;  %7101 = vmatprep.mubr.msk.f32.mxu1 %vm7707_vm2, %v11117_v56 }
 0x108   :  { %7027 = vmatmul.mubr.msk.f32.gmra.mxu0 %vm614_vm1, %v1539_v0  ;;  %7102 = vmatmul.mubr.msk.f32.gmra.mxu1 %vm614_vm1, %v1540_v63  ;;  %v1548_v0 = vld [vmem:[#allocation2 + $0x8a] sm:$0xff] }
 0x109   :  { %7029 = vmatprep.mubr.msk.f32.mxu0 %vm7707_vm2, %v11117_v56  ;;  %7104 = vmatprep.mubr.msk.f32.mxu1 %vm7707_vm2, %v11117_v56 }
 0x10c   :  { %7030 = vmatmul.mubr.msk.f32.gmra.mxu0 %vm614_vm1, %v1540_v63  ;;  %7105 = vmatmul.mubr.msk.f32.gmra.mxu1 %vm614_vm1, %v1541_v60  ;;  %v1549_v63 = vld [vmem:[#allocation2 + $0x92] sm:$0xff] }
 0x10d   :  { %7032 = vmatprep.mubr.msk.f32.mxu0 %vm7707_vm2, %v11117_v56  ;;  %7107 = vmatprep.mubr.msk.f32.mxu1 %vm7707_vm2, %v11117_v56 }
 0x110   :  { %7033 = vmatmul.mubr.msk.f32.gmra.mxu0 %vm614_vm1, %v1541_v60  ;;  %7108 = vmatmul.mubr.msk.f32.gmra.mxu1 %vm614_vm1, %v1542_v59  ;;  %v1550_v60 = vld [vmem:[#allocation2 + $0x9a] sm:$0xff] }
 0x111   :  { %7035 = vmatprep.mubr.msk.f32.mxu0 %vm7707_vm2, %v11117_v56  ;;  %7110 = vmatprep.mubr.msk.f32.mxu1 %vm7707_vm2, %v11117_v56 }
 0x114   :  { %7036 = vmatmul.mubr.msk.f32.gmra.mxu0 %vm614_vm1, %v1542_v59  ;;  %7111 = vmatmul.mubr.msk.f32.gmra.mxu1 %vm614_vm1, %v1543_v58  ;;  %v1551_v59 = vld [vmem:[#allocation2 + $0xa2] sm:$0xff] }
 0x115   :  { %7038 = vmatprep.mubr.msk.f32.mxu0 %vm7707_vm2, %v11117_v56  ;;  %7113 = vmatprep.mubr.msk.f32.mxu1 %vm7707_vm2, %v11117_v56 }
 0x118   :  { %7039 = vmatmul.mubr.msk.f32.gmra.mxu0 %vm614_vm1, %v1543_v58  ;;  %7114 = vmatmul.mubr.msk.f32.gmra.mxu1 %vm614_vm1, %v1544_v55  ;;  %v1552_v58 = vld [vmem:[#allocation2 + $0xaa] sm:$0xff] }
 0x119   :  { %7041 = vmatprep.mubr.msk.f32.mxu0 %vm7707_vm2, %v11117_v56  ;;  %7116 = vmatprep.mubr.msk.f32.mxu1 %vm7707_vm2, %v11117_v56 }
 0x11c   :  { %7042 = vmatmul.mubr.msk.f32.gmra.mxu0 %vm614_vm1, %v1544_v55  ;;  %7117 = vmatmul.mubr.msk.f32.gmra.mxu1 %vm614_vm1, %v1545_v61  ;;  %v1553_v55 = vld [vmem:[#allocation2 + $0xb2] sm:$0xff] }
 0x11d   :  { %7044 = vmatprep.mubr.msk.f32.mxu0 %vm7707_vm2, %v11117_v56  ;;  %7119 = vmatprep.mubr.msk.f32.mxu1 %vm7707_vm2, %v11117_v56 }
 0x120   :  { %7045 = vmatmul.mubr.msk.f32.gmra.mxu0 %vm614_vm1, %v1545_v61  ;;  %7120 = vmatmul.mubr.msk.f32.gmra.mxu1 %vm614_vm1, %v1546_v62  ;;  %v1252_v61 = vld [vmem:[#allocation2 + $0xb2] sm:$0x3] }
 0x121   :  { %7047 = vmatprep.mubr.msk.f32.mxu0 %vm7707_vm2, %v11117_v56  ;;  %7122 = vmatprep.mubr.msk.f32.mxu1 %vm7707_vm2, %v11117_v56 }
 0x124   :  { %7048 = vmatmul.mubr.msk.f32.gmra.mxu0 %vm614_vm1, %v1546_v62  ;;  %7123 = vmatmul.mubr.msk.f32.gmra.mxu1 %vm614_vm1, %v1547_v57  ;;  %v1554_v62 = vld [vmem:[#allocation2 + $0xba] sm:$0x3] }
 0x125   :  { %7050 = vmatprep.mubr.msk.f32.mxu0 %vm7707_vm2, %v11117_v56  ;;  %7125 = vmatprep.mubr.msk.f32.mxu1 %vm7707_vm2, %v11117_v56 }
 0x128   :  { %7051 = vmatmul.mubr.msk.f32.gmra.mxu0 %vm614_vm1, %v1547_v57  ;;  %7126 = vmatmul.mubr.msk.f32.gmra.mxu1 %vm614_vm1, %v1548_v0  ;;  %v1834_v57 = vld [vmem:[#allocation2 + $0xb] sm:$0xff] }
 0x129   :  { %7053 = vmatprep.mubr.msk.f32.mxu0 %vm7707_vm2, %v11117_v56  ;;  %7128 = vmatprep.mubr.msk.f32.mxu1 %vm7707_vm2, %v11117_v56 }
 0x12c   :  { %7054 = vmatmul.mubr.msk.f32.gmra.mxu0 %vm614_vm1, %v1548_v0  ;;  %7129 = vmatmul.mubr.msk.f32.gmra.mxu1 %vm614_vm1, %v1549_v63  ;;  %v2136_v0 = vld [vmem:[#allocation2 + $0xc] sm:$0xff] }
 0x12d   :  { %7056 = vmatprep.mubr.msk.f32.mxu0 %vm7707_vm2, %v11117_v56  ;;  %7131 = vmatprep.mubr.msk.f32.mxu1 %vm7707_vm2, %v11117_v56 }
 0x130   :  { %7057 = vmatmul.mubr.msk.f32.gmra.mxu0 %vm614_vm1, %v1549_v63  ;;  %7132 = vmatmul.mubr.msk.f32.gmra.mxu1 %vm614_vm1, %v1550_v60  ;;  %v2464_v63 = vld [vmem:[#allocation13 + $0xa0] sm:$0x3] }
 0x131   :  { %7059 = vmatprep.mubr.msk.f32.mxu0 %vm7707_vm2, %v11117_v56  ;;  %7134 = vmatprep.mubr.msk.f32.mxu1 %vm7707_vm2, %v11117_v56 }
 0x134   :  { %7060 = vmatmul.mubr.msk.f32.gmra.mxu0 %vm614_vm1, %v1550_v60  ;;  %7135 = vmatmul.mubr.msk.f32.gmra.mxu1 %vm614_vm1, %v1551_v59  ;;  %v2463_v60 = vld [vmem:[#allocation13 + $0x98] sm:$0xff] }
 0x135   :  { %7062 = vmatprep.mubr.msk.f32.mxu0 %vm7707_vm2, %v11117_v56  ;;  %7137 = vmatprep.mubr.msk.f32.mxu1 %vm7707_vm2, %v11117_v56 }
 0x138   :  { %7063 = vmatmul.mubr.msk.f32.gmra.mxu0 %vm614_vm1, %v1551_v59  ;;  %7138 = vmatmul.mubr.msk.f32.gmra.mxu1 %vm614_vm1, %v1552_v58  ;;  %v2766_v59 = vld [vmem:[#allocation13 + $0xb8] sm:$0x3] }
 0x139   :  { %7065 = vmatprep.mubr.msk.f32.mxu0 %vm7707_vm2, %v11117_v56  ;;  %7140 = vmatprep.mubr.msk.f32.mxu1 %vm7707_vm2, %v11117_v56 }
 0x13c   :  { %7066 = vmatmul.mubr.msk.f32.gmra.mxu0 %vm614_vm1, %v1552_v58  ;;  %7141 = vmatmul.mubr.msk.f32.gmra.mxu1 %vm614_vm1, %v1553_v55  ;;  %v1835_v58 = vld [vmem:[#allocation2 + $0x13] sm:$0xff] }
 0x13d   :  { %7068 = vmatprep.mubr.msk.f32.mxu0 %vm7707_vm2, %v11117_v56  ;;  %7143 = vmatprep.mubr.msk.f32.mxu1 %vm7707_vm2, %v11117_v56  ;;  %v9268_v55 = vld [vmem:[#allocation2 + $0x14] sm:$0xff] }
 0x140   :  { %7069 = vmatmul.mubr.msk.f32.gmra.mxu0 %vm614_vm1, %v1252_v61  ;;  %7144 = vmatmul.mubr.msk.f32.gmra.mxu1 %vm614_vm1, %v1554_v62  ;;  %v2462_v61 = vld [vmem:[#allocation13 + $0x90] sm:$0xff] }
 0x141   :  { %7152 = vmatprep.mubr.msk.f32.mxu0 %vm7707_vm2, %v11117_v56  ;;  %7227 = vmatprep.mubr.msk.f32.mxu1 %vm7707_vm2, %v11117_v56  ;;  %v2765_v62 = vld [vmem:[#allocation13 + $0xb0] sm:$0xff] }
 0x144   :  { %7153 = vmatmul.mubr.msk.f32.vlgmr.msra.gmra.mxu0 %vm614_vm1, %v1834_v57  ;;  %7228 = vmatmul.mubr.msk.f32.vlgmr.msra.gmra.mxu1 %vm614_vm1, %v2136_v0  ;;  %v1836_v57 = vld [vmem:[#allocation2 + $0x1b] sm:$0xff] }
 0x145   :  { %7297 = vmatpush3.msk.msra.mxu0 %vm794_vm0, %v2464_v63  ;;  %7155 = vmatprep.mubr.msk.f32.mxu0 %vm7707_vm2, %v11117_v56  ;;  %v9281_v0 = vld [vmem:[#allocation2 + $0x1c] sm:$0xff] }
 0x146   :  { %7230 = vmatprep.mubr.msk.f32.mxu1 %vm7707_vm2, %v11117_v56  ;;  %7298 = vmatprep.subr.mxu0 %v11117_v56 }
 0x147   :  { %7299 = vmatpush3.msra.mxu0 %v2463_v60  ;;  %7372 = vmatpush3.msk.msra.mxu1 %vm794_vm0, %v2766_v59  ;;  %v2764_v59 = vld [vmem:[#allocation13 + $0xa8] sm:$0xff] }
 0x148   :  { %7156 = vmatmul.mubr.msk.f32.gmra.mxu0 %vm614_vm1, %v1835_v58  ;;  %7231 = vmatmul.mubr.msk.f32.gmra.mxu1 %vm614_vm1, %v9268_v55 }
 0x149   :  { %7158 = vmatprep.mubr.msk.f32.mxu0 %vm7707_vm2, %v11117_v56  ;;  %7233 = vmatprep.mubr.msk.f32.mxu1 %vm7707_vm2, %v11117_v56 }
 0x14a   :  { %7300 = vmatprep.subr.mxu0 %v11117_v56  ;;  %7373 = vmatprep.subr.mxu1 %v11117_v56 }
 0x14b   :  { %7301 = vmatpush3.msra.mxu0 %v2462_v61  ;;  %7374 = vmatpush3.msra.mxu1 %v2765_v62  ;;  %v864_v63 = vpop.f32.mrf.mxu0 }
 0x14c   :  { %v1116_v60 = vpop.f32.mrf.mxu1  ;;  %7159 = vmatmul.mubr.msk.f32.gmra.mxu0 %vm614_vm1, %v1836_v57  ;;  %7234 = vmatmul.mubr.msk.f32.gmra.mxu1 %vm614_vm1, %v9281_v0 }
 0x14d   :  { %v9288_v58 = vadd.f32 %v1116_v60, %v864_v63  ;;  %7161 = vmatprep.mubr.msk.f32.mxu0 %vm7707_vm2, %v11117_v56  ;;  %7236 = vmatprep.mubr.msk.f32.mxu1 %vm7707_vm2, %v11117_v56  ;;  %v6854_v61 = vpop.f32.mrf.mxu0  ;;  %v1838_v60 = vld [vmem:[#allocation2 + $0x2b] sm:$0xff] }
 0x14e   :  { %v6929_v62 = vpop.f32.mrf.mxu1  ;;  %7446 = vmatprep.subr.mxu0 %v11117_v56  ;;  %7375 = vmatprep.subr.mxu1 %v11117_v56  ;;  %v9307_v61 = vld [vmem:[#allocation2 + $0x2c] sm:$0xff] }
 0x14f   :  { %7376 = vmatpush3.msra.mxu1 %v2764_v59 }
 0x150   :  { %v869_v57 = vpop.f32.mrf.mxu0  ;;  %v1121_v51 = vpop.f32.mrf.mxu1  ;;  %7162 = vmatmul.mubr.msk.f32.gmra.mxu0 %vm614_vm1, %v1837_v53  ;;  %7237 = vmatmul.mubr.msk.f32.gmra.mxu1 %vm614_vm1, %v9294_v54  ;;  %v1839_v53 = vld [vmem:[#allocation2 + $0x33] sm:$0xff] }
 0x151   :  { %v9301_v63 = vadd.f32 %v1121_v51, %v869_v57  ;;  %7164 = vmatprep.mubr.msk.f32.mxu0 %vm7707_vm2, %v11117_v56  ;;  %7239 = vmatprep.mubr.msk.f32.mxu1 %vm7707_vm2, %v11117_v56  ;;  %v9318_v57 = vld [vmem:[#allocation2 + $0x34] sm:$0xff] }
 0x152   :  { %v6857_v62 = vpop.f32.mrf.mxu0  ;;  %v6932_v59 = vpop.f32.mrf.mxu1 }
 0x154   :  { %v874_v52 = vpop.f32.mrf.mxu0  ;;  %v1126_v49 = vpop.f32.mrf.mxu1  ;;  %7165 = vmatmul.mubr.msk.f32.gmra.mxu0 %vm614_vm1, %v1838_v60  ;;  %7240 = vmatmul.mubr.msk.f32.gmra.mxu1 %vm614_vm1, %v9307_v61  ;;  %v9329_v60 = vld [vmem:[#allocation2 + $0x3c] sm:$0xff] }
 0x155   :  { %v9312_v51 = vadd.f32 %v1126_v49, %v874_v52  ;;  %7167 = vmatprep.mubr.msk.f32.mxu0 %vm7707_vm2, %v11117_v56  ;;  %7242 = vmatprep.mubr.msk.f32.mxu1 %vm7707_vm2, %v11117_v56  ;;  %v1840_v52 = vld [vmem:[#allocation2 + $0x3b] sm:$0xff] }
 0x156   :  { %v6860_v62 = vpop.f32.mrf.mxu0  ;;  %v6935_v59 = vpop.f32.mrf.mxu1 }
 0x158   :  { %v879_v50 = vpop.f32.mrf.mxu0  ;;  %v1131_v47 = vpop.f32.mrf.mxu1  ;;  %7168 = vmatmul.mubr.msk.f32.gmra.mxu0 %vm614_vm1, %v1839_v53  ;;  %7243 = vmatmul.mubr.msk.f32.gmra.mxu1 %vm614_vm1, %v9318_v57  ;;  %v9340_v53 = vld [vmem:[#allocation2 + $0x44] sm:$0xff] }
 0x159   :  { %v9323_v49 = vadd.f32 %v1131_v47, %v879_v50  ;;  %7170 = vmatprep.mubr.msk.f32.mxu0 %vm7707_vm2, %v11117_v56  ;;  %7245 = vmatprep.mubr.msk.f32.mxu1 %vm7707_vm2, %v11117_v56  ;;  %v1841_v50 = vld [vmem:[#allocation2 + $0x43] sm:$0xff] }
 0x15a   :  { %v6863_v62 = vpop.f32.mrf.mxu0  ;;  %v6938_v59 = vpop.f32.mrf.mxu1 }
 0x15c   :  { %v884_v48 = vpop.f32.mrf.mxu0  ;;  %v1136_v45 = vpop.f32.mrf.mxu1  ;;  %7171 = vmatmul.mubr.msk.f32.gmra.mxu0 %vm614_vm1, %v1840_v52  ;;  %7246 = vmatmul.mubr.msk.f32.gmra.mxu1 %vm614_vm1, %v9329_v60  ;;  %v9351_v52 = vld [vmem:[#allocation2 + $0x4c] sm:$0xff] }
 0x15d   :  { %v9334_v47 = vadd.f32 %v1136_v45, %v884_v48  ;;  %7173 = vmatprep.mubr.msk.f32.mxu0 %vm7707_vm2, %v11117_v56  ;;  %7248 = vmatprep.mubr.msk.f32.mxu1 %vm7707_vm2, %v11117_v56  ;;  %v1842_v48 = vld [vmem:[#allocation2 + $0x4b] sm:$0xff] }
 0x15e   :  { %v6866_v62 = vpop.f32.mrf.mxu0  ;;  %v6941_v59 = vpop.f32.mrf.mxu1 }
 0x160   :  { %v889_v46 = vpop.f32.mrf.mxu0  ;;  %v1141_v43 = vpop.f32.mrf.mxu1  ;;  %7174 = vmatmul.mubr.msk.f32.gmra.mxu0 %vm614_vm1, %v1841_v50  ;;  %7249 = vmatmul.mubr.msk.f32.gmra.mxu1 %vm614_vm1, %v9340_v53  ;;  %v9362_v50 = vld [vmem:[#allocation2 + $0x54] sm:$0xff] }
 0x161   :  { %v9345_v45 = vadd.f32 %v1141_v43, %v889_v46  ;;  %7176 = vmatprep.mubr.msk.f32.mxu0 %vm7707_vm2, %v11117_v56  ;;  %7251 = vmatprep.mubr.msk.f32.mxu1 %vm7707_vm2, %v11117_v56  ;;  %v1843_v46 = vld [vmem:[#allocation2 + $0x53] sm:$0xff] }
 0x162   :  { %v6869_v62 = vpop.f32.mrf.mxu0  ;;  %v6944_v59 = vpop.f32.mrf.mxu1 }
 0x164   :  { %v894_v44 = vpop.f32.mrf.mxu0  ;;  %v1146_v41 = vpop.f32.mrf.mxu1  ;;  %7177 = vmatmul.mubr.msk.f32.gmra.mxu0 %vm614_vm1, %v1842_v48  ;;  %7252 = vmatmul.mubr.msk.f32.gmra.mxu1 %vm614_vm1, %v9351_v52  ;;  %v9373_v48 = vld [vmem:[#allocation2 + $0x5c] sm:$0xff] }
 0x165   :  { %v9356_v43 = vadd.f32 %v1146_v41, %v894_v44  ;;  %7179 = vmatprep.mubr.msk.f32.mxu0 %vm7707_vm2, %v11117_v56  ;;  %7254 = vmatprep.mubr.msk.f32.mxu1 %vm7707_vm2, %v11117_v56  ;;  %v1844_v44 = vld [vmem:[#allocation2 + $0x5b] sm:$0xff] }
 0x166   :  { %v6872_v62 = vpop.f32.mrf.mxu0  ;;  %v6947_v59 = vpop.f32.mrf.mxu1 }
 0x168   :  { %v899_v42 = vpop.f32.mrf.mxu0  ;;  %v1151_v39 = vpop.f32.mrf.mxu1  ;;  %7180 = vmatmul.mubr.msk.f32.gmra.mxu0 %vm614_vm1, %v1843_v46  ;;  %7255 = vmatmul.mubr.msk.f32.gmra.mxu1 %vm614_vm1, %v9362_v50  ;;  %v9384_v46 = vld [vmem:[#allocation2 + $0x64] sm:$0xff] }
 0x169   :  { %v9367_v41 = vadd.f32 %v1151_v39, %v899_v42  ;;  %7182 = vmatprep.mubr.msk.f32.mxu0 %vm7707_vm2, %v11117_v56  ;;  %7257 = vmatprep.mubr.msk.f32.mxu1 %vm7707_vm2, %v11117_v56  ;;  %v1845_v42 = vld [vmem:[#allocation2 + $0x63] sm:$0xff] }
 0x16a   :  { %v6875_v62 = vpop.f32.mrf.mxu0  ;;  %v6950_v59 = vpop.f32.mrf.mxu1 }
 0x16c   :  { %v904_v40 = vpop.f32.mrf.mxu0  ;;  %v1156_v37 = vpop.f32.mrf.mxu1  ;;  %7183 = vmatmul.mubr.msk.f32.gmra.mxu0 %vm614_vm1, %v1844_v44  ;;  %7258 = vmatmul.mubr.msk.f32.gmra.mxu1 %vm614_vm1, %v9373_v48  ;;  %v9395_v44 = vld [vmem:[#allocation2 + $0x6c] sm:$0xff] }
 0x16d   :  { %v9378_v39 = vadd.f32 %v1156_v37, %v904_v40  ;;  %7185 = vmatprep.mubr.msk.f32.mxu0 %vm7707_vm2, %v11117_v56  ;;  %7260 = vmatprep.mubr.msk.f32.mxu1 %vm7707_vm2, %v11117_v56  ;;  %v1846_v40 = vld [vmem:[#allocation2 + $0x6b] sm:$0xff] }
 0x16e   :  { %v6878_v62 = vpop.f32.mrf.mxu0  ;;  %v6953_v59 = vpop.f32.mrf.mxu1 }
 0x170   :  { %v909_v38 = vpop.f32.mrf.mxu0  ;;  %v1161_v35 = vpop.f32.mrf.mxu1  ;;  %7186 = vmatmul.mubr.msk.f32.gmra.mxu0 %vm614_vm1, %v1845_v42  ;;  %7261 = vmatmul.mubr.msk.f32.gmra.mxu1 %vm614_vm1, %v9384_v46  ;;  %v9406_v42 = vld [vmem:[#allocation2 + $0x74] sm:$0xff] }
 0x171   :  { %v9389_v37 = vadd.f32 %v1161_v35, %v909_v38  ;;  %7188 = vmatprep.mubr.msk.f32.mxu0 %vm7707_vm2, %v11117_v56  ;;  %7263 = vmatprep.mubr.msk.f32.mxu1 %vm7707_vm2, %v11117_v56  ;;  %v1847_v38 = vld [vmem:[#allocation2 + $0x73] sm:$0xff] }
 0x172   :  { %v6881_v62 = vpop.f32.mrf.mxu0  ;;  %v6956_v59 = vpop.f32.mrf.mxu1 }
 0x174   :  { %v914_v36 = vpop.f32.mrf.mxu0  ;;  %v1166_v33 = vpop.f32.mrf.mxu1  ;;  %7189 = vmatmul.mubr.msk.f32.gmra.mxu0 %vm614_vm1, %v1846_v40  ;;  %7264 = vmatmul.mubr.msk.f32.gmra.mxu1 %vm614_vm1, %v9395_v44  ;;  %v9417_v40 = vld [vmem:[#allocation2 + $0x7c] sm:$0xff] }
 0x175   :  { %v9400_v35 = vadd.f32 %v1166_v33, %v914_v36  ;;  %7191 = vmatprep.mubr.msk.f32.mxu0 %vm7707_vm2, %v11117_v56  ;;  %7266 = vmatprep.mubr.msk.f32.mxu1 %vm7707_vm2, %v11117_v56  ;;  %v1848_v36 = vld [vmem:[#allocation2 + $0x7b] sm:$0xff] }
 0x176   :  { %v6884_v62 = vpop.f32.mrf.mxu0  ;;  %v6959_v59 = vpop.f32.mrf.mxu1 }
 0x178   :  { %v919_v34 = vpop.f32.mrf.mxu0  ;;  %v1171_v31 = vpop.f32.mrf.mxu1  ;;  %7192 = vmatmul.mubr.msk.f32.gmra.mxu0 %vm614_vm1, %v1847_v38  ;;  %7267 = vmatmul.mubr.msk.f32.gmra.mxu1 %vm614_vm1, %v9406_v42  ;;  %v9428_v38 = vld [vmem:[#allocation2 + $0x84] sm:$0xff] }
 0x179   :  { %v9411_v33 = vadd.f32 %v1171_v31, %v919_v34  ;;  %7194 = vmatprep.mubr.msk.f32.mxu0 %vm7707_vm2, %v11117_v56  ;;  %7269 = vmatprep.mubr.msk.f32.mxu1 %vm7707_vm2, %v11117_v56  ;;  %v1849_v34 = vld [vmem:[#allocation2 + $0x83] sm:$0xff] }
 0x17a   :  { %v6887_v62 = vpop.f32.mrf.mxu0  ;;  %v6962_v59 = vpop.f32.mrf.mxu1 }
 0x17c   :  { %v924_v32 = vpop.f32.mrf.mxu0  ;;  %v1176_v29 = vpop.f32.mrf.mxu1  ;;  %7195 = vmatmul.mubr.msk.f32.gmra.mxu0 %vm614_vm1, %v1848_v36  ;;  %7270 = vmatmul.mubr.msk.f32.gmra.mxu1 %vm614_vm1, %v9417_v40  ;;  %v9439_v36 = vld [vmem:[#allocation2 + $0x8c] sm:$0xff] }
 0x17d   :  { %v9422_v31 = vadd.f32 %v1176_v29, %v924_v32  ;;  %7197 = vmatprep.mubr.msk.f32.mxu0 %vm7707_vm2, %v11117_v56  ;;  %7272 = vmatprep.mubr.msk.f32.mxu1 %vm7707_vm2, %v11117_v56  ;;  %v1850_v32 = vld [vmem:[#allocation2 + $0x8b] sm:$0xff] }
 0x17e   :  { %v6890_v62 = vpop.f32.mrf.mxu0  ;;  %v6965_v59 = vpop.f32.mrf.mxu1 }
 0x180   :  { %v929_v30 = vpop.f32.mrf.mxu0  ;;  %v1181_v27 = vpop.f32.mrf.mxu1  ;;  %7198 = vmatmul.mubr.msk.f32.gmra.mxu0 %vm614_vm1, %v1849_v34  ;;  %7273 = vmatmul.mubr.msk.f32.gmra.mxu1 %vm614_vm1, %v9428_v38  ;;  %v9450_v34 = vld [vmem:[#allocation2 + $0x94] sm:$0xff] }
 0x181   :  { %v9433_v29 = vadd.f32 %v1181_v27, %v929_v30  ;;  %7200 = vmatprep.mubr.msk.f32.mxu0 %vm7707_vm2, %v11117_v56  ;;  %7275 = vmatprep.mubr.msk.f32.mxu1 %vm7707_vm2, %v11117_v56  ;;  %v1851_v30 = vld [vmem:[#allocation2 + $0x93] sm:$0xff] }
 0x182   :  { %v6893_v62 = vpop.f32.mrf.mxu0  ;;  %v6968_v59 = vpop.f32.mrf.mxu1 }
 0x184   :  { %v934_v28 = vpop.f32.mrf.mxu0  ;;  %v1186_v25 = vpop.f32.mrf.mxu1  ;;  %7201 = vmatmul.mubr.msk.f32.gmra.mxu0 %vm614_vm1, %v1850_v32  ;;  %7276 = vmatmul.mubr.msk.f32.gmra.mxu1 %vm614_vm1, %v9439_v36  ;;  %v9461_v32 = vld [vmem:[#allocation2 + $0x9c] sm:$0xff] }
 0x185   :  { %v9444_v27 = vadd.f32 %v1186_v25, %v934_v28  ;;  %7203 = vmatprep.mubr.msk.f32.mxu0 %vm7707_vm2, %v11117_v56  ;;  %7278 = vmatprep.mubr.msk.f32.mxu1 %vm7707_vm2, %v11117_v56  ;;  %v1852_v28 = vld [vmem:[#allocation2 + $0x9b] sm:$0xff] }
 0x186   :  { %v6896_v62 = vpop.f32.mrf.mxu0  ;;  %v6971_v59 = vpop.f32.mrf.mxu1 }
 0x188   :  { %v939_v26 = vpop.f32.mrf.mxu0  ;;  %v1191_v23 = vpop.f32.mrf.mxu1  ;;  %7204 = vmatmul.mubr.msk.f32.gmra.mxu0 %vm614_vm1, %v1851_v30  ;;  %7279 = vmatmul.mubr.msk.f32.gmra.mxu1 %vm614_vm1, %v9450_v34  ;;  %v9472_v30 = vld [vmem:[#allocation2 + $0xa4] sm:$0xff] }
 0x189   :  { %v9455_v25 = vadd.f32 %v1191_v23, %v939_v26  ;;  %7206 = vmatprep.mubr.msk.f32.mxu0 %vm7707_vm2, %v11117_v56  ;;  %7281 = vmatprep.mubr.msk.f32.mxu1 %vm7707_vm2, %v11117_v56  ;;  %v1853_v26 = vld [vmem:[#allocation2 + $0xa3] sm:$0xff] }
 0x18a   :  { %v6899_v62 = vpop.f32.mrf.mxu0  ;;  %v6974_v59 = vpop.f32.mrf.mxu1 }
 0x18c   :  { %v944_v24 = vpop.f32.mrf.mxu0  ;;  %v1196_v21 = vpop.f32.mrf.mxu1  ;;  %7207 = vmatmul.mubr.msk.f32.gmra.mxu0 %vm614_vm1, %v1852_v28  ;;  %7282 = vmatmul.mubr.msk.f32.gmra.mxu1 %vm614_vm1, %v9461_v32  ;;  %v9483_v28 = vld [vmem:[#allocation2 + $0xac] sm:$0xff] }
 0x18d   :  { %v9466_v23 = vadd.f32 %v1196_v21, %v944_v24  ;;  %7209 = vmatprep.mubr.msk.f32.mxu0 %vm7707_vm2, %v11117_v56  ;;  %7284 = vmatprep.mubr.msk.f32.mxu1 %vm7707_vm2, %v11117_v56  ;;  %v1854_v24 = vld [vmem:[#allocation2 + $0xab] sm:$0xff] }
 0x18e   :  { %v6902_v62 = vpop.f32.mrf.mxu0  ;;  %v6977_v59 = vpop.f32.mrf.mxu1 }
 0x190   :  { %v949_v22 = vpop.f32.mrf.mxu0  ;;  %v1201_v19 = vpop.f32.mrf.mxu1  ;;  %7210 = vmatmul.mubr.msk.f32.gmra.mxu0 %vm614_vm1, %v1853_v26  ;;  %7285 = vmatmul.mubr.msk.f32.gmra.mxu1 %vm614_vm1, %v9472_v30  ;;  %v9494_v26 = vld [vmem:[#allocation2 + $0xb4] sm:$0xff] }
 0x191   :  { %v9477_v21 = vadd.f32 %v1201_v19, %v949_v22  ;;  %7212 = vmatprep.mubr.msk.f32.mxu0 %vm7707_vm2, %v11117_v56  ;;  %7287 = vmatprep.mubr.msk.f32.mxu1 %vm7707_vm2, %v11117_v56  ;;  %v1855_v22 = vld [vmem:[#allocation2 + $0xb3] sm:$0xff] }
 0x192   :  { %v6905_v62 = vpop.f32.mrf.mxu0  ;;  %v6980_v59 = vpop.f32.mrf.mxu1 }
 0x194   :  { %v954_v20 = vpop.f32.mrf.mxu0  ;;  %v1206_v17 = vpop.f32.mrf.mxu1  ;;  %7213 = vmatmul.mubr.msk.f32.gmra.mxu0 %vm614_vm1, %v1854_v24  ;;  %7288 = vmatmul.mubr.msk.f32.gmra.mxu1 %vm614_vm1, %v9483_v28  ;;  %v2158_v24 = vld [vmem:[#allocation2 + $0xbc] sm:$0x3] }
 0x195   :  { %v9488_v19 = vadd.f32 %v1206_v17, %v954_v20  ;;  %7215 = vmatprep.mubr.msk.f32.mxu0 %vm7707_vm2, %v11117_v56  ;;  %7290 = vmatprep.mubr.msk.f32.mxu1 %vm7707_vm2, %v11117_v56  ;;  %v1856_v20 = vld [vmem:[#allocation2 + $0xbb] sm:$0x3] }
 0x196   :  { %v6908_v62 = vpop.f32.mrf.mxu0  ;;  %v6983_v59 = vpop.f32.mrf.mxu1 }
 0x198   :  { %v959_v18 = vpop.f32.mrf.mxu0  ;;  %v1211_v15 = vpop.f32.mrf.mxu1  ;;  %7216 = vmatmul.mubr.msk.f32.gmra.mxu0 %vm614_vm1, %v1855_v22  ;;  %7291 = vmatmul.mubr.msk.f32.gmra.mxu1 %vm614_vm1, %v9494_v26 }
 0x199   :  { %v9499_v17 = vadd.f32 %v1211_v15, %v959_v18  ;;  %7218 = vmatprep.mubr.msk.f32.mxu0 %vm7707_vm2, %v11117_v56  ;;  %7293 = vmatprep.mubr.msk.f32.mxu1 %vm7707_vm2, %v11117_v56  ;;  %v2740_v15 = vld [vmem:[#allocation2 + $0x15] sm:$0xff] }
 0x19a   :  { %v6911_v16 = vpop.f32.mrf.mxu0  ;;  %v6986_v62 = vpop.f32.mrf.mxu1 }
 0x19c   :  { %v964_v59 = vpop.f32.mrf.mxu0  ;;  %v1216_v13 = vpop.f32.mrf.mxu1  ;;  %7219 = vmatmul.mubr.msk.f32.gmra.mxu0 %vm614_vm1, %v1856_v20  ;;  %7294 = vmatmul.mubr.msk.f32.gmra.mxu1 %vm614_vm1, %v2158_v24  ;;  %v3067_v20 = vld [vmem:[#allocation13 + $0xc8] sm:$0xff]  ;;  %v2741_v24 = vld [vmem:[#allocation2 + $0x1d] sm:$0xff] }
 0x19d   :  { %v9507_v22 = vadd.f32 %v1216_v13, %v964_v59  ;;  %7302 = vmatprep.mubr.msk.f32.mxu0 %vm7707_vm2, %v11117_v56  ;;  %7377 = vmatprep.mubr.msk.f32.mxu1 %vm7707_vm2, %v11117_v56 }
 0x19e   :  { %v6914_v18 = vpop.f32.mrf.mxu0  ;;  %v6989_v14 = vpop.f32.mrf.mxu1 }
 0x1a0   :  { %v969_v16 = vpop.f32.mrf.mxu0  ;;  %v1221_v62 = vpop.f32.mrf.mxu1  ;;  %7303 = vmatmul.mubr.msk.f32.vlgmr.msra.gmra.mxu0 %vm614_vm1, %v9268_v55  ;;  %7378 = vmatmul.mubr.msk.f32.vlgmr.msra.gmra.mxu1 %vm614_vm1, %v2740_v15 }
 0x1a1   :  { %v9516_v13 = vadd.f32 %v1221_v62, %v969_v16  ;;  %7447 = vmatpush3.msk.msra.mxu0 %vm794_vm0, %v3068_v11  ;;  %7305 = vmatprep.mubr.msk.f32.mxu0 %vm7707_vm2, %v11117_v56  ;;  %v3066_v11 = vld [vmem:[#allocation13 + $0xc0] sm:$0xff] }
 0x1a2   :  { %v6917_v59 = vpop.f32.mrf.mxu0  ;;  %v6992_v18 = vpop.f32.mrf.mxu1  ;;  %7380 = vmatprep.mubr.msk.f32.mxu1 %vm7707_vm2, %v11117_v56  ;;  %7448 = vmatprep.subr.mxu0 %v11117_v56  ;;  %v2742_v16 = vld [vmem:[#allocation2 + $0x25] sm:$0xff] }
 0x1a3   :  { %7449 = vmatpush3.msra.mxu0 %v3067_v20  ;;  %v2743_v18 = vld [vmem:[#allocation2 + $0x2d] sm:$0xff] }
 0x1a4   :  { %v974_v14 = vpop.f32.mrf.mxu0  ;;  %v1226_v55 = vpop.f32.mrf.mxu1  ;;  %7306 = vmatmul.mubr.msk.f32.gmra.mxu0 %vm614_vm1, %v9281_v0  ;;  %7381 = vmatmul.mubr.msk.f32.gmra.mxu1 %vm614_vm1, %v2741_v24 }
 0x1a5   :  { %v9527_v15 = vadd.f32 %v1226_v55, %v974_v14  ;;  %7308 = vmatprep.mubr.msk.f32.mxu0 %vm7707_vm2, %v11117_v56  ;;  %7383 = vmatprep.mubr.msk.f32.mxu1 %vm7707_vm2, %v11117_v56 }
 0x1a6   :  { %v6920_v62 = vpop.f32.mrf.mxu0  ;;  %v6995_v59 = vpop.f32.mrf.mxu1  ;;  %7450 = vmatprep.subr.mxu0 %v11117_v56 }
 0x1a7   :  { %7451 = vmatpush3.msra.mxu0 %v3066_v11 }
 0x1a8   :  { %v1395_v20 = vpop.f32.mrf.mxu0  ;;  %7309 = vmatmul.mubr.msk.f32.gmra.mxu0 %vm614_vm1, %v9294_v54  ;;  %v1697_v0 = vpop.f32.mrf.mxu1  ;;  %7384 = vmatmul.mubr.msk.f32.gmra.mxu1 %vm614_vm1, %v2742_v16  ;;  %v2744_v16 = vld [vmem:[#allocation2 + $0x35] sm:$0xff] }
 0x1a9   :  { %v1509_v24 = vadd.f32 %v1395_v20, %v9288_v58  ;;  %7311 = vmatprep.mubr.msk.f32.mxu0 %vm7707_vm2, %v11117_v56  ;;  %7386 = vmatprep.mubr.msk.f32.mxu1 %vm7707_vm2, %v11117_v56 }
 0x1aa   :  { %v7004_v14 = vpop.f32.mrf.mxu0  ;;  %v7079_v55 = vpop.f32.mrf.mxu1 }
 0x1ab   :  { %v9542_v62 = vadd.f32 %v1697_v0, %v1509_v24 }
 0x1ac   :  { %v1400_v11 = vpop.f32.mrf.mxu0  ;;  %7312 = vmatmul.mubr.msk.f32.gmra.mxu0 %vm614_vm1, %v9307_v61  ;;  %v1702_v54 = vpop.f32.mrf.mxu1  ;;  %7387 = vmatmul.mubr.msk.f32.gmra.mxu1 %vm614_vm1, %v2743_v18  ;;  %v2745_v18 = vld [vmem:[#allocation2 + $0x3d] sm:$0xff] }
 0x1ad   :  { %v1510_v58 = vadd.f32 %v1400_v11, %v9301_v63  ;;  %7314 = vmatprep.mubr.msk.f32.mxu0 %vm7707_vm2, %v11117_v56  ;;  %7389 = vmatprep.mubr.msk.f32.mxu1 %vm7707_vm2, %v11117_v56 }
 0x1ae   :  { %v7007_v59 = vpop.f32.mrf.mxu0  ;;  %v7082_v20 = vpop.f32.mrf.mxu1 }
 0x1af   :  { %v9552_v0 = vadd.f32 %v1702_v54, %v1510_v58  ;;  %v2746_v58 = vld [vmem:[#allocation2 + $0x45] sm:$0xff] }
 0x1b0   :  { %v1405_v24 = vpop.f32.mrf.mxu0  ;;  %7315 = vmatmul.mubr.msk.f32.gmra.mxu0 %vm614_vm1, %v9318_v57  ;;  %v1707_v61 = vpop.f32.mrf.mxu1  ;;  %7390 = vmatmul.mubr.msk.f32.gmra.mxu1 %vm614_vm1, %v2744_v16 }
 0x1b1   :  { %v1511_v63 = vadd.f32 %v1405_v24, %v9312_v51  ;;  %7317 = vmatprep.mubr.msk.f32.mxu0 %vm7707_vm2, %v11117_v56  ;;  %7392 = vmatprep.mubr.msk.f32.mxu1 %vm7707_vm2, %v11117_v56 }
 0x1b2   :  { %v7010_v14 = vpop.f32.mrf.mxu0  ;;  %v7085_v55 = vpop.f32.mrf.mxu1 }
 0x1b3   :  { %v9562_v11 = vadd.f32 %v1707_v61, %v1511_v63  ;;  %v2747_v61 = vld [vmem:[#allocation2 + $0x4d] sm:$0xff] }
 0x1b4   :  { %v1410_v54 = vpop.f32.mrf.mxu0  ;;  %7318 = vmatmul.mubr.msk.f32.gmra.mxu0 %vm614_vm1, %v9329_v60  ;;  %v1712_v57 = vpop.f32.mrf.mxu1  ;;  %7393 = vmatmul.mubr.msk.f32.gmra.mxu1 %vm614_vm1, %v2745_v18 }
 0x1b5   :  { %v1512_v51 = vadd.f32 %v1410_v54, %v9323_v49  ;;  %7320 = vmatprep.mubr.msk.f32.mxu0 %vm7707_vm2, %v11117_v56  ;;  %7395 = vmatprep.mubr.msk.f32.mxu1 %vm7707_vm2, %v11117_v56  ;;  %v2748_v54 = vld [vmem:[#allocation2 + $0x55] sm:$0xff] }
 0x1b6   :  { %v7013_v16 = vpop.f32.mrf.mxu0  ;;  %v7088_v59 = vpop.f32.mrf.mxu1 }
 0x1b7   :  { %v9572_v20 = vadd.f32 %v1712_v57, %v1512_v51  ;;  %v2749_v59 = vld [vmem:[#allocation2 + $0x5d] sm:$0xff] }
 0x1b8   :  { %v1415_v24 = vpop.f32.mrf.mxu0  ;;  %7321 = vmatmul.mubr.msk.f32.gmra.mxu0 %vm614_vm1, %v9340_v53  ;;  %v1717_v60 = vpop.f32.mrf.mxu1  ;;  %7396 = vmatmul.mubr.msk.f32.gmra.mxu1 %vm614_vm1, %v2746_v58 }
 0x1b9   :  { %v1513_v49 = vadd.f32 %v1415_v24, %v9334_v47  ;;  %7323 = vmatprep.mubr.msk.f32.mxu0 %vm7707_vm2, %v11117_v56  ;;  %7398 = vmatprep.mubr.msk.f32.mxu1 %vm7707_vm2, %v11117_v56 }
 0x1ba   :  { %v7016_v63 = vpop.f32.mrf.mxu0  ;;  %v7091_v18 = vpop.f32.mrf.mxu1 }
 0x1bb   :  { %v9582_v14 = vadd.f32 %v1717_v60, %v1513_v49  ;;  %v2750_v63 = vld [vmem:[#allocation2 + $0x65] sm:$0xff] }
 0x1bc   :  { %v1420_v55 = vpop.f32.mrf.mxu0  ;;  %7324 = vmatmul.mubr.msk.f32.gmra.mxu0 %vm614_vm1, %v9351_v52  ;;  %v1722_v53 = vpop.f32.mrf.mxu1  ;;  %7399 = vmatmul.mubr.msk.f32.gmra.mxu1 %vm614_vm1, %v2747_v61 }
 0x1bd   :  { %v1514_v47 = vadd.f32 %v1420_v55, %v9345_v45  ;;  %7326 = vmatprep.mubr.msk.f32.mxu0 %vm7707_vm2, %v11117_v56  ;;  %7401 = vmatprep.mubr.msk.f32.mxu1 %vm7707_vm2, %v11117_v56 }
 0x1be   :  { %v7019_v57 = vpop.f32.mrf.mxu0  ;;  %v7094_v51 = vpop.f32.mrf.mxu1 }
 0x1bf   :  { %v9592_v58 = vadd.f32 %v1722_v53, %v1514_v47 }
 0x1c0   :  { %v1425_v16 = vpop.f32.mrf.mxu0  ;;  %7327 = vmatmul.mubr.msk.f32.gmra.mxu0 %vm614_vm1, %v9362_v50  ;;  %v1727_v52 = vpop.f32.mrf.mxu1  ;;  %7402 = vmatmul.mubr.msk.f32.gmra.mxu1 %vm614_vm1, %v2748_v54  ;;  %v2751_v54 = vld [vmem:[#allocation2 + $0x6d] sm:$0xff] }
 0x1c1   :  { %v1515_v45 = vadd.f32 %v1425_v16, %v9356_v43  ;;  %7329 = vmatprep.mubr.msk.f32.mxu0 %vm7707_vm2, %v11117_v56  ;;  %7404 = vmatprep.mubr.msk.f32.mxu1 %vm7707_vm2, %v11117_v56 }
 0x1c2   :  { %v7022_v24 = vpop.f32.mrf.mxu0  ;;  %v7097_v60 = vpop.f32.mrf.mxu1 }
 0x1c3   :  { %v9602_v49 = vadd.f32 %v1727_v52, %v1515_v45  ;;  %v2752_v45 = vld [vmem:[#allocation2 + $0x75] sm:$0xff] }
 0x1c4   :  { %v1430_v61 = vpop.f32.mrf.mxu0  ;;  %7330 = vmatmul.mubr.msk.f32.gmra.mxu0 %vm614_vm1, %v9373_v48  ;;  %v1732_v50 = vpop.f32.mrf.mxu1  ;;  %7405 = vmatmul.mubr.msk.f32.gmra.mxu1 %vm614_vm1, %v2749_v59 }
 0x1c5   :  { %v1516_v43 = vadd.f32 %v1430_v61, %v9367_v41  ;;  %7332 = vmatprep.mubr.msk.f32.mxu0 %vm7707_vm2, %v11117_v56  ;;  %7407 = vmatprep.mubr.msk.f32.mxu1 %vm7707_vm2, %v11117_v56 }
 0x1c6   :  { %v7025_v18 = vpop.f32.mrf.mxu0  ;;  %v7100_v55 = vpop.f32.mrf.mxu1 }
 0x1c7   :  { %v9612_v53 = vadd.f32 %v1732_v50, %v1516_v43  ;;  %v2753_v50 = vld [vmem:[#allocation2 + $0x7d] sm:$0xff] }
 0x1c8   :  { %v1435_v47 = vpop.f32.mrf.mxu0  ;;  %7333 = vmatmul.mubr.msk.f32.gmra.mxu0 %vm614_vm1, %v9384_v46  ;;  %v1737_v48 = vpop.f32.mrf.mxu1  ;;  %7408 = vmatmul.mubr.msk.f32.gmra.mxu1 %vm614_vm1, %v2750_v63 }
 0x1c9   :  { %v1517_v41 = vadd.f32 %v1435_v47, %v9378_v39  ;;  %7335 = vmatprep.mubr.msk.f32.mxu0 %vm7707_vm2, %v11117_v56  ;;  %7410 = vmatprep.mubr.msk.f32.mxu1 %vm7707_vm2, %v11117_v56  ;;  %v2754_v47 = vld [vmem:[#allocation2 + $0x85] sm:$0xff] }
 0x1ca   :  { %v7028_v57 = vpop.f32.mrf.mxu0  ;;  %v7103_v51 = vpop.f32.mrf.mxu1 }
 0x1cb   :  { %v9622_v16 = vadd.f32 %v1737_v48, %v1517_v41  ;;  %v2755_v51 = vld [vmem:[#allocation2 + $0x8d] sm:$0xff] }
 0x1cc   :  { %v1440_v52 = vpop.f32.mrf.mxu0  ;;  %7336 = vmatmul.mubr.msk.f32.gmra.mxu0 %vm614_vm1, %v9395_v44  ;;  %v1742_v46 = vpop.f32.mrf.mxu1  ;;  %7411 = vmatmul.mubr.msk.f32.gmra.mxu1 %vm614_vm1, %v2751_v54 }
 0x1cd   :  { %v1518_v39 = vadd.f32 %v1440_v52, %v9389_v37  ;;  %7338 = vmatprep.mubr.msk.f32.mxu0 %vm7707_vm2, %v11117_v56  ;;  %7413 = vmatprep.mubr.msk.f32.mxu1 %vm7707_vm2, %v11117_v56 }
 0x1ce   :  { %v7031_v59 = vpop.f32.mrf.mxu0  ;;  %v7106_v24 = vpop.f32.mrf.mxu1 }
 0x1cf   :  { %v9632_v60 = vadd.f32 %v1742_v46, %v1518_v39  ;;  %v2756_v59 = vld [vmem:[#allocation2 + $0x95] sm:$0xff] }
 0x1d0   :  { %v1445_v61 = vpop.f32.mrf.mxu0  ;;  %7339 = vmatmul.mubr.msk.f32.gmra.mxu0 %vm614_vm1, %v9406_v42  ;;  %v1747_v44 = vpop.f32.mrf.mxu1  ;;  %7414 = vmatmul.mubr.msk.f32.gmra.mxu1 %vm614_vm1, %v2752_v45 }
 0x1d1   :  { %v1519_v37 = vadd.f32 %v1445_v61, %v9400_v35  ;;  %7341 = vmatprep.mubr.msk.f32.mxu0 %vm7707_vm2, %v11117_v56  ;;  %7416 = vmatprep.mubr.msk.f32.mxu1 %vm7707_vm2, %v11117_v56 }
 0x1d2   :  { %v7034_v43 = vpop.f32.mrf.mxu0  ;;  %v7109_v63 = vpop.f32.mrf.mxu1 }
 0x1d3   :  { %v9642_v18 = vadd.f32 %v1747_v44, %v1519_v37 }
 0x1d4   :  { %v1450_v55 = vpop.f32.mrf.mxu0  ;;  %7342 = vmatmul.mubr.msk.f32.gmra.mxu0 %vm614_vm1, %v9417_v40  ;;  %v1752_v42 = vpop.f32.mrf.mxu1  ;;  %7417 = vmatmul.mubr.msk.f32.gmra.mxu1 %vm614_vm1, %v2753_v50  ;;  %v2757_v50 = vld [vmem:[#allocation2 + $0x9d] sm:$0xff] }
 0x1d5   :  { %v1520_v35 = vadd.f32 %v1450_v55, %v9411_v33  ;;  %7344 = vmatprep.mubr.msk.f32.mxu0 %vm7707_vm2, %v11117_v56  ;;  %7419 = vmatprep.mubr.msk.f32.mxu1 %vm7707_vm2, %v11117_v56 }
 0x1d6   :  { %v7037_v48 = vpop.f32.mrf.mxu0  ;;  %v7112_v41 = vpop.f32.mrf.mxu1 }
 0x1d7   :  { %v9652_v54 = vadd.f32 %v1752_v42, %v1520_v35  ;;  %v2758_v35 = vld [vmem:[#allocation2 + $0xa5] sm:$0xff] }
 0x1d8   :  { %v1455_v57 = vpop.f32.mrf.mxu0  ;;  %7345 = vmatmul.mubr.msk.f32.gmra.mxu0 %vm614_vm1, %v9428_v38  ;;  %v1757_v40 = vpop.f32.mrf.mxu1  ;;  %7420 = vmatmul.mubr.msk.f32.gmra.mxu1 %vm614_vm1, %v2754_v47 }
 0x1d9   :  { %v1521_v33 = vadd.f32 %v1455_v57, %v9422_v31  ;;  %7347 = vmatprep.mubr.msk.f32.mxu0 %vm7707_vm2, %v11117_v56  ;;  %7422 = vmatprep.mubr.msk.f32.mxu1 %vm7707_vm2, %v11117_v56 }
 0x1da   :  { %v7040_v52 = vpop.f32.mrf.mxu0  ;;  %v7115_v46 = vpop.f32.mrf.mxu1 }
 0x1db   :  { %v9662_v39 = vadd.f32 %v1757_v40, %v1521_v33  ;;  %v2759_v40 = vld [vmem:[#allocation2 + $0xad] sm:$0xff] }
 0x1dc   :  { %v1460_v45 = vpop.f32.mrf.mxu0  ;;  %7348 = vmatmul.mubr.msk.f32.gmra.mxu0 %vm614_vm1, %v9439_v36  ;;  %v1762_v38 = vpop.f32.mrf.mxu1  ;;  %7423 = vmatmul.mubr.msk.f32.gmra.mxu1 %vm614_vm1, %v2755_v51 }
 0x1dd   :  { %v1522_v31 = vadd.f32 %v1460_v45, %v9433_v29  ;;  %7350 = vmatprep.mubr.msk.f32.mxu0 %vm7707_vm2, %v11117_v56  ;;  %7425 = vmatprep.mubr.msk.f32.mxu1 %vm7707_vm2, %v11117_v56  ;;  %v2760_v45 = vld [vmem:[#allocation2 + $0xb5] sm:$0xff] }
 0x1de   :  { %v7043_v24 = vpop.f32.mrf.mxu0  ;;  %v7118_v61 = vpop.f32.mrf.mxu1 }
 0x1df   :  { %v9672_v44 = vadd.f32 %v1762_v38, %v1522_v31  ;;  %v2459_v61 = vld [vmem:[#allocation2 + $0xbc] sm:$0xff] }
 0x1e0   :  { %v1465_v37 = vpop.f32.mrf.mxu0  ;;  %7351 = vmatmul.mubr.msk.f32.gmra.mxu0 %vm614_vm1, %v9450_v34  ;;  %v1767_v36 = vpop.f32.mrf.mxu1  ;;  %7426 = vmatmul.mubr.msk.f32.gmra.mxu1 %vm614_vm1, %v2756_v59 }
 0x1e1   :  { %v1523_v29 = vadd.f32 %v1465_v37, %v9444_v27  ;;  %7353 = vmatprep.mubr.msk.f32.mxu0 %vm7707_vm2, %v11117_v56  ;;  %7428 = vmatprep.mubr.msk.f32.mxu1 %vm7707_vm2, %v11117_v56  ;;  %v2761_v37 = vld [vmem:[#allocation2 + $0xbd] sm:$0xff] }
 0x1e2   :  { %v7046_v43 = vpop.f32.mrf.mxu0  ;;  %v7121_v63 = vpop.f32.mrf.mxu1 }
 0x1e3   :  { %v9682_v55 = vadd.f32 %v1767_v36, %v1523_v29  ;;  %v2460_v63 = vld [vmem:[#allocation2 + $0xc4] sm:$0x3] }
 0x1e4   :  { %v1470_v42 = vpop.f32.mrf.mxu0  ;;  %7354 = vmatmul.mubr.msk.f32.gmra.mxu0 %vm614_vm1, %v9461_v32  ;;  %v1772_v34 = vpop.f32.mrf.mxu1  ;;  %7429 = vmatmul.mubr.msk.f32.gmra.mxu1 %vm614_vm1, %v2757_v50 }
 0x1e5   :  { %v1524_v27 = vadd.f32 %v1470_v42, %v9455_v25  ;;  %7356 = vmatprep.mubr.msk.f32.mxu0 %vm7707_vm2, %v11117_v56  ;;  %7431 = vmatprep.mubr.msk.f32.mxu1 %vm7707_vm2, %v11117_v56  ;;  %v2762_v42 = vld [vmem:[#allocation2 + $0xc5] sm:$0x3] }
 0x1e6   :  { %v7049_v47 = vpop.f32.mrf.mxu0  ;;  %v7124_v48 = vpop.f32.mrf.mxu1 }
 0x1e7   :  { %v9692_v41 = vadd.f32 %v1772_v34, %v1524_v27 }
 0x1e8   :  { %v1475_v57 = vpop.f32.mrf.mxu0  ;;  %7357 = vmatmul.mubr.msk.f32.gmra.mxu0 %vm614_vm1, %v9472_v30  ;;  %v1777_v32 = vpop.f32.mrf.mxu1  ;;  %7432 = vmatmul.mubr.msk.f32.gmra.mxu1 %vm614_vm1, %v2758_v35 }
 0x1e9   :  { %v1525_v25 = vadd.f32 %v1475_v57, %v9466_v23  ;;  %7359 = vmatprep.mubr.msk.f32.mxu0 %vm7707_vm2, %v11117_v56  ;;  %7434 = vmatprep.mubr.msk.f32.mxu1 %vm7707_vm2, %v11117_v56  ;;  %v3042_v57 = vld [vmem:[#allocation2 + $0x16] sm:$0xff] }
 0x1ea   :  { %v7052_v33 = vpop.f32.mrf.mxu0  ;;  %v7127_v51 = vpop.f32.mrf.mxu1 }
 0x1eb   :  { %v9702_v52 = vadd.f32 %v1777_v32, %v1525_v25 }
 0x1ec   :  { %v1480_v46 = vpop.f32.mrf.mxu0  ;;  %7360 = vmatmul.mubr.msk.f32.gmra.mxu0 %vm614_vm1, %v9483_v28  ;;  %v1782_v30 = vpop.f32.mrf.mxu1  ;;  %7435 = vmatmul.mubr.msk.f32.gmra.mxu1 %vm614_vm1, %v2759_v40 }
 0x1ed   :  { %v1526_v23 = vadd.f32 %v1480_v46, %v9477_v21  ;;  %7362 = vmatprep.mubr.msk.f32.mxu0 %vm7707_vm2, %v11117_v56  ;;  %7437 = vmatprep.mubr.msk.f32.mxu1 %vm7707_vm2, %v11117_v56 }
 0x1ee   :  { %v7055_v38 = vpop.f32.mrf.mxu0  ;;  %v7130_v31 = vpop.f32.mrf.mxu1 }
 0x1ef   :  { %v9712_v59 = vadd.f32 %v1782_v30, %v1526_v23  ;;  %v3043_v30 = vld [vmem:[#allocation2 + $0x1e] sm:$0xff] }
 0x1f0   :  { %v1485_v24 = vpop.f32.mrf.mxu0  ;;  %7363 = vmatmul.mubr.msk.f32.gmra.mxu0 %vm614_vm1, %v9494_v26  ;;  %v1787_v28 = vpop.f32.mrf.mxu1  ;;  %7438 = vmatmul.mubr.msk.f32.gmra.mxu1 %vm614_vm1, %v2760_v45 }
 0x1f1   :  { %v1527_v21 = vadd.f32 %v1485_v24, %v9488_v19  ;;  %7365 = vmatprep.mubr.msk.f32.mxu0 %vm7707_vm2, %v11117_v56  ;;  %7440 = vmatprep.mubr.msk.f32.mxu1 %vm7707_vm2, %v11117_v56 }
 0x1f2   :  { %v7058_v36 = vpop.f32.mrf.mxu0  ;;  %v7133_v29 = vpop.f32.mrf.mxu1 }
 0x1f3   :  { %v9722_v50 = vadd.f32 %v1787_v28, %v1527_v21  ;;  %v3044_v28 = vld [vmem:[#allocation2 + $0x26] sm:$0xff] }
 0x1f4   :  { %v1490_v43 = vpop.f32.mrf.mxu0  ;;  %7366 = vmatmul.mubr.msk.f32.gmra.mxu0 %vm614_vm1, %v2459_v61  ;;  %v1792_v26 = vpop.f32.mrf.mxu1  ;;  %7441 = vmatmul.mubr.msk.f32.gmra.mxu1 %vm614_vm1, %v2761_v37 }
 0x1f5   :  { %v1528_v19 = vadd.f32 %v1490_v43, %v9499_v17  ;;  %7368 = vmatprep.mubr.msk.f32.mxu0 %vm7707_vm2, %v11117_v56  ;;  %7443 = vmatprep.mubr.msk.f32.mxu1 %vm7707_vm2, %v11117_v56  ;;  %v3045_v43 = vld [vmem:[#allocation2 + $0x2e] sm:$0xff] }
 0x1f6   :  { %v7061_v34 = vpop.f32.mrf.mxu0  ;;  %v7136_v27 = vpop.f32.mrf.mxu1 }
 0x1f7   :  { %v9731_v35 = vadd.f32 %v1792_v26, %v1528_v19  ;;  %v3046_v27 = vld [vmem:[#allocation2 + $0x36] sm:$0xff] }
 0x1f8   :  { %v1495_v47 = vpop.f32.mrf.mxu0  ;;  %7369 = vmatmul.mubr.msk.f32.gmra.mxu0 %vm614_vm1, %v2460_v63  ;;  %v1797_v48 = vpop.f32.mrf.mxu1  ;;  %7444 = vmatmul.mubr.msk.f32.gmra.mxu1 %vm614_vm1, %v2762_v42 }
 0x1f9   :  { %v1529_v17 = vadd.f32 %v1495_v47, %v9507_v22  ;;  %7452 = vmatprep.mubr.msk.f32.mxu0 %vm7707_vm2, %v11117_v56 }
 0x1fa   :  { %v7064_v32 = vpop.f32.mrf.mxu0  ;;  %v7139_v25 = vpop.f32.mrf.mxu1 }
 0x1fb   :  { %v9738_v40 = vadd.f32 %v1797_v48, %v1529_v17  ;;  %v3047_v25 = vld [vmem:[#allocation2 + $0x3e] sm:$0xff] }
 0x1fc   :  { %v1500_v33 = vpop.f32.mrf.mxu0  ;;  %7453 = vmatmul.mubr.msk.f32.vlgmr.msra.gmra.mxu0 %vm614_vm1, %v3042_v57  ;;  %v1802_v51 = vpop.f32.mrf.mxu1 }
 0x1fd   :  { %v1530_v46 = vadd.f32 %v1500_v33, %v9516_v13  ;;  %7455 = vmatprep.mubr.msk.f32.mxu0 %vm7707_vm2, %v11117_v56 }
 0x1fe   :  { %v7067_v23 = vpop.f32.mrf.mxu0  ;;  %v7142_v22 = vpop.f32.mrf.mxu1 }
 0x1ff   :  { %v9744_v45 = vadd.f32 %v1802_v51, %v1530_v46  ;;  %v3048_v22 = vld [vmem:[#allocation2 + $0x46] sm:$0xff] }
 0x200   :  { %v1505_v38 = vpop.f32.mrf.mxu0  ;;  %7456 = vmatmul.mubr.msk.f32.gmra.mxu0 %vm614_vm1, %v3043_v30  ;;  %v1807_v31 = vpop.f32.mrf.mxu1 }
 0x201   :  { %v1531_v24 = vadd.f32 %v1505_v38, %v9527_v15  ;;  %7458 = vmatprep.mubr.msk.f32.mxu0 %vm7707_vm2, %v11117_v56 }
 0x202   :  { %v7070_v21 = vpop.f32.mrf.mxu0  ;;  %v7145_v13 = vpop.f32.mrf.mxu1 }
 0x203   :  { %v9750_v61 = vadd.f32 %v1807_v31, %v1531_v24  ;;  %v3049_v13 = vld [vmem:[#allocation2 + $0x4e] sm:$0xff] }
 0x204   :  { %v1999_v37 = vpop.f32.mrf.mxu0  ;;  %7459 = vmatmul.mubr.msk.f32.gmra.mxu0 %vm614_vm1, %v3044_v28  ;;  %v2301_v36 = vpop.f32.mrf.mxu1 }
 0x205   :  { %v2113_v29 = vadd.f32 %v1999_v37, %v9542_v62  ;;  %7461 = vmatprep.mubr.msk.f32.mxu0 %vm7707_vm2, %v11117_v56 }
 0x206   :  { %v7154_v26 = vpop.f32.mrf.mxu0  ;;  %v7229_v15 = vpop.f32.mrf.mxu1 }
 0x207   :  { %v9756_v19 = vadd.f32 %v2301_v36, %v2113_v29  ;;  %v3050_v15 = vld [vmem:[#allocation2 + $0x56] sm:$0xff] }
 0x208   :  { %v2004_v63 = vpop.f32.mrf.mxu0  ;;  %7462 = vmatmul.mubr.msk.f32.gmra.mxu0 %vm614_vm1, %v3045_v43  ;;  %v2306_v42 = vpop.f32.mrf.mxu1 }
 0x209   :  { %v2114_v34 = vadd.f32 %v2004_v63, %v9552_v0  ;;  %7464 = vmatprep.mubr.msk.f32.mxu0 %vm7707_vm2, %v11117_v56 }
 0x20a   :  { %v7157_v47 = vpop.f32.mrf.mxu0  ;;  %v7232_v62 = vpop.f32.mrf.mxu1 }
 0x20b   :  { %v9762_v48 = vadd.f32 %v2306_v42, %v2114_v34  ;;  %v3051_v62 = vld [vmem:[#allocation2 + $0x5e] sm:$0xff] }
 0x20c   :  { %v2009_v17 = vpop.f32.mrf.mxu0  ;;  %7465 = vmatmul.mubr.msk.f32.gmra.mxu0 %vm614_vm1, %v3046_v27  ;;  %v2311_v57 = vpop.f32.mrf.mxu1 }
 0x20d   :  { %v2115_v32 = vadd.f32 %v2009_v17, %v9562_v11  ;;  %7467 = vmatprep.mubr.msk.f32.mxu0 %vm7707_vm2, %v11117_v56 }
 0x20e   :  { %v7160_v33 = vpop.f32.mrf.mxu0  ;;  %v7235_v0 = vpop.f32.mrf.mxu1 }
 0x20f   :  { %v9768_v51 = vadd.f32 %v2311_v57, %v2115_v32  ;;  %v3052_v0 = vld [vmem:[#allocation2 + $0x66] sm:$0xff] }
 0x210   :  { %v2014_v46 = vpop.f32.mrf.mxu0  ;;  %7468 = vmatmul.mubr.msk.f32.gmra.mxu0 %vm614_vm1, %v3047_v25  ;;  %v2316_v30 = vpop.f32.mrf.mxu1 }
 0x211   :  { %v2116_v23 = vadd.f32 %v2014_v46, %v9572_v20  ;;  %7470 = vmatprep.mubr.msk.f32.mxu0 %vm7707_vm2, %v11117_v56 }
 0x212   :  { %v7163_v38 = vpop.f32.mrf.mxu0  ;;  %v7238_v11 = vpop.f32.mrf.mxu1 }
 0x213   :  { %v9774_v31 = vadd.f32 %v2316_v30, %v2116_v23  ;;  %v3053_v11 = vld [vmem:[#allocation2 + $0x6e] sm:$0xff] }
 0x214   :  { %v2019_v24 = vpop.f32.mrf.mxu0  ;;  %7471 = vmatmul.mubr.msk.f32.gmra.mxu0 %vm614_vm1, %v3048_v22  ;;  %v2321_v28 = vpop.f32.mrf.mxu1 }
 0x215   :  { %v2117_v21 = vadd.f32 %v2019_v24, %v9582_v14  ;;  %7473 = vmatprep.mubr.msk.f32.mxu0 %vm7707_vm2, %v11117_v56 }
 0x216   :  { %v7166_v37 = vpop.f32.mrf.mxu0  ;;  %v7241_v20 = vpop.f32.mrf.mxu1 }
 0x217   :  { %v9780_v36 = vadd.f32 %v2321_v28, %v2117_v21  ;;  %v3054_v20 = vld [vmem:[#allocation2 + $0x76] sm:$0xff] }
 0x218   :  { %v2024_v29 = vpop.f32.mrf.mxu0  ;;  %7474 = vmatmul.mubr.msk.f32.gmra.mxu0 %vm614_vm1, %v3049_v13  ;;  %v2326_v43 = vpop.f32.mrf.mxu1 }
 0x219   :  { %v2118_v26 = vadd.f32 %v2024_v29, %v9592_v58  ;;  %7476 = vmatprep.mubr.msk.f32.mxu0 %vm7707_vm2, %v11117_v56 }
 0x21a   :  { %v7169_v63 = vpop.f32.mrf.mxu0  ;;  %v7244_v14 = vpop.f32.mrf.mxu1 }
 0x21b   :  { %v9786_v42 = vadd.f32 %v2326_v43, %v2118_v26  ;;  %v3055_v14 = vld [vmem:[#allocation2 + $0x7e] sm:$0xff] }
 0x21c   :  { %v2029_v34 = vpop.f32.mrf.mxu0  ;;  %7477 = vmatmul.mubr.msk.f32.gmra.mxu0 %vm614_vm1, %v3050_v15  ;;  %v2331_v27 = vpop.f32.mrf.mxu1 }
 0x21d   :  { %v2119_v47 = vadd.f32 %v2029_v34, %v9602_v49  ;;  %7479 = vmatprep.mubr.msk.f32.mxu0 %vm7707_vm2, %v11117_v56 }
 0x21e   :  { %v7172_v17 = vpop.f32.mrf.mxu0  ;;  %v7247_v58 = vpop.f32.mrf.mxu1 }
 0x21f   :  { %v9792_v57 = vadd.f32 %v2331_v27, %v2119_v47  ;;  %v3056_v58 = vld [vmem:[#allocation2 + $0x86] sm:$0xff] }
 0x220   :  { %v2034_v32 = vpop.f32.mrf.mxu0  ;;  %7480 = vmatmul.mubr.msk.f32.gmra.mxu0 %vm614_vm1, %v3051_v62  ;;  %v2336_v25 = vpop.f32.mrf.mxu1 }
 0x221   :  { %v2120_v33 = vadd.f32 %v2034_v32, %v9612_v53  ;;  %7482 = vmatprep.mubr.msk.f32.mxu0 %vm7707_vm2, %v11117_v56 }
 0x222   :  { %v7175_v46 = vpop.f32.mrf.mxu0  ;;  %v7250_v49 = vpop.f32.mrf.mxu1 }
 0x223   :  { %v9798_v30 = vadd.f32 %v2336_v25, %v2120_v33  ;;  %v3057_v49 = vld [vmem:[#allocation2 + $0x8e] sm:$0xff] }
 0x224   :  { %v2039_v23 = vpop.f32.mrf.mxu0  ;;  %7483 = vmatmul.mubr.msk.f32.gmra.mxu0 %vm614_vm1, %v3052_v0  ;;  %v2341_v22 = vpop.f32.mrf.mxu1 }
 0x225   :  { %v2121_v38 = vadd.f32 %v2039_v23, %v9622_v16  ;;  %7485 = vmatprep.mubr.msk.f32.mxu0 %vm7707_vm2, %v11117_v56 }
 0x226   :  { %v7178_v24 = vpop.f32.mrf.mxu0  ;;  %v7253_v53 = vpop.f32.mrf.mxu1 }
 0x227   :  { %v9804_v28 = vadd.f32 %v2341_v22, %v2121_v38  ;;  %v3058_v53 = vld [vmem:[#allocation2 + $0x96] sm:$0xff] }
 0x228   :  { %v2044_v21 = vpop.f32.mrf.mxu0  ;;  %7486 = vmatmul.mubr.msk.f32.gmra.mxu0 %vm614_vm1, %v3053_v11  ;;  %v2346_v13 = vpop.f32.mrf.mxu1 }
 0x229   :  { %v2122_v37 = vadd.f32 %v2044_v21, %v9632_v60  ;;  %7488 = vmatprep.mubr.msk.f32.mxu0 %vm7707_vm2, %v11117_v56 }
 0x22a   :  { %v7181_v29 = vpop.f32.mrf.mxu0  ;;  %v7256_v16 = vpop.f32.mrf.mxu1 }
 0x22b   :  { %v9810_v43 = vadd.f32 %v2346_v13, %v2122_v37  ;;  %v3059_v16 = vld [vmem:[#allocation2 + $0x9e] sm:$0xff] }
 0x22c   :  { %v2049_v26 = vpop.f32.mrf.mxu0  ;;  %7489 = vmatmul.mubr.msk.f32.gmra.mxu0 %vm614_vm1, %v3054_v20  ;;  %v2351_v15 = vpop.f32.mrf.mxu1 }
 0x22d   :  { %v2123_v63 = vadd.f32 %v2049_v26, %v9642_v18  ;;  %7491 = vmatprep.mubr.msk.f32.mxu0 %vm7707_vm2, %v11117_v56 }
 0x22e   :  { %v7184_v34 = vpop.f32.mrf.mxu0  ;;  %v7259_v60 = vpop.f32.mrf.mxu1 }
 0x22f   :  { %v9816_v27 = vadd.f32 %v2351_v15, %v2123_v63  ;;  %v3060_v60 = vld [vmem:[#allocation2 + $0xa6] sm:$0xff] }
 0x230   :  { %v2054_v47 = vpop.f32.mrf.mxu0  ;;  %7492 = vmatmul.mubr.msk.f32.gmra.mxu0 %vm614_vm1, %v3055_v14  ;;  %v2356_v62 = vpop.f32.mrf.mxu1 }
 0x231   :  { %v2124_v17 = vadd.f32 %v2054_v47, %v9652_v54  ;;  %7494 = vmatprep.mubr.msk.f32.mxu0 %vm7707_vm2, %v11117_v56 }
 0x232   :  { %v7187_v32 = vpop.f32.mrf.mxu0  ;;  %v7262_v18 = vpop.f32.mrf.mxu1 }
 0x233   :  { %v9822_v25 = vadd.f32 %v2356_v62, %v2124_v17  ;;  %v3061_v18 = vld [vmem:[#allocation2 + $0xae] sm:$0xff] }
 0x234   :  { %v2059_v33 = vpop.f32.mrf.mxu0  ;;  %7495 = vmatmul.mubr.msk.f32.gmra.mxu0 %vm614_vm1, %v3056_v58  ;;  %v2361_v0 = vpop.f32.mrf.mxu1 }
 0x235   :  { %v2125_v46 = vadd.f32 %v2059_v33, %v9662_v39  ;;  %7497 = vmatprep.mubr.msk.f32.mxu0 %vm7707_vm2, %v11117_v56 }
 0x236   :  { %v7190_v23 = vpop.f32.mrf.mxu0  ;;  %v7265_v54 = vpop.f32.mrf.mxu1 }
 0x237   :  { %v9828_v22 = vadd.f32 %v2361_v0, %v2125_v46  ;;  %v3062_v54 = vld [vmem:[#allocation2 + $0xb6] sm:$0xff] }
 0x238   :  { %v2064_v38 = vpop.f32.mrf.mxu0  ;;  %7498 = vmatmul.mubr.msk.f32.gmra.mxu0 %vm614_vm1, %v3057_v49  ;;  %v2366_v11 = vpop.f32.mrf.mxu1 }
 0x239   :  { %v2126_v24 = vadd.f32 %v2064_v38, %v9672_v44  ;;  %7500 = vmatprep.mubr.msk.f32.mxu0 %vm7707_vm2, %v11117_v56 }
 0x23a   :  { %v7193_v21 = vpop.f32.mrf.mxu0  ;;  %v7268_v39 = vpop.f32.mrf.mxu1 }
 0x23b   :  { %v9834_v13 = vadd.f32 %v2366_v11, %v2126_v24  ;;  %v3063_v39 = vld [vmem:[#allocation2 + $0xbe] sm:$0xff] }
 0x23c   :  { %v2069_v37 = vpop.f32.mrf.mxu0  ;;  %7501 = vmatmul.mubr.msk.f32.gmra.mxu0 %vm614_vm1, %v3058_v53  ;;  %v2371_v20 = vpop.f32.mrf.mxu1 }
 0x23d   :  { %v2127_v29 = vadd.f32 %v2069_v37, %v9682_v55  ;;  %7503 = vmatprep.mubr.msk.f32.mxu0 %vm7707_vm2, %v11117_v56 }
 0x23e   :  { %v7196_v26 = vpop.f32.mrf.mxu0  ;;  %v7271_v44 = vpop.f32.mrf.mxu1 }
 0x23f   :  { %v9840_v15 = vadd.f32 %v2371_v20, %v2127_v29  ;;  %v3064_v44 = vld [vmem:[#allocation2 + $0xc6] sm:$0x3] }
 0x240   :  { %v2074_v63 = vpop.f32.mrf.mxu0  ;;  %7504 = vmatmul.mubr.msk.f32.gmra.mxu0 %vm614_vm1, %v3059_v16  ;;  %v2376_v14 = vpop.f32.mrf.mxu1 }
 0x241   :  { %v2128_v34 = vadd.f32 %v2074_v63, %v9692_v41  ;;  %7506 = vmatprep.mubr.msk.f32.mxu0 %vm7707_vm2, %v11117_v56 }
 0x242   :  { %v7199_v47 = vpop.f32.mrf.mxu0  ;;  %v7274_v55 = vpop.f32.mrf.mxu1 }
 0x243   :  { %v9846_v62 = vadd.f32 %v2376_v14, %v2128_v34 }
 0x244   :  { %v2079_v17 = vpop.f32.mrf.mxu0  ;;  %7507 = vmatmul.mubr.msk.f32.gmra.mxu0 %vm614_vm1, %v3060_v60  ;;  %v2381_v58 = vpop.f32.mrf.mxu1 }
 0x245   :  { %v2129_v32 = vadd.f32 %v2079_v17, %v9702_v52  ;;  %7509 = vmatprep.mubr.msk.f32.mxu0 %vm7707_vm2, %v11117_v56 }
 0x246   :  { %v7202_v33 = vpop.f32.mrf.mxu0  ;;  %v7277_v41 = vpop.f32.mrf.mxu1 }
 0x247   :  { %v9852_v0 = vadd.f32 %v2381_v58, %v2129_v32 }
 0x248   :  { %v2084_v46 = vpop.f32.mrf.mxu0  ;;  %7510 = vmatmul.mubr.msk.f32.gmra.mxu0 %vm614_vm1, %v3061_v18  ;;  %v2386_v49 = vpop.f32.mrf.mxu1 }
 0x249   :  { %v2130_v23 = vadd.f32 %v2084_v46, %v9712_v59  ;;  %7512 = vmatprep.mubr.msk.f32.mxu0 %vm7707_vm2, %v11117_v56 }
 0x24a   :  { %v7205_v38 = vpop.f32.mrf.mxu0  ;;  %v7280_v52 = vpop.f32.mrf.mxu1 }
 0x24b   :  { %v9858_v11 = vadd.f32 %v2386_v49, %v2130_v23 }
 0x24c   :  { %v2089_v24 = vpop.f32.mrf.mxu0  ;;  %7513 = vmatmul.mubr.msk.f32.gmra.mxu0 %vm614_vm1, %v3062_v54  ;;  %v2391_v53 = vpop.f32.mrf.mxu1 }
 0x24d   :  { %v2131_v21 = vadd.f32 %v2089_v24, %v9722_v50  ;;  %7515 = vmatprep.mubr.msk.f32.mxu0 %vm7707_vm2, %v11117_v56 }
 0x24e   :  { %v7208_v37 = vpop.f32.mrf.mxu0  ;;  %v7283_v59 = vpop.f32.mrf.mxu1 }
 0x24f   :  { %v9864_v20 = vadd.f32 %v2391_v53, %v2131_v21 }
 0x250   :  { %v2094_v29 = vpop.f32.mrf.mxu0  ;;  %7516 = vmatmul.mubr.msk.f32.gmra.mxu0 %vm614_vm1, %v3063_v39  ;;  %v2396_v16 = vpop.f32.mrf.mxu1 }
 0x251   :  { %v2132_v26 = vadd.f32 %v2094_v29, %v9731_v35  ;;  %7518 = vmatprep.mubr.msk.f32.mxu0 %vm7707_vm2, %v11117_v56 }
 0x252   :  { %v7211_v63 = vpop.f32.mrf.mxu0  ;;  %v7286_v50 = vpop.f32.mrf.mxu1 }
 0x253   :  { %v9870_v14 = vadd.f32 %v2396_v16, %v2132_v26 }
 0x254   :  { %v2099_v34 = vpop.f32.mrf.mxu0  ;;  %7519 = vmatmul.mubr.msk.f32.gmra.mxu0 %vm614_vm1, %v3064_v44  ;;  %v2401_v60 = vpop.f32.mrf.mxu1 }
 0x255   :  { %v2133_v47 = vadd.f32 %v2099_v34, %v9738_v40 }
 0x256   :  { %v7214_v55 = vpop.f32.mrf.mxu0  ;;  %v7289_v17 = vpop.f32.mrf.mxu1 }
 0x257   :  { %v9874_v58 = vadd.f32 %v2401_v60, %v2133_v47 }
 0x258   :  { %v2104_v32 = vpop.f32.mrf.mxu0  ;;  %v2406_v35 = vpop.f32.mrf.mxu1 }
 0x259   :  { %v2134_v18 = vadd.f32 %v2104_v32, %v9744_v45 }
 0x25a   :  { %v7217_v33 = vpop.f32.mrf.mxu0  ;;  %v7292_v41 = vpop.f32.mrf.mxu1 }
 0x25b   :  { %v9877_v46 = vadd.f32 %v2406_v35, %v2134_v18 }
 0x25c   :  { %v2109_v49 = vpop.f32.mrf.mxu0  ;;  %v2411_v23 = vpop.f32.mrf.mxu1 }
 0x25d   :  { %v2135_v54 = vadd.f32 %v2109_v49, %v9750_v61 }
 0x25e   :  { %v7220_v38 = vpop.f32.mrf.mxu0  ;;  %v7295_v52 = vpop.f32.mrf.mxu1 }
 0x25f   :  { %v9880_v24 = vadd.f32 %v2411_v23, %v2135_v54 }
 0x260   :  { %v2603_v40 = vpop.f32.mrf.mxu0  ;;  %v2905_v53 = vpop.f32.mrf.mxu1 }
 0x261   :  { %v2717_v21 = vadd.f32 %v2603_v40, %v9756_v19 }
 0x262   :  { %v7304_v39 = vpop.f32.mrf.mxu0  ;;  %v7379_v37 = vpop.f32.mrf.mxu1 }
 0x263   :  { %v9883_v59 = vadd.f32 %v2905_v53, %v2717_v21 }
 0x264   :  { %v2608_v45 = vpop.f32.mrf.mxu0  ;;  %v2910_v29 = vpop.f32.mrf.mxu1 }
 0x265   :  { %v2718_v16 = vadd.f32 %v2608_v45, %v9762_v48 }
 0x266   :  { %v7307_v26 = vpop.f32.mrf.mxu0  ;;  %v7382_v44 = vpop.f32.mrf.mxu1 }
 0x267   :  { %v9886_v63 = vadd.f32 %v2910_v29, %v2718_v16 }
 0x268   :  { %v2613_v61 = vpop.f32.mrf.mxu0  ;;  %v2915_v50 = vpop.f32.mrf.mxu1 }
 0x269   :  { %v2719_v34 = vadd.f32 %v2613_v61, %v9768_v51 }
 0x26a   :  { %v7310_v60 = vpop.f32.mrf.mxu0  ;;  %v7385_v47 = vpop.f32.mrf.mxu1 }
 0x26b   :  { %v9889_v55 = vadd.f32 %v2915_v50, %v2719_v34 }
 0x26c   :  { %v2618_v19 = vpop.f32.mrf.mxu0  ;;  %v2920_v17 = vpop.f32.mrf.mxu1 }
 0x26d   :  { %v2720_v32 = vadd.f32 %v2618_v19, %v9774_v31 }
 0x26e   :  { %v7313_v35 = vpop.f32.mrf.mxu0  ;;  %v7388_v18 = vpop.f32.mrf.mxu1 }
 0x26f   :  { %v9892_v33 = vadd.f32 %v2920_v17, %v2720_v32 }
 0x270   :  { %v2623_v48 = vpop.f32.mrf.mxu0  ;;  %v2925_v41 = vpop.f32.mrf.mxu1 }
 0x271   :  { %v2721_v49 = vadd.f32 %v2623_v48, %v9780_v36 }
 0x272   :  { %v7316_v23 = vpop.f32.mrf.mxu0  ;;  %v7391_v54 = vpop.f32.mrf.mxu1 }
 0x273   :  { %v9895_v38 = vadd.f32 %v2925_v41, %v2721_v49 }
 0x274   :  { %v2628_v51 = vpop.f32.mrf.mxu0  ;;  %v2930_v52 = vpop.f32.mrf.mxu1 }
 0x275   :  { %v2722_v40 = vadd.f32 %v2628_v51, %v9786_v42 }
 0x276   :  { %v7319_v53 = vpop.f32.mrf.mxu0  ;;  %v7394_v21 = vpop.f32.mrf.mxu1 }
 0x277   :  { %v9898_v39 = vadd.f32 %v2930_v52, %v2722_v40 }
 0x278   :  { %v2633_v31 = vpop.f32.mrf.mxu0  ;;  %v2935_v37 = vpop.f32.mrf.mxu1 }
 0x279   :  { %v2723_v45 = vadd.f32 %v2633_v31, %v9792_v57 }
 0x27a   :  { %v7322_v29 = vpop.f32.mrf.mxu0  ;;  %v7397_v16 = vpop.f32.mrf.mxu1 }
 0x27b   :  { %v9901_v26 = vadd.f32 %v2935_v37, %v2723_v45 }
 0x27c   :  { %v2638_v36 = vpop.f32.mrf.mxu0  ;;  %v2940_v44 = vpop.f32.mrf.mxu1 }
 0x27d   :  { %v2724_v61 = vadd.f32 %v2638_v36, %v9798_v30 }
 0x27e   :  { %v7325_v50 = vpop.f32.mrf.mxu0  ;;  %v7400_v34 = vpop.f32.mrf.mxu1 }
 0x27f   :  { %v9904_v60 = vadd.f32 %v2940_v44, %v2724_v61 }
 0x280   :  { %v2643_v42 = vpop.f32.mrf.mxu0  ;;  %v2945_v47 = vpop.f32.mrf.mxu1 }
 0x281   :  { %v2725_v19 = vadd.f32 %v2643_v42, %v9804_v28 }
 0x282   :  { %v7328_v17 = vpop.f32.mrf.mxu0  ;;  %v7403_v32 = vpop.f32.mrf.mxu1 }
 0x283   :  { %v9907_v35 = vadd.f32 %v2945_v47, %v2725_v19 }
 0x284   :  { %v2648_v57 = vpop.f32.mrf.mxu0  ;;  %v2950_v18 = vpop.f32.mrf.mxu1 }
 0x285   :  { %v2726_v48 = vadd.f32 %v2648_v57, %v9810_v43 }
 0x286   :  { %v7331_v41 = vpop.f32.mrf.mxu0  ;;  %v7406_v49 = vpop.f32.mrf.mxu1 }
 0x287   :  { %v9910_v23 = vadd.f32 %v2950_v18, %v2726_v48 }
 0x288   :  { %v2653_v30 = vpop.f32.mrf.mxu0  ;;  %v2955_v54 = vpop.f32.mrf.mxu1 }
 0x289   :  { %v2727_v51 = vadd.f32 %v2653_v30, %v9816_v27 }
 0x28a   :  { %v7334_v52 = vpop.f32.mrf.mxu0  ;;  %v7409_v40 = vpop.f32.mrf.mxu1 }
 0x28b   :  { %v9913_v53 = vadd.f32 %v2955_v54, %v2727_v51 }
 0x28c   :  { %v2658_v28 = vpop.f32.mrf.mxu0  ;;  %v2960_v21 = vpop.f32.mrf.mxu1 }
 0x28d   :  { %v2728_v31 = vadd.f32 %v2658_v28, %v9822_v25 }
 0x28e   :  { %v7337_v37 = vpop.f32.mrf.mxu0  ;;  %v7412_v45 = vpop.f32.mrf.mxu1 }
 0x28f   :  { %v9916_v29 = vadd.f32 %v2960_v21, %v2728_v31 }
 0x290   :  { %v2663_v43 = vpop.f32.mrf.mxu0  ;;  %v2965_v16 = vpop.f32.mrf.mxu1 }
 0x291   :  { %v2729_v36 = vadd.f32 %v2663_v43, %v9828_v22 }
 0x292   :  { %v7340_v44 = vpop.f32.mrf.mxu0  ;;  %v7415_v61 = vpop.f32.mrf.mxu1 }
 0x293   :  { %v9919_v50 = vadd.f32 %v2965_v16, %v2729_v36 }
 0x294   :  { %v2668_v27 = vpop.f32.mrf.mxu0  ;;  %v2970_v34 = vpop.f32.mrf.mxu1 }
 0x295   :  { %v2730_v42 = vadd.f32 %v2668_v27, %v9834_v13 }
 0x296   :  { %v7343_v47 = vpop.f32.mrf.mxu0  ;;  %v7418_v19 = vpop.f32.mrf.mxu1 }
 0x297   :  { %v9922_v17 = vadd.f32 %v2970_v34, %v2730_v42 }
 0x298   :  { %v2673_v25 = vpop.f32.mrf.mxu0  ;;  %v2975_v32 = vpop.f32.mrf.mxu1 }
 0x299   :  { %v2731_v57 = vadd.f32 %v2673_v25, %v9840_v15 }
 0x29a   :  { %7692 = shalt.err (!%p7689_p9)  }
 0x29b   :  { %613 = dma.hbm_to_vmem [thread:$0]  %s10910_s12, 8192, %s611_s5, [#allocation11 + $0x3]  ;;  %v7346_v22 = vpop.f32.mrf.mxu0  ;;  %v7421_v13 = vpop.f32.mrf.mxu1  ;;  %v9928_v18 = vadd.f32 %v2975_v32, %v2731_v57  ;;  %3585 = vmatprep.subr.mxu1 %v11117_v56  ;;  %vm3473_vm3 = vcmask 408576  }
 0x29d   :  { %v2678_v48 = vpop.f32.mrf.mxu0  ;;  %v2980_v41 = vpop.f32.mrf.mxu1 }
 0x29e   :  { %v2732_v49 = vadd.f32 %v2678_v48, %v9846_v62 }
 0x29f   :  { %v7349_v15 = vpop.f32.mrf.mxu0  ;;  %v7424_v30 = vpop.f32.mrf.mxu1 }
 0x2a0   :  { %v9931_v54 = vadd.f32 %v2980_v41, %v2732_v49 }
 0x2a1   :  { %v2683_v51 = vpop.f32.mrf.mxu0  ;;  %v2985_v52 = vpop.f32.mrf.mxu1 }
 0x2a2   :  { %v2733_v40 = vadd.f32 %v2683_v51, %v9852_v0 }
 0x2a3   :  { %v7352_v28 = vpop.f32.mrf.mxu0  ;;  %v7427_v21 = vpop.f32.mrf.mxu1 }
 0x2a4   :  { %v9934_v31 = vadd.f32 %v2985_v52, %v2733_v40 }
 0x2a5   :  { %v2688_v37 = vpop.f32.mrf.mxu0  ;;  %v2990_v45 = vpop.f32.mrf.mxu1 }
 0x2a6   :  { %v2734_v43 = vadd.f32 %v2688_v37, %v9858_v11 }
 0x2a7   :  { %v7355_v16 = vpop.f32.mrf.mxu0  ;;  %v7430_v36 = vpop.f32.mrf.mxu1 }
 0x2a8   :  { %v9937_v44 = vadd.f32 %v2990_v45, %v2734_v43  ;;  %v9957_v36 = vld [vmem:[%s10900_s2] ss:$0 sm:$0xff] }
 0x2a9   :  { %v2693_v62 = vpop.f32.mrf.mxu0  ;;  %v2995_v61 = vpop.f32.mrf.mxu1 }
 0x2aa   :  { %v2735_v27 = vadd.f32 %v2693_v62, %v9864_v20 }
 0x2ab   :  { %v7358_v34 = vpop.f32.mrf.mxu0  ;;  %v7433_v42 = vpop.f32.mrf.mxu1 }
 0x2ac   :  { %v9940_v47 = vadd.f32 %v2995_v61, %v2735_v27 }
 0x2ad   :  { %v2698_v0 = vpop.f32.mrf.mxu0  ;;  %v3000_v19 = vpop.f32.mrf.mxu1 }
 0x2ae   :  { %v2736_v25 = vadd.f32 %v2698_v0, %v9870_v14 }
 0x2af   :  { %v7361_v32 = vpop.f32.mrf.mxu0  ;;  %v7436_v57 = vpop.f32.mrf.mxu1 }
 0x2b0   :  { %v9943_v22 = vadd.f32 %v3000_v19, %v2736_v25 }
 0x2b1   :  { %v2703_v11 = vpop.f32.mrf.mxu0  ;;  %v3005_v13 = vpop.f32.mrf.mxu1 }
 0x2b2   :  { %v2737_v48 = vadd.f32 %v2703_v11, %v9874_v58 }
 0x2b3   :  { %v7364_v41 = vpop.f32.mrf.mxu0  ;;  %v7439_v49 = vpop.f32.mrf.mxu1 }
 0x2b4   :  { %v9946_v15 = vadd.f32 %v3005_v13, %v2737_v48 }
 0x2b5   :  { %v2708_v20 = vpop.f32.mrf.mxu0  ;;  %v3010_v30 = vpop.f32.mrf.mxu1 }
 0x2b6   :  { %v2738_v51 = vadd.f32 %v2708_v20, %v9877_v46 }
 0x2b7   :  { %v7367_v52 = vpop.f32.mrf.mxu0  ;;  %v7442_v40 = vpop.f32.mrf.mxu1 }
 0x2b8   :  { %v9949_v28 = vadd.f32 %v3010_v30, %v2738_v51 }
 0x2b9   :  { %v2713_v14 = vpop.f32.mrf.mxu0  ;;  %v3015_v21 = vpop.f32.mrf.mxu1 }
 0x2ba   :  { %v2739_v37 = vadd.f32 %v2713_v14, %v9880_v24 }
 0x2bb   :  { %v7370_v45 = vpop.f32.mrf.mxu0  ;;  %v7445_v43 = vpop.f32.mrf.mxu1 }
 0x2bc   :  { %v9952_v16 = vadd.f32 %v3015_v21, %v2739_v37 }
 0x2bd   :  { %v3207_v58 = vpop.f32.mrf.mxu0 }
 0x2be   :  { %v3321_v46 = vadd.f32 %v3207_v58, %v9883_v59 }
 0x2bf   :  { %v7454_v62 = vpop.f32.mrf.mxu0 }
 0x2c0   :  { %v9961_v61 = vadd.f32 %v9957_v36, %v3321_v46 }
 0x2c1   :  { %v3212_v27 = vpop.f32.mrf.mxu0 }
 0x2c2   :  { %v3374_v34 = vmax.f32 %v9961_v61, 0.0  ;;  %v3322_v24 = vadd.f32 %v3212_v27, %v9886_v63 }
 0x2c3   :  { %v7457_v42 = vpop.f32.mrf.mxu0 }
 0x2c4   :  { %v9966_v0 = vadd.f32 %v9957_v36, %v3322_v24 }
 0x2c5   :  { %v3217_v19 = vpop.f32.mrf.mxu0 }
 0x2c6   :  { %v3375_v25 = vmax.f32 %v9966_v0, 0.0  ;;  %v3323_v32 = vadd.f32 %v3217_v19, %v9889_v55 }
 0x2c7   :  { %v7460_v57 = vpop.f32.mrf.mxu0 }
 0x2c8   :  { %v9971_v59 = vadd.f32 %v9957_v36, %v3323_v32 }
 0x2c9   :  { %v3222_v11 = vpop.f32.mrf.mxu0 }
 0x2ca   :  { %v3376_v13 = vmax.f32 %v9971_v59, 0.0  ;;  %v3324_v48 = vadd.f32 %v3222_v11, %v9892_v33 }
 0x2cb   :  { %v7463_v41 = vpop.f32.mrf.mxu0 }
 0x2cc   :  { %v9976_v63 = vadd.f32 %v9957_v36, %v3324_v48 }
 0x2cd   :  { %v3227_v49 = vpop.f32.mrf.mxu0 }
 0x2ce   :  { %v3377_v20 = vmax.f32 %v9976_v63, 0.0  ;;  %v3325_v30 = vadd.f32 %v3227_v49, %v9895_v38 }
 0x2cf   :  { %v7466_v51 = vpop.f32.mrf.mxu0 }
 0x2d0   :  { %v9981_v55 = vadd.f32 %v9957_v36, %v3325_v30 }
 0x2d1   :  { %v3232_v52 = vpop.f32.mrf.mxu0 }
 0x2d2   :  { %v3378_v40 = vmax.f32 %v9981_v55, 0.0  ;;  %v3326_v14 = vadd.f32 %v3232_v52, %v9898_v39 }
 0x2d3   :  { %v7469_v21 = vpop.f32.mrf.mxu0 }
 0x2d4   :  { %v9986_v33 = vadd.f32 %v9957_v36, %v3326_v14 }
 0x2d5   :  { %v3237_v37 = vpop.f32.mrf.mxu0 }
 0x2d6   :  { %v3379_v45 = vmax.f32 %v9986_v33, 0.0  ;;  %v3327_v43 = vadd.f32 %v3237_v37, %v9901_v26 }
 0x2d7   :  { %v7472_v58 = vpop.f32.mrf.mxu0 }
 0x2d8   :  { %v9991_v38 = vadd.f32 %v9957_v36, %v3327_v43 }
 0x2d9   :  { %v3242_v46 = vpop.f32.mrf.mxu0 }
 0x2da   :  { %v3380_v62 = vmax.f32 %v9991_v38, 0.0  ;;  %v3328_v27 = vadd.f32 %v3242_v46, %v9904_v60 }
 0x2db   :  { %v7475_v24 = vpop.f32.mrf.mxu0 }
 0x2dc   :  { %v9996_v39 = vadd.f32 %v9957_v36, %v3328_v27 }
 0x2dd   :  { %v3247_v42 = vpop.f32.mrf.mxu0 }
 0x2de   :  { %v3381_v19 = vmax.f32 %v9996_v39, 0.0  ;;  %v3329_v32 = vadd.f32 %v3247_v42, %v9907_v35 }
 0x2df   :  { %v7478_v57 = vpop.f32.mrf.mxu0 }
 0x2e0   :  { %v10001_v26 = vadd.f32 %v9957_v36, %v3329_v32 }
 0x2e1   :  { %v3252_v11 = vpop.f32.mrf.mxu0 }
 0x2e2   :  { %v3382_v48 = vmax.f32 %v10001_v26, 0.0  ;;  %v3330_v41 = vadd.f32 %v3252_v11, %v9910_v23 }
 0x2e3   :  { %v7481_v49 = vpop.f32.mrf.mxu0 }
 0x2e4   :  { %v10006_v60 = vadd.f32 %v9957_v36, %v3330_v41 }
 0x2e5   :  { %v3257_v30 = vpop.f32.mrf.mxu0 }
 0x2e6   :  { %v3383_v51 = vmax.f32 %v10006_v60, 0.0  ;;  %v3331_v52 = vadd.f32 %v3257_v30, %v9913_v53 }
 0x2e7   :  { %v7484_v14 = vpop.f32.mrf.mxu0 }
 0x2e8   :  { %v10011_v35 = vadd.f32 %v9957_v36, %v3331_v52 }
 0x2e9   :  { %v3262_v21 = vpop.f32.mrf.mxu0 }
 0x2ea   :  { %v3384_v37 = vmax.f32 %v10011_v35, 0.0  ;;  %v3332_v43 = vadd.f32 %v3262_v21, %v9916_v29 }
 0x2eb   :  { %v7487_v58 = vpop.f32.mrf.mxu0 }
 0x2ec   :  { %v10016_v23 = vadd.f32 %v9957_v36, %v3332_v43 }
 0x2ed   :  { %v3267_v46 = vpop.f32.mrf.mxu0 }
 0x2ee   :  { %v3385_v27 = vmax.f32 %v10016_v23, 0.0  ;;  %v3333_v24 = vadd.f32 %v3267_v46, %v9919_v50 }
 0x2ef   :  { %v7490_v42 = vpop.f32.mrf.mxu0 }
 0x2f0   :  { %v10021_v53 = vadd.f32 %v9957_v36, %v3333_v24 }
 0x2f1   :  { %v3272_v32 = vpop.f32.mrf.mxu0 }
 0x2f2   :  { %v3386_v57 = vmax.f32 %v10021_v53, 0.0  ;;  %v3334_v11 = vadd.f32 %v3272_v32, %v9922_v17 }
 0x2f3   :  { %v7493_v41 = vpop.f32.mrf.mxu0 }
 0x2f4   :  { %v3364_v29 = vadd.f32 %v9957_v36, %v3334_v11 }
 0x2f5   :  { %v3277_v49 = vpop.f32.mrf.mxu0 }
 0x2f6   :  { %v3387_v30 = vmax.f32 %v3364_v29, 0.0  ;;  %v3335_v52 = vadd.f32 %v3277_v49, %v9928_v18 }
 0x2f7   :  { %v7496_v14 = vpop.f32.mrf.mxu0 }
 0x2f8   :  { %v3365_v21 = vadd.f32 %v9957_v36, %v3335_v52 }
 0x2f9   :  { %v3282_v50 = vpop.f32.mrf.mxu0 }
 0x2fa   :  { %v3388_v43 = vmax.f32 %v3365_v21, 0.0  ;;  %v3336_v58 = vadd.f32 %v3282_v50, %v9931_v54 }
 0x2fb   :  { %v7499_v46 = vpop.f32.mrf.mxu0 }
 0x2fc   :  { %v3366_v24 = vadd.f32 %v9957_v36, %v3336_v58 }
 0x2fd   :  { %v3287_v42 = vpop.f32.mrf.mxu0 }
 0x2fe   :  { %v3389_v53 = vmax.f32 %v3366_v24, 0.0  ;;  %v3337_v17 = vadd.f32 %v3287_v42, %v9934_v31 }
 0x2ff   :  { %v7502_v32 = vpop.f32.mrf.mxu0 }
 0x300   :  { %v10032_v11 = vadd.f32 %v9957_v36, %v3337_v17 }
 0x301   :  { %v3292_v41 = vpop.f32.mrf.mxu0 }
 0x302   :  { %v3338_v29 = vadd.f32 %v3292_v41, %v9937_v44 }
 0x303   :  { %v7505_v49 = vpop.f32.mrf.mxu0 }
 0x304   :  { %v10037_v52 = vadd.f32 %v9957_v36, %v3338_v29 }
 0x305   :  { %v3297_v54 = vpop.f32.mrf.mxu0 }
 0x306   :  { %v3339_v21 = vadd.f32 %v3297_v54, %v9940_v47 }
 0x307   :  { %v7508_v50 = vpop.f32.mrf.mxu0 }
 0x308   :  { %v10042_v31 = vadd.f32 %v9957_v36, %v3339_v21 }
 0x309   :  { %v3302_v58 = vpop.f32.mrf.mxu0 }
 0x30a   :  { %v3340_v24 = vadd.f32 %v3302_v58, %v9943_v22 }
 0x30b   :  { %v7511_v42 = vpop.f32.mrf.mxu0 }
 0x30c   :  { %v3370_v44 = vadd.f32 %v9957_v36, %v3340_v24 }
 0x30d   :  { %v3307_v17 = vpop.f32.mrf.mxu0 }
 0x30e   :  { %v3393_v32 = vmax.f32 %v3370_v44, 0.0  ;;  %v3341_v41 = vadd.f32 %v3307_v17, %v9946_v15 }
 0x30f   :  { %v7514_v29 = vpop.f32.mrf.mxu0 }
 0x310   :  { %v3371_v49 = vadd.f32 %v9957_v36, %v3341_v41 }
 0x311   :  { %v3312_v47 = vpop.f32.mrf.mxu0 }
 0x312   :  { %v3394_v54 = vmax.f32 %v3371_v49, 0.0  ;;  %v3342_v21 = vadd.f32 %v3312_v47, %v9949_v28 }
 0x313   :  { %v7517_v50 = vpop.f32.mrf.mxu0 }
 0x314   :  { %v3372_v18 = vadd.f32 %v9957_v36, %v3342_v21 }
 0x315   :  { %v3317_v14 = vpop.f32.mrf.mxu0 }
 0x316   :  { %v3395_v46 = vmax.f32 %v3372_v18, 0.0  ;;  %v3343_v22 = vadd.f32 %v3317_v14, %v9952_v16 }
 0x317   :  { %v7520_v58 = vpop.f32.mrf.mxu0 }
 0x318   :  { %v3373_v24 = vadd.f32 %v9957_v36, %v3343_v22 }
 0x31a   :  { %v3396_v42 = vmax.f32 %v3373_v24, 0.0 }
 0x31b   :  { %7695 = dma.done.wait [#allocation11], 9216 }
 0x31c   :  { %7696 = vsyncadd [#allocation11], 4294958080  ;;  %3586 = vmatpush1.msra.mxu1 %v3389_v53  ;;  %6257 = vmatprep.mubr.msk.f32.mxu1 %vm3473_vm3, %v7811_v2  ;;  %v11118_v2 = vmax.f32 %v10042_v31, 0.0  ;;  %v11119_v15 = vmax.f32 %v10037_v52, 0.0  ;;  %v11120_v28 = vmax.f32 %v10032_v11, 0.0  ;;  %v11131_v16 = vld [vmem:[#allocation36_spill] sm:$0xff] }
 0x31d   :  { %3587 = vmatprep.subr.mxu1 %v11117_v56  ;;  %v11132_v36 = vld [vmem:[#allocation39_spill] sm:$0xff]  ;;  %v11133_v61 = vld [vmem:[#allocation38_spill] sm:$0xff]  ;;  %v11135_v0 = vld [vmem:[#allocation40_spill] sm:$0xff]  ;;  %vm3857_vm4 = vcmask 261120   ;;  %s7709_s22 = smov 32   ;;  %s7710_s23 = smov 64  }
 0x31e   :  { %3588 = vmatpush1.msra.mxu1 %v3388_v43  ;;  %v11137_v59 = vld [vmem:[#allocation42_spill] sm:$0xff]  ;;  %v11139_v63 = vld [vmem:[#allocation44_spill] sm:$0xff]  ;;  %v11160_v53 = vld [vmem:[#allocation67_spill] sm:$0xff]  ;;  %s7711_s29 = smov 96   ;;  %vm3882_vm5 = vcmask 254976   ;;  %vm3924_vm6 = vcmask 523520  }
 0x31f   :  { %3589 = vmatprep.subr.mxu1 %v11117_v56  ;;  %v11141_v55 = vld [vmem:[#allocation46_spill] sm:$0xff]  ;;  %v11143_v33 = vld [vmem:[#allocation48_spill] sm:$0xff]  ;;  %v11162_v18 = vld [vmem:[#allocation69_spill] sm:$0xff]  ;;  %vm3974_vm7 = vcmask 785920   ;;  %vm4024_vm8 = vcmask 1048320   ;;  %vm3932_vm9 = vcmask 517376  }
 0x320   :  { %3590 = vmatpush1.msra.mxu1 %v3387_v30  ;;  %v11145_v38 = vld [vmem:[#allocation50_spill] sm:$0xff]  ;;  %v11147_v39 = vld [vmem:[#allocation52_spill] sm:$0xff]  ;;  %v11158_v30 = vld [vmem:[#allocation65_spill] sm:$0xff]  ;;  %vm3982_vm10 = vcmask 779776   ;;  %vm4032_vm11 = vcmask 1042176   ;;  %vm4535_vm12 = vcmask 474112  }
 0x321   :  { %3591 = vmatprep.subr.mxu1 %v11117_v56  ;;  %v11149_v26 = vld [vmem:[#allocation54_spill] sm:$0xff]  ;;  %v11151_v60 = vld [vmem:[#allocation56_spill] sm:$0xff]  ;;  %v11164_v14 = vld [vmem:[#allocation71_spill] sm:$0xff]  ;;  %vm4744_vm13 = vcmask 523264   ;;  %vm4754_vm14 = vcmask 521216   ;;  %vm4771_vm15 = vcmask 1048064  }
 0x322   :  { %3592 = vmatpush1.msra.mxu1 %v3386_v57  ;;  %v11153_v35 = vld [vmem:[#allocation58_spill] sm:$0xff]  ;;  %v11155_v23 = vld [vmem:[#allocation60_spill] sm:$0xff]  ;;  %v11168_v17 = vld [vmem:[#allocation75_spill] sm:$0xff]  ;;  %vm4774_vm1 = vcmask 1046016  }
 0x323   :  { %3593 = vmatprep.subr.mxu1 %v11117_v56  ;;  %v11157_v57 = vld [vmem:[#allocation62_spill] sm:$0xff]  ;;  %v11159_v43 = vld [vmem:[#allocation64_spill] sm:$0xff]  ;;  %v11170_v41 = vld [vmem:[#allocation77_spill] sm:$0xff] }
 0x324   :  { %3594 = vmatpush1.msra.mxu1 %v3385_v27  ;;  %v11156_v27 = vld [vmem:[#allocation63_spill] sm:$0xff]  ;;  %v11161_v11 = vld [vmem:[#allocation66_spill] sm:$0xff]  ;;  %v11163_v52 = vld [vmem:[#allocation68_spill] sm:$0xff] }
 0x325   :  { %3595 = vmatprep.subr.mxu1 %v11117_v56  ;;  %v11165_v31 = vld [vmem:[#allocation70_spill] sm:$0xff]  ;;  %v11167_v44 = vld [vmem:[#allocation72_spill] sm:$0xff]  ;;  %v11172_v49 = vld [vmem:[#allocation79_spill] sm:$0xff] }
 0x326   :  { %3596 = vmatpush1.msra.mxu1 %v3384_v37  ;;  %v11154_v37 = vld [vmem:[#allocation61_spill] sm:$0xff]  ;;  %v11171_v29 = vld [vmem:[#allocation76_spill] sm:$0xff]  ;;  %v11173_v47 = vld [vmem:[#allocation78_spill] sm:$0xff] }
 0x327   :  { %3597 = vmatprep.subr.mxu1 %v11117_v56  ;;  %v11175_v21 = vld [vmem:[#allocation80_spill] sm:$0xff]  ;;  %v11176_v50 = vld [vmem:[#allocation83_spill] sm:$0xff]  ;;  %v11177_v22 = vld [vmem:[#allocation82_spill] sm:$0xff] }
 0x328   :  { %3598 = vmatpush1.msra.mxu1 %v3383_v51  ;;  %v11152_v51 = vld [vmem:[#allocation59_spill] sm:$0xff]  ;;  %v11178_v58 = vld [vmem:[#allocation85_spill] sm:$0xff]  ;;  %v11179_v24 = vld [vmem:[#allocation84_spill] sm:$0xff] }
 0x329   :  { %3599 = vmatprep.subr.mxu1 %v11117_v56 }
 0x32a   :  { %3600 = vmatpush1.msra.mxu1 %v3382_v48  ;;  %v11150_v48 = vld [vmem:[#allocation57_spill] sm:$0xff] }
 0x32b   :  { %3601 = vmatprep.subr.mxu1 %v11117_v56 }
 0x32c   :  { %3602 = vmatpush1.msra.mxu1 %v3381_v19  ;;  %v11148_v19 = vld [vmem:[#allocation55_spill] sm:$0xff] }
 0x32d   :  { %3603 = vmatprep.subr.mxu1 %v11117_v56 }
 0x32e   :  { %3604 = vmatpush1.msra.mxu1 %v3380_v62  ;;  %v11146_v62 = vld [vmem:[#allocation53_spill] sm:$0xff] }
 0x32f   :  { %3605 = vmatprep.subr.mxu1 %v11117_v56 }
 0x330   :  { %3606 = vmatpush1.msra.mxu1 %v3379_v45  ;;  %v11144_v45 = vld [vmem:[#allocation51_spill] sm:$0xff] }
 0x331   :  { %3607 = vmatprep.subr.mxu1 %v11117_v56 }
 0x332   :  { %3608 = vmatpush1.msra.mxu1 %v3378_v40  ;;  %v11142_v40 = vld [vmem:[#allocation49_spill] sm:$0xff] }
 0x333   :  { %3609 = vmatprep.subr.mxu1 %v11117_v56 }
 0x334   :  { %3610 = vmatpush1.msra.mxu1 %v3377_v20  ;;  %v11140_v20 = vld [vmem:[#allocation47_spill] sm:$0xff] }
 0x335   :  { %3611 = vmatprep.subr.mxu1 %v11117_v56 }
 0x336   :  { %3612 = vmatpush1.msra.mxu1 %v3376_v13  ;;  %v11138_v13 = vld [vmem:[#allocation45_spill] sm:$0xff] }
 0x337   :  { %3613 = vmatprep.subr.mxu1 %v11117_v56 }
 0x338   :  { %3614 = vmatpush1.msra.mxu1 %v3375_v25  ;;  %v11136_v25 = vld [vmem:[#allocation43_spill] sm:$0xff] }
 0x339   :  { %3615 = vmatprep.subr.mxu1 %v11117_v56 }
 0x33a   :  { %3616 = vmatpush1.msra.mxu1 %v3374_v34  ;;  %v11134_v34 = vld [vmem:[#allocation41_spill] sm:$0xff] }
 0x33b   :  { %3635 = vmatprep.subr.mxu1 %v11117_v56 }
 0x33c   :  { %6256 = vmatpush2.msk.msra.mxu1 %vm794_vm0, %v3396_v42  ;;  %v11180_v42 = vld [vmem:[#allocation87_spill] sm:$0xff] }
 0x33d   :  { %3637 = vmatprep.subr.mxu1 %v11117_v56 }
 0x33e   :  { %3638 = vmatpush2.msra.mxu1 %v3395_v46  ;;  %v11166_v46 = vld [vmem:[#allocation73_spill] sm:$0xff] }
 0x33f   :  { %3639 = vmatprep.subr.mxu1 %v11117_v56 }
 0x340   :  { %3640 = vmatpush2.msra.mxu1 %v3394_v54  ;;  %v11174_v54 = vld [vmem:[#allocation81_spill] sm:$0xff] }
 0x341   :  { %3641 = vmatprep.subr.mxu1 %v11117_v56 }
 0x342   :  { %3642 = vmatpush2.msra.mxu1 %v3393_v32  ;;  %v11169_v32 = vld [vmem:[#allocation74_spill] sm:$0xff] }
 0x343   :  { %3643 = vmatprep.subr.mxu1 %v11117_v56 }
 0x344   :  { %3644 = vmatpush2.msra.mxu1 %v11118_v2  ;;  %v11181_v2 = vld [vmem:[#allocation86_spill] sm:$0xff] }
 0x345   :  { %3645 = vmatprep.subr.mxu1 %v11117_v56 }
 0x346   :  { %3646 = vmatpush2.msra.mxu1 %v11119_v15 }
 0x347   :  { %3647 = vmatprep.subr.mxu1 %v11117_v56 }
 0x348   :  { %3648 = vmatpush2.msra.mxu1 %v11120_v28 }
 0x349   :  { %3650 = vmatmul.mubr.f32.vlgmr.msra.gmra.mxu1 %v7806_v1  ;;  %v11121_v1 = vld [vmem:[#allocation27_spill] sm:$0xff] }
 0x34a   :  { %6258 = vmatprep.mubr.msk.f32.mxu1 %vm3473_vm3, %v7821_v4  ;;  %v11123_v4 = vld [vmem:[#allocation28_spill] sm:$0xff] }
 0x34d   :  { %3655 = vmatmul.mubr.f32.gmra.mxu1 %v7816_v3  ;;  %v11122_v3 = vld [vmem:[#allocation29_spill] sm:$0xff] }
 0x34e   :  { %6259 = vmatprep.mubr.msk.f32.mxu1 %vm3473_vm3, %v7831_v6  ;;  %v11125_v6 = vld [vmem:[#allocation30_spill] sm:$0xff] }
 0x351   :  { %3660 = vmatmul.mubr.f32.gmra.mxu1 %v7826_v5  ;;  %v11124_v5 = vld [vmem:[#allocation31_spill] sm:$0xff] }
 0x352   :  { %6260 = vmatprep.mubr.msk.f32.mxu1 %vm3473_vm3, %v7841_v8  ;;  %v11127_v8 = vld [vmem:[#allocation32_spill] sm:$0xff] }
 0x355   :  { %3665 = vmatmul.mubr.f32.gmra.mxu1 %v7836_v7  ;;  %v11126_v7 = vld [vmem:[#allocation33_spill] sm:$0xff] }
 0x356   :  { %6261 = vmatprep.mubr.msk.f32.mxu1 %vm3473_vm3, %v7851_v10  ;;  %v11129_v10 = vld [vmem:[#allocation34_spill] sm:$0xff] }
 0x359   :  { %3670 = vmatmul.mubr.f32.gmra.mxu1 %v7846_v9  ;;  %v11128_v9 = vld [vmem:[#allocation35_spill] sm:$0xff] }
 0x35a   :  { %6262 = vmatprep.mubr.msk.f32.mxu1 %vm3473_vm3, %v7861_v12  ;;  %v11130_v12 = vld [vmem:[#allocation37_spill] sm:$0xff] }
 0x35d   :  { %3675 = vmatmul.mubr.f32.gmra.mxu1 %v11121_v1 }
 0x35e   :  { %6263 = vmatprep.mubr.msk.f32.mxu1 %vm3473_vm3, %v11122_v3 }
 0x361   :  { %3680 = vmatmul.mubr.f32.gmra.mxu1 %v11123_v4 }
 0x362   :  { %6264 = vmatprep.mubr.msk.f32.mxu1 %vm3473_vm3, %v11124_v5 }
 0x365   :  { %3685 = vmatmul.mubr.f32.gmra.mxu1 %v11125_v6 }
 0x366   :  { %6265 = vmatprep.mubr.msk.f32.mxu1 %vm3473_vm3, %v11126_v7 }
 0x369   :  { %3690 = vmatmul.mubr.f32.gmra.mxu1 %v11127_v8 }
 0x36a   :  { %6266 = vmatprep.mubr.msk.f32.mxu1 %vm3473_vm3, %v11128_v9 }
 0x36d   :  { %3695 = vmatmul.mubr.f32.gmra.mxu1 %v11129_v10 }
 0x36e   :  { %6267 = vmatprep.mubr.msk.f32.mxu1 %vm3473_vm3, %v11130_v12 }
 0x371   :  { %3700 = vmatmul.mubr.f32.gmra.mxu1 %v11131_v16 }
 0x372   :  { %6268 = vmatprep.mubr.msk.f32.mxu1 %vm3473_vm3, %v11132_v36 }
 0x375   :  { %3705 = vmatmul.mubr.f32.gmra.mxu1 %v11133_v61 }
 0x376   :  { %6269 = vmatprep.mubr.msk.f32.mxu1 %vm3473_vm3, %v11134_v34 }
 0x379   :  { %3710 = vmatmul.mubr.f32.gmra.mxu1 %v11135_v0 }
 0x37a   :  { %6270 = vmatprep.mubr.msk.f32.mxu1 %vm3473_vm3, %v11136_v25 }
 0x37d   :  { %3715 = vmatmul.mubr.f32.gmra.mxu1 %v11137_v59 }
 0x37e   :  { %6271 = vmatprep.mubr.msk.f32.mxu1 %vm3473_vm3, %v11138_v13 }
 0x381   :  { %3720 = vmatmul.mubr.f32.gmra.mxu1 %v11139_v63 }
 0x382   :  { %6272 = vmatprep.mubr.msk.f32.mxu1 %vm3473_vm3, %v11140_v20 }
 0x385   :  { %3725 = vmatmul.mubr.f32.gmra.mxu1 %v11141_v55 }
 0x386   :  { %6273 = vmatprep.mubr.msk.f32.mxu1 %vm3473_vm3, %v11142_v40 }
 0x389   :  { %3730 = vmatmul.mubr.f32.gmra.mxu1 %v11143_v33 }
 0x38a   :  { %6274 = vmatprep.mubr.msk.f32.mxu1 %vm3473_vm3, %v11144_v45 }
 0x38d   :  { %3735 = vmatmul.mubr.f32.gmra.mxu1 %v11145_v38 }
 0x38e   :  { %6275 = vmatprep.mubr.msk.f32.mxu1 %vm3473_vm3, %v11146_v62 }
 0x391   :  { %3740 = vmatmul.mubr.f32.gmra.mxu1 %v11147_v39 }
 0x392   :  { %6276 = vmatprep.mubr.msk.f32.mxu1 %vm3473_vm3, %v11148_v19 }
 0x395   :  { %3745 = vmatmul.mubr.f32.gmra.mxu1 %v11149_v26 }
 0x396   :  { %6277 = vmatprep.mubr.msk.f32.mxu1 %vm3473_vm3, %v11150_v48 }
 0x399   :  { %3750 = vmatmul.mubr.f32.gmra.mxu1 %v11151_v60 }
 0x39a   :  { %6278 = vmatprep.mubr.msk.f32.mxu1 %vm3473_vm3, %v11152_v51 }
 0x39d   :  { %3755 = vmatmul.mubr.f32.gmra.mxu1 %v11153_v35 }
 0x39e   :  { %6279 = vmatprep.mubr.msk.f32.mxu1 %vm3473_vm3, %v11154_v37 }
 0x3a1   :  { %3760 = vmatmul.mubr.f32.gmra.mxu1 %v11155_v23 }
 0x3a2   :  { %6280 = vmatprep.mubr.msk.f32.mxu1 %vm3473_vm3, %v11156_v27 }
 0x3a5   :  { %3765 = vmatmul.mubr.f32.gmra.mxu1 %v11157_v57 }
 0x3a6   :  { %6281 = vmatprep.mubr.msk.f32.mxu1 %vm3473_vm3, %v11158_v30 }
 0x3a9   :  { %3770 = vmatmul.mubr.f32.gmra.mxu1 %v11159_v43 }
 0x3aa   :  { %6282 = vmatprep.mubr.msk.f32.mxu1 %vm3473_vm3, %v11160_v53 }
 0x3ad   :  { %3775 = vmatmul.mubr.f32.gmra.mxu1 %v11161_v11 }
 0x3ae   :  { %6283 = vmatprep.mubr.msk.f32.mxu1 %vm3473_vm3, %v11162_v18 }
 0x3b1   :  { %3780 = vmatmul.mubr.f32.gmra.mxu1 %v11163_v52 }
 0x3b2   :  { %6284 = vmatprep.mubr.msk.f32.mxu1 %vm3473_vm3, %v11164_v14 }
 0x3b5   :  { %3785 = vmatmul.mubr.f32.gmra.mxu1 %v11165_v31 }
 0x3b6   :  { %6285 = vmatprep.mubr.msk.f32.mxu1 %vm3473_vm3, %v11166_v46 }
 0x3b9   :  { %3790 = vmatmul.mubr.f32.gmra.mxu1 %v11167_v44 }
 0x3ba   :  { %6286 = vmatprep.mubr.msk.f32.mxu1 %vm3473_vm3, %v11168_v17 }
 0x3bd   :  { %3795 = vmatmul.mubr.f32.gmra.mxu1 %v11169_v32 }
 0x3be   :  { %6287 = vmatprep.mubr.msk.f32.mxu1 %vm3473_vm3, %v11170_v41 }
 0x3c1   :  { %3800 = vmatmul.mubr.f32.gmra.mxu1 %v11171_v29 }
 0x3c2   :  { %6288 = vmatprep.mubr.msk.f32.mxu1 %vm3473_vm3, %v11172_v49 }
 0x3c5   :  { %3805 = vmatmul.mubr.f32.gmra.mxu1 %v11173_v47  ;;  %v4265_v47 = vld [vmem:[%s10901_s3 + $0xf8] sm:$0xff] }
 0x3c6   :  { %6289 = vmatprep.mubr.msk.f32.mxu1 %vm3473_vm3, %v11174_v54  ;;  %v4249_v54 = vld [vmem:[%s10901_s3 + $0x78] sm:$0xff]  ;;  %6575 = vmatprep.subr.mxu0 %v4265_v47 }
 0x3c7   :  { %6576 = vmatpush3.msra.mxu0 %v4249_v54  ;;  %v4256_v54 = vld [vmem:[%s10901_s3 + $0xb0] sm:$0xff] }
 0x3c9   :  { %3810 = vmatmul.mubr.f32.gmra.mxu1 %v11175_v21  ;;  %v4264_v21 = vld [vmem:[%s10901_s3 + $0xf0] sm:$0xff] }
 0x3ca   :  { %6290 = vmatprep.mubr.msk.f32.mxu1 %vm3473_vm3, %v11176_v50  ;;  %6577 = vmatprep.subr.mxu0 %v4264_v21 }
 0x3cd   :  { %3815 = vmatmul.mubr.f32.gmra.mxu1 %v11177_v22  ;;  %v4248_v22 = vld [vmem:[%s10901_s3 + $0x70] sm:$0xff] }
 0x3ce   :  { %6291 = vmatprep.mubr.msk.f32.mxu1 %vm3473_vm3, %v11178_v58  ;;  %v4263_v58 = vld [vmem:[%s10901_s3 + $0xe8] sm:$0xff]  ;;  %6578 = vmatpush3.msra.mxu0 %v4248_v22 }
 0x3cf   :  { %6579 = vmatprep.subr.mxu0 %v4263_v58 }
 0x3d1   :  { %3820 = vmatmul.mubr.f32.gmra.mxu1 %v11179_v24 }
 0x3d2   :  { %6292 = vmatprep.mubr.msk.f32.mxu1 %vm3473_vm3, %v11180_v42  ;;  %v4247_v42 = vld [vmem:[%s10901_s3 + $0x68] sm:$0xff] }
 0x3d3   :  { %6580 = vmatpush3.msra.mxu0 %v4247_v42  ;;  %v4254_v42 = vld [vmem:[%s10901_s3 + $0xa0] sm:$0xff] }
 0x3d5   :  { %3825 = vmatmul.mubr.f32.gmra.mxu1 %v11181_v2  ;;  %v4262_v2 = vld [vmem:[%s10901_s3 + $0xe0] sm:$0xff] }
 0x3d6   :  { %6581 = vmatprep.subr.mxu0 %v4262_v2  ;;  %v4237_v2 = vld [vmem:[%s10901_s3 + $0x18] sm:$0xff] }
 0x409   :  { %v10215_v15 = vpop.f32.mrf.mxu1 }
 0x40b   :  { %v3653_v28 = vpop.f32.mrf.mxu1 }
 0x40d   :  { %v10217_v1 = vpop.f32.mrf.mxu1 }
 0x40f   :  { %v3658_v3 = vpop.f32.mrf.mxu1 }
 0x410   :  { %v4246_v3 = vld [vmem:[%s10901_s3 + $0x60] sm:$0xff] }
 0x411   :  { %v10219_v4 = vpop.f32.mrf.mxu1  ;;  %6582 = vmatpush3.msra.mxu0 %v4246_v3 }
 0x413   :  { %v3663_v5 = vpop.f32.mrf.mxu1 }
 0x414   :  { %v4261_v5 = vld [vmem:[%s10901_s3 + $0xd8] sm:$0xff] }
 0x415   :  { %v10221_v6 = vpop.f32.mrf.mxu1  ;;  %6583 = vmatprep.subr.mxu0 %v4261_v5 }
 0x417   :  { %v3668_v7 = vpop.f32.mrf.mxu1 }
 0x419   :  { %v10223_v8 = vpop.f32.mrf.mxu1 }
 0x41b   :  { %v3673_v9 = vpop.f32.mrf.mxu1 }
 0x41c   :  { %v4245_v9 = vld [vmem:[%s10901_s3 + $0x58] sm:$0xff] }
 0x41d   :  { %v10225_v10 = vpop.f32.mrf.mxu1  ;;  %6584 = vmatpush3.msra.mxu0 %v4245_v9 }
 0x41f   :  { %v3678_v12 = vpop.f32.mrf.mxu1 }
 0x420   :  { %v4260_v12 = vld [vmem:[%s10901_s3 + $0xd0] sm:$0xff] }
 0x421   :  { %v10227_v16 = vpop.f32.mrf.mxu1  ;;  %6585 = vmatprep.subr.mxu0 %v4260_v12 }
 0x423   :  { %v3683_v36 = vpop.f32.mrf.mxu1 }
 0x425   :  { %v10229_v61 = vpop.f32.mrf.mxu1 }
 0x427   :  { %v3688_v34 = vpop.f32.mrf.mxu1 }
 0x428   :  { %v4244_v34 = vld [vmem:[%s10901_s3 + $0x50] sm:$0xff] }
 0x429   :  { %v10231_v0 = vpop.f32.mrf.mxu1  ;;  %6586 = vmatpush3.msra.mxu0 %v4244_v34 }
 0x42b   :  { %v3693_v25 = vpop.f32.mrf.mxu1 }
 0x42c   :  { %v4259_v25 = vld [vmem:[%s10901_s3 + $0xc8] sm:$0xff] }
 0x42d   :  { %v10233_v59 = vpop.f32.mrf.mxu1  ;;  %6587 = vmatprep.subr.mxu0 %v4259_v25 }
 0x42e   :  { %v3830_v13 = vmax.f32 %v10215_v15, %v10233_v59  ;;  %v4241_v15 = vld [vmem:[%s10901_s3 + $0x38] sm:$0xff] }
 0x42f   :  { %v3698_v63 = vpop.f32.mrf.mxu1 }
 0x431   :  { %v10237_v20 = vpop.f32.mrf.mxu1 }
 0x432   :  { %v3831_v55 = vmax.f32 %v10217_v1, %v10237_v20  ;;  %v4255_v1 = vld [vmem:[%s10901_s3 + $0xa8] sm:$0xff] }
 0x433   :  { %v3703_v40 = vpop.f32.mrf.mxu1  ;;  %v4239_v20 = vld [vmem:[%s10901_s3 + $0x28] sm:$0xff] }
 0x434   :  { %v4243_v40 = vld [vmem:[%s10901_s3 + $0x48] sm:$0xff] }
 0x435   :  { %v10241_v33 = vpop.f32.mrf.mxu1  ;;  %6588 = vmatpush3.msra.mxu0 %v4243_v40 }
 0x436   :  { %v3832_v45 = vmax.f32 %v10219_v4, %v10241_v33  ;;  %v4238_v4 = vld [vmem:[%s10901_s3 + $0x20] sm:$0xff]  ;;  %v4253_v33 = vld [vmem:[%s10901_s3 + $0x98] sm:$0xff] }
 0x437   :  { %v3708_v38 = vpop.f32.mrf.mxu1 }
 0x439   :  { %v10245_v62 = vpop.f32.mrf.mxu1 }
 0x43a   :  { %v3833_v39 = vmax.f32 %v10221_v6, %v10245_v62  ;;  %v4252_v62 = vld [vmem:[%s10901_s3 + $0x90] sm:$0xff] }
 0x43b   :  { %v3713_v19 = vpop.f32.mrf.mxu1 }
 0x43d   :  { %v10249_v26 = vpop.f32.mrf.mxu1 }
 0x43e   :  { %v3834_v48 = vmax.f32 %v10223_v8, %v10249_v26 }
 0x43f   :  { %v3718_v60 = vpop.f32.mrf.mxu1 }
 0x441   :  { %v10253_v51 = vpop.f32.mrf.mxu1 }
 0x442   :  { %v3835_v35 = vmax.f32 %v10225_v10, %v10253_v51 }
 0x443   :  { %v3723_v37 = vpop.f32.mrf.mxu1 }
 0x445   :  { %v10257_v23 = vpop.f32.mrf.mxu1 }
 0x446   :  { %v3836_v27 = vmax.f32 %v10227_v16, %v10257_v23 }
 0x447   :  { %v3728_v57 = vpop.f32.mrf.mxu1 }
 0x449   :  { %v10261_v30 = vpop.f32.mrf.mxu1 }
 0x44a   :  { %v3837_v43 = vmax.f32 %v10229_v61, %v10261_v30 }
 0x44b   :  { %v3733_v53 = vpop.f32.mrf.mxu1 }
 0x44d   :  { %v10265_v11 = vpop.f32.mrf.mxu1 }
 0x44e   :  { %v3838_v18 = vmax.f32 %v10231_v0, %v10265_v11 }
 0x44f   :  { %v3738_v52 = vpop.f32.mrf.mxu1 }
 0x451   :  { %v3741_v14 = vpop.f32.mrf.mxu1 }
 0x453   :  { %v3743_v31 = vpop.f32.mrf.mxu1 }
 0x455   :  { %v3746_v46 = vpop.f32.mrf.mxu1 }
 0x457   :  { %v3748_v44 = vpop.f32.mrf.mxu1 }
 0x458   :  { %v4258_v44 = vld [vmem:[%s10901_s3 + $0xc0] sm:$0xff] }
 0x459   :  { %v10269_v17 = vpop.f32.mrf.mxu1  ;;  %6589 = vmatprep.subr.mxu0 %v4258_v44 }
 0x45b   :  { %v3753_v32 = vpop.f32.mrf.mxu1 }
 0x45c   :  { %v4242_v32 = vld [vmem:[%s10901_s3 + $0x40] sm:$0xff] }
 0x45d   :  { %v10271_v41 = vpop.f32.mrf.mxu1  ;;  %6590 = vmatpush3.msra.mxu0 %v4242_v32 }
 0x45f   :  { %v3758_v29 = vpop.f32.mrf.mxu1 }
 0x460   :  { %v4257_v29 = vld [vmem:[%s10901_s3 + $0xb8] sm:$0xff] }
 0x461   :  { %v10273_v49 = vpop.f32.mrf.mxu1  ;;  %6591 = vmatprep.subr.mxu0 %v4257_v29 }
 0x462   :  { %6592 = vmatpush3.msra.mxu0 %v4241_v15 }
 0x463   :  { %v3763_v50 = vpop.f32.mrf.mxu1  ;;  %6593 = vmatprep.subr.mxu0 %v4256_v54 }
 0x464   :  { %v4240_v50 = vld [vmem:[%s10901_s3 + $0x30] sm:$0xff] }
 0x465   :  { %v10290_v24 = vpop.f32.mrf.mxu1  ;;  %6594 = vmatpush3.msra.mxu0 %v4240_v50 }
 0x466   :  { %6595 = vmatprep.subr.mxu0 %v4255_v1 }
 0x467   :  { %v3768_v28 = vpop.f32.mrf.mxu1  ;;  %6596 = vmatpush3.msra.mxu0 %v4239_v20 }
 0x468   :  { %6597 = vmatprep.subr.mxu0 %v4254_v42 }
 0x469   :  { %v10304_v7 = vpop.f32.mrf.mxu1  ;;  %6598 = vmatpush3.msra.mxu0 %v4238_v4 }
 0x46a   :  { %6599 = vmatprep.subr.mxu0 %v4253_v33 }
 0x46b   :  { %v3773_v36 = vpop.f32.mrf.mxu1  ;;  %6600 = vmatpush3.msra.mxu0 %v4237_v2 }
 0x46c   :  { %6601 = vmatprep.subr.mxu0 %v4252_v62  ;;  %v4251_v36 = vld [vmem:[%s10901_s3 + $0x88] sm:$0xff] }
 0x46d   :  { %v10318_v63 = vpop.f32.mrf.mxu1 }
 0x46f   :  { %v3778_v38 = vpop.f32.mrf.mxu1 }
 0x470   :  { %v4235_v38 = vld [vmem:[%s10901_s3 + $0x8] sm:$0xff] }
 0x471   :  { %v10323_v19 = vpop.f32.mrf.mxu1 }
 0x473   :  { %v3783_v60 = vpop.f32.mrf.mxu1 }
 0x475   :  { %v3786_v37 = vpop.f32.mrf.mxu1 }
 0x476   :  { %v3839_v57 = vmax.f32 %v3741_v14, %v3786_v37 }
 0x477   :  { %v3788_v53 = vpop.f32.mrf.mxu1 }
 0x478   :  { %v3848_v52 = vmax.f32 %v3830_v13, %v3839_v57  ;;  %v4250_v57 = vld [vmem:[%s10901_s3 + $0x80] sm:$0xff] }
 0x479   :  { %v3791_v31 = vpop.f32.mrf.mxu1  ;;  %v4234_v53 = vld [vmem:[%s10901_s3] sm:$0xff] }
 0x47a   :  { %v3840_v14 = vmax.f32 %v3746_v46, %v3791_v31  ;;  %3858 = vst.msk [vmem:[#allocation3] sm:$0xff] %vm3857_vm4, %v3848_v52 }
 0x47b   :  { %v3793_v59 = vpop.f32.mrf.mxu1 }
 0x47c   :  { %v3849_v13 = vmax.f32 %v3831_v55, %v3840_v14 }
 0x47d   :  { %v3796_v47 = vpop.f32.mrf.mxu1 }
 0x47e   :  { %3859 = vst.msk [vmem:[#allocation3 + $0x8] sm:$0xff] %vm3857_vm4, %v3849_v13  ;;  %v3841_v46 = vmax.f32 %v10269_v17, %v3796_v47 }
 0x47f   :  { %v3798_v21 = vpop.f32.mrf.mxu1 }
 0x480   :  { %v3850_v55 = vmax.f32 %v3832_v45, %v3841_v46 }
 0x481   :  { %v3801_v17 = vpop.f32.mrf.mxu1  ;;  %v3867_v22 = vld [vmem:[#allocation3] sm:$0xff] }
 0x482   :  { %3860 = vst.msk [vmem:[#allocation3 + $0x10] sm:$0xff] %vm3857_vm4, %v3850_v55  ;;  %v3842_v58 = vmax.f32 %v10271_v41, %v3801_v17  ;;  %3875 = vst.msk [vmem:[#allocation5] sm:$0xff] %vm3857_vm4, %v3867_v22 }
 0x483   :  { %v3803_v45 = vpop.f32.mrf.mxu1 }
 0x484   :  { %v3851_v41 = vmax.f32 %v3833_v39, %v3842_v58 }
 0x485   :  { %v3806_v28 = vpop.f32.mrf.mxu1  ;;  %v4050_v3 = vld [vmem:[#allocation3 + $0x8] sm:$0xff] }
 0x486   :  { %v3934_v5 = vld [vmem:[#allocation3 + $0x2] sm:$0xff]  ;;  %3861 = vst.msk [vmem:[#allocation3 + $0x18] sm:$0xff] %vm3857_vm4, %v3851_v41  ;;  %v3843_v9 = vmax.f32 %v10273_v49, %v3806_v28  ;;  %4066 = vrot.lane.b32.xlu0 %v4050_v3, %s7709_s22  ;;  %3876 = vst.msk [vmem:[#allocation5 + $0x18] sm:$0xff] %vm3857_vm4, %v4050_v3 }
 0x487   :  { %3950 = vrot.lane.b32.xlu1 %v3934_v5, %s7710_s23  ;;  %v4034_v6 = vld [vmem:[#allocation3 + $0x7] sm:$0xff]  ;;  %v3808_v39 = vpop.f32.mrf.mxu1 }
 0x488   :  { %4042 = vst.msk [vmem:[#allocation5 + $0x8] sm:$0xff] %vm3857_vm4, %v4034_v6  ;;  %v4236_v49 = vld [vmem:[%s10901_s3 + $0x10] sm:$0xff]  ;;  %v3852_v12 = vmax.f32 %v3834_v48, %v3843_v9 }
 0x489   :  { %v3811_v34 = vpop.f32.mrf.mxu1  ;;  %v3984_v25 = vld [vmem:[#allocation3 + $0x6] sm:$0xff]  ;;  %6602 = vmatpush3.msra.mxu0 %v4236_v49  ;;  %v4051_v8 = vld [vmem:[#allocation3 + $0x10] sm:$0xff] }
 0x48a   :  { %v3884_v40 = vld [vmem:[#allocation3 + $0x1] sm:$0xff]  ;;  %3862 = vst.msk [vmem:[#allocation3 + $0x20] sm:$0xff] %vm3857_vm4, %v3852_v12  ;;  %v3844_v60 = vmax.f32 %v10290_v24, %v3811_v34  ;;  %v3985_v26 = vld [vmem:[#allocation3 + $0xe] sm:$0xff]  ;;  %6603 = vmatprep.subr.mxu0 %v4251_v36  ;;  %3877 = vst.msk [vmem:[#allocation5 + $0x30] sm:$0xff] %vm3857_vm4, %v4051_v8 }
 0x48b   :  { %4000 = vrot.lane.b32.xlu1 %v3984_v25, %s7711_s29  ;;  %3900 = vrot.lane.b32.xlu0 %v3884_v40, %s7709_s22  ;;  %v3813_v48 = vpop.f32.mrf.mxu1  ;;  %v4035_v37 = vld [vmem:[#allocation3 + $0xf] sm:$0xff]  ;;  %4202 = vst.msk [vmem:[#allocation5 + $0x10] sm:$0xff] %vm3857_vm4, %v3985_v26 }
 0x48c   :  { %v3853_v24 = vmax.f32 %v3835_v35, %v3844_v60  ;;  %4043 = vst.msk [vmem:[#allocation5 + $0x20] sm:$0xff] %vm3857_vm4, %v4035_v37  ;;  %6604 = vmatpush3.msra.mxu0 %v4235_v38  ;;  %v4098_v44 = vld [vmem:[#allocation3 + $0xc] sm:$0xff] }
 0x48d   :  { %v10416_v52 = vld [vmem:[#allocation3 + $0x16] sm:$0xff]  ;;  %v3816_v31 = vpop.f32.mrf.mxu1  ;;  %v4146_v32 = vld [vmem:[#allocation3 + $0xd] sm:$0xff]  ;;  %6605 = vmatprep.subr.mxu0 %v4250_v57 }
 0x48e   :  { %4203 = vst.msk [vmem:[#allocation5 + $0x28] sm:$0xff] %vm3857_vm4, %v10416_v52  ;;  %3863 = vst.msk [vmem:[#allocation3 + $0x28] sm:$0xff] %vm3857_vm4, %v3853_v24  ;;  %v3845_v10 = vmax.f32 %v10304_v7, %v3816_v31  ;;  %v4052_v51 = vld [vmem:[#allocation3 + $0x18] sm:$0xff]  ;;  %6606 = vmatpush3.msra.mxu0 %v4234_v53  ;;  %v3885_v59 = vld [vmem:[#allocation3 + $0x9] sm:$0xff] }
 0x48f   :  { %4114 = vrot.lane.b32.xlu1 %v4098_v44, %s7710_s23  ;;  %4162 = vrot.lane.b32.xlu0 %v4146_v32, %s7711_s29  ;;  %v3818_v35 = vpop.f32.mrf.mxu1  ;;  %v4036_v29 = vld [vmem:[#allocation3 + $0x17] sm:$0xff]  ;;  %3878 = vst.msk [vmem:[#allocation5 + $0x48] sm:$0xff] %vm3857_vm4, %v4052_v51 }
 0x490   :  { %v3854_v14 = vmax.f32 %v3836_v27, %v3845_v10  ;;  %4044 = vst.msk [vmem:[#allocation5 + $0x38] sm:$0xff] %vm3857_vm4, %v4036_v29  ;;  %v3935_v27 = vld [vmem:[#allocation3 + $0xa] sm:$0xff]  ;;  %v4147_v30 = vld [vmem:[#allocation3 + $0x15] sm:$0xff] }
 0x491   :  { %v3821_v15 = vpop.f32.mrf.mxu1  ;;  %v4053_v13 = vld [vmem:[#allocation3 + $0x20] sm:$0xff]  ;;  %v3886_v0 = vld [vmem:[#allocation3 + $0x11] sm:$0xff] }
 0x492   :  { %3864 = vst.msk [vmem:[#allocation3 + $0x30] sm:$0xff] %vm3857_vm4, %v3854_v14  ;;  %v3846_v7 = vmax.f32 %v10318_v63, %v3821_v15  ;;  %v3987_v47 = vld [vmem:[#allocation3 + $0x1e] sm:$0xff]  ;;  %3879 = vst.msk [vmem:[#allocation5 + $0x60] sm:$0xff] %vm3857_vm4, %v4053_v13  ;;  %v4099_v63 = vld [vmem:[#allocation3 + $0x14] sm:$0xff] }
 0x493   :  { %3902 = vrot.lane.b32.xlu1 %v3885_v59, %s7709_s22  ;;  %4068 = vrot.lane.b32.xlu0 %v4051_v8, %s7709_s22  ;;  %v3823_v46 = vpop.f32.mrf.mxu1  ;;  %v4037_v54 = vld [vmem:[#allocation3 + $0x1f] sm:$0xff]  ;;  %4204 = vst.msk [vmem:[#allocation5 + $0x40] sm:$0xff] %vm3857_vm4, %v3987_v47  ;;  %v3936_v58 = vld [vmem:[#allocation3 + $0x12] sm:$0xff] }
 0x494   :  { %v3855_v16 = vmax.f32 %v3837_v43, %v3846_v7  ;;  %4045 = vst.msk [vmem:[#allocation5 + $0x50] sm:$0xff] %vm3857_vm4, %v4037_v54  ;;  %v4100_v42 = vld [vmem:[#allocation3 + $0x1c] sm:$0xff]  ;;  %v10480_v12 = vld [vmem:[%s10901_s3 + $0x118] sm:$0xff] }
 0x495   :  { %v3826_v23 = vpop.f32.mrf.mxu1  ;;  %v4054_v50 = vld [vmem:[#allocation3 + $0x28] sm:$0xff]  ;;  %v4148_v41 = vld [vmem:[#allocation3 + $0x1d] sm:$0xff]  ;;  %7521 = vmatprep.subr.mxu0 %v10480_v12 }
 0x496   :  { %3865 = vst.msk [vmem:[#allocation3 + $0x38] sm:$0xff] %vm3857_vm4, %v3855_v16  ;;  %v3847_v21 = vmax.f32 %v10323_v19, %v3826_v23  ;;  %v3988_v1 = vld [vmem:[#allocation3 + $0x26] sm:$0xff]  ;;  %3880 = vst.msk [vmem:[#allocation5 + $0x78] sm:$0xff] %vm3857_vm4, %v4054_v50  ;;  %v3887_v2 = vld [vmem:[#allocation3 + $0x19] sm:$0xff] }
 0x497   :  { %3952 = vrot.lane.b32.xlu1 %v3935_v27, %s7710_s23  ;;  %4116 = vrot.lane.b32.xlu0 %v4099_v63, %s7710_s23  ;;  %v3828_v20 = vpop.f32.mrf.mxu1  ;;  %v4038_v55 = vld [vmem:[#allocation3 + $0x27] sm:$0xff]  ;;  %4205 = vst.msk [vmem:[#allocation5 + $0x58] sm:$0xff] %vm3857_vm4, %v3988_v1  ;;  %v3937_v28 = vld [vmem:[#allocation3 + $0x1a] sm:$0xff] }
 0x498   :  { %v3856_v61 = vmax.f32 %v3838_v18, %v3847_v21  ;;  %4046 = vst.msk [vmem:[#allocation5 + $0x68] sm:$0xff] %vm3857_vm4, %v4038_v55  ;;  %v4101_v3 = vld [vmem:[#allocation3 + $0x24] sm:$0xff]  ;;  %v4266_v23 = vld [vmem:[%s10901_s3 + $0x100] sm:$0xff] }
 0x499   :  { %v4055_v43 = vld [vmem:[#allocation3 + $0x30] sm:$0xff]  ;;  %v4149_v5 = vld [vmem:[#allocation3 + $0x25] sm:$0xff] }
 0x49a   :  { %3866 = vst.msk [vmem:[#allocation3 + $0x40] sm:$0xff] %vm3857_vm4, %v3856_v61  ;;  %v3989_v19 = vld [vmem:[#allocation3 + $0x2e] sm:$0xff]  ;;  %3881 = vst.msk [vmem:[#allocation5 + $0x90] sm:$0xff] %vm3857_vm4, %v4055_v43  ;;  %v3888_v9 = vld [vmem:[#allocation3 + $0x21] sm:$0xff] }
 0x49b   :  { %4002 = vrot.lane.b32.xlu1 %v3985_v26, %s7711_s29  ;;  %4164 = vrot.lane.b32.xlu0 %v4147_v30, %s7711_s29  ;;  %v4039_v17 = vld [vmem:[#allocation3 + $0x2f] sm:$0xff]  ;;  %4206 = vst.msk [vmem:[#allocation5 + $0x70] sm:$0xff] %vm3857_vm4, %v3989_v19  ;;  %v3938_v6 = vld [vmem:[#allocation3 + $0x22] sm:$0xff] }
 0x49c   :  { %4047 = vst.msk [vmem:[#allocation5 + $0x80] sm:$0xff] %vm3857_vm4, %v4039_v17  ;;  %v4102_v62 = vld [vmem:[#allocation3 + $0x2c] sm:$0xff]  ;;  %v4267_v16 = vld [vmem:[%s10901_s3 + $0x108] sm:$0xff] }
 0x49d   :  { %v3990_v11 = vld [vmem:[#allocation3 + $0x36] sm:$0xff]  ;;  %v4150_v39 = vld [vmem:[#allocation3 + $0x2d] sm:$0xff]  ;;  %v3991_v53 = vld [vmem:[#allocation3 + $0x3e] sm:$0x3] }
 0x49e   :  { %4207 = vst.msk [vmem:[#allocation5 + $0x88] sm:$0xff] %vm3857_vm4, %v3990_v11  ;;  %v4040_v18 = vld [vmem:[#allocation3 + $0x37] sm:$0xff]  ;;  %v3889_v49 = vld [vmem:[#allocation3 + $0x29] sm:$0xff] }
 0x49f   :  { %3904 = vrot.lane.b32.xlu1 %v3886_v0, %s7709_s22  ;;  %4070 = vrot.lane.b32.xlu0 %v4052_v51, %s7709_s22  ;;  %v3874_v22 = vld [vmem:[#allocation3 + $0x38] sm:$0x3]  ;;  %4048 = vst.msk [vmem:[#allocation5 + $0x98] sm:$0xff] %vm3857_vm4, %v4040_v18  ;;  %v3939_v36 = vld [vmem:[#allocation3 + $0x2a] sm:$0xff]  ;;  %v3941_v57 = vld [vmem:[#allocation3 + $0x3a] sm:$0x3] }
 0x4a0   :  { %3883 = vst.msk [vmem:[#allocation5 + $0xa8] sm:$0x3] %vm3882_vm5, %v3874_v22  ;;  %v4103_v34 = vld [vmem:[#allocation3 + $0x34] sm:$0xff] }
 0x4a1   :  { %v4201_v4 = vld [vmem:[#allocation3 + $0x46] sm:$0x3]  ;;  %v4041_v33 = vld [vmem:[#allocation3 + $0x3f] sm:$0x3]  ;;  %v4151_v25 = vld [vmem:[#allocation3 + $0x35] sm:$0xff] }
 0x4a2   :  { %4209 = vst.msk [vmem:[#allocation5 + $0xb8] sm:$0x3] %vm3882_vm5, %v4201_v4  ;;  %v4200_v45 = vld [vmem:[#allocation3 + $0x3e] sm:$0xff]  ;;  %4049 = vst.msk [vmem:[#allocation5 + $0xb0] sm:$0x3] %vm3882_vm5, %v4041_v33  ;;  %v3890_v40 = vld [vmem:[#allocation3 + $0x31] sm:$0xff] }
 0x4a3   :  { %3954 = vrot.lane.b32.xlu1 %v3936_v58, %s7710_s23  ;;  %4118 = vrot.lane.b32.xlu0 %v4100_v42, %s7710_s23  ;;  %4208 = vst.msk [vmem:[#allocation5 + $0xa0] sm:$0xff] %vm3857_vm4, %v4200_v45  ;;  %v4056_v38 = vld [vmem:[#allocation3 + $0x38] sm:$0xff]  ;;  %v4057_v37 = vld [vmem:[#allocation3 + $0x40] sm:$0x3]  ;;  %v4105_v24 = vld [vmem:[#allocation3 + $0x44] sm:$0x3] }
 0x4a4   :  { %v3940_v60 = vld [vmem:[#allocation3 + $0x32] sm:$0xff]  ;;  %v4104_v8 = vld [vmem:[#allocation3 + $0x3c] sm:$0xff] }
 0x4a5   :  { %v4152_v26 = vld [vmem:[#allocation3 + $0x3d] sm:$0xff]  ;;  %v3891_v48 = vld [vmem:[#allocation3 + $0x39] sm:$0x3] }
 0x4a7   :  { %4004 = vrot.lane.b32.xlu1 %v10416_v52, %s7711_s29  ;;  %4166 = vrot.lane.b32.xlu0 %v4148_v41, %s7711_s29  ;;  %v4153_v52 = vld [vmem:[#allocation3 + $0x45] sm:$0x3] }
 0x4ab   :  { %3906 = vrot.lane.b32.xlu1 %v3887_v2, %s7709_s22  ;;  %4072 = vrot.lane.b32.xlu0 %v4053_v13, %s7709_s22 }
 0x4af   :  { %3956 = vrot.lane.b32.xlu1 %v3937_v28, %s7710_s23  ;;  %4120 = vrot.lane.b32.xlu0 %v4101_v3, %s7710_s23 }
 0x4b3   :  { %4006 = vrot.lane.b32.xlu1 %v3987_v47, %s7711_s29  ;;  %4168 = vrot.lane.b32.xlu0 %v4149_v5, %s7711_s29  ;;  %v4268_v47 = vld [vmem:[%s10901_s3 + $0x110] sm:$0xff] }
 0x4b7   :  { %3908 = vrot.lane.b32.xlu1 %v3888_v9, %s7709_s22  ;;  %4074 = vrot.lane.b32.xlu0 %v4054_v50, %s7709_s22 }
 0x4bb   :  { %3958 = vrot.lane.b32.xlu1 %v3938_v6, %s7710_s23  ;;  %4122 = vrot.lane.b32.xlu0 %v4102_v62, %s7710_s23 }
 0x4bf   :  { %4008 = vrot.lane.b32.xlu1 %v3988_v1, %s7711_s29  ;;  %4170 = vrot.lane.b32.xlu0 %v4150_v39, %s7711_s29 }
 0x4c3   :  { %3910 = vrot.lane.b32.xlu1 %v3889_v49, %s7709_s22  ;;  %4076 = vrot.lane.b32.xlu0 %v4055_v43, %s7709_s22 }
 0x4c7   :  { %3960 = vrot.lane.b32.xlu1 %v3939_v36, %s7710_s23  ;;  %4124 = vrot.lane.b32.xlu0 %v4103_v34, %s7710_s23 }
 0x4cb   :  { %4010 = vrot.lane.b32.xlu1 %v3989_v19, %s7711_s29  ;;  %4172 = vrot.lane.b32.xlu0 %v4151_v25, %s7711_s29 }
 0x4cf   :  { %3912 = vrot.lane.b32.xlu1 %v3890_v40, %s7709_s22  ;;  %4078 = vrot.lane.b32.xlu0 %v4056_v38, %s7709_s22 }
 0x4d3   :  { %3962 = vrot.lane.b32.xlu1 %v3940_v60, %s7710_s23  ;;  %4126 = vrot.lane.b32.xlu0 %v4104_v8, %s7710_s23 }
 0x4d7   :  { %4012 = vrot.lane.b32.xlu1 %v3990_v11, %s7711_s29  ;;  %4174 = vrot.lane.b32.xlu0 %v4152_v26, %s7711_s29 }
 0x4db   :  { %3914 = vrot.lane.b32.xlu1 %v3891_v48, %s7709_s22  ;;  %4080 = vrot.lane.b32.xlu0 %v4057_v37, %s7709_s22 }
 0x4df   :  { %3964 = vrot.lane.b32.xlu1 %v3941_v57, %s7710_s23  ;;  %4128 = vrot.lane.b32.xlu0 %v4105_v24, %s7710_s23 }
 0x4e3   :  { %4014 = vrot.lane.b32.xlu1 %v3991_v53, %s7711_s29  ;;  %4176 = vrot.lane.b32.xlu0 %v4153_v52, %s7711_s29 }
 0x4f8   :  { %v4067_v31 = vpop.permute.xlu0 %4066 }
 0x4f9   :  { %v3951_v44 = vpop.permute.xlu1 %3950  ;;  %4090 = vst.msk [vmem:[#allocation5 + $0x8] sm:$0xff] %vm3924_vm6, %v4067_v31 }
 0x4fd   :  { %v4001_v32 = vpop.permute.xlu1 %4000  ;;  %v3901_v10 = vpop.permute.xlu0 %3900 }
 0x4fe   :  { %3925 = vst.msk [vmem:[#allocation5] sm:$0xff] %vm3924_vm6, %v3901_v10 }
 0x4ff   :  { %3975 = vst.msk [vmem:[#allocation5] sm:$0xff] %vm3974_vm7, %v3951_v44 }
 0x500   :  { %4025 = vst.msk [vmem:[#allocation5] sm:$0xff] %vm4024_vm8, %v4001_v32 }
 0x501   :  { %v4115_v51 = vpop.permute.xlu1 %4114  ;;  %v4163_v35 = vpop.permute.xlu0 %4162 }
 0x502   :  { %4138 = vst.msk [vmem:[#allocation5 + $0x8] sm:$0xff] %vm3974_vm7, %v4115_v51  ;;  %v4212_v51 = vld [vmem:[#allocation5 + $0x10] sm:$0xff] }
 0x503   :  { %4186 = vst.msk [vmem:[#allocation5 + $0x8] sm:$0xff] %vm4024_vm8, %v4163_v35  ;;  %v4215_v35 = vld [vmem:[#allocation5 + $0x28] sm:$0xff] }
 0x505   :  { %v3903_v29 = vpop.permute.xlu1 %3902  ;;  %v4069_v14 = vpop.permute.xlu0 %4068 }
 0x506   :  { %3926 = vst.msk [vmem:[#allocation5 + $0x18] sm:$0xff] %vm3924_vm6, %v3903_v29  ;;  %4091 = vst.msk [vmem:[#allocation5 + $0x20] sm:$0xff] %vm3924_vm6, %v4069_v14  ;;  %v4218_v29 = vld [vmem:[#allocation5 + $0x40] sm:$0xff]  ;;  %v4221_v14 = vld [vmem:[#allocation5 + $0x58] sm:$0xff] }
 0x507   :  { %v4210_v13 = vld [vmem:[#allocation5] sm:$0xff] }
 0x509   :  { %v3953_v15 = vpop.permute.xlu1 %3952  ;;  %v4117_v59 = vpop.permute.xlu0 %4116 }
 0x50a   :  { %3976 = vst.msk [vmem:[#allocation5 + $0x18] sm:$0xff] %vm3974_vm7, %v3953_v15  ;;  %4139 = vst.msk [vmem:[#allocation5 + $0x20] sm:$0xff] %vm3974_vm7, %v4117_v59  ;;  %v4211_v7 = vld [vmem:[#allocation5 + $0x8] sm:$0xff]  ;;  %v4224_v15 = vld [vmem:[#allocation5 + $0x70] sm:$0xff] }
 0x50b   :  { %4365 = vmatprep.mubr.f32.mxu0 %v4211_v7  ;;  %v4227_v59 = vld [vmem:[#allocation5 + $0x88] sm:$0xff]  ;;  %v4230_v7 = vld [vmem:[#allocation5 + $0xa0] sm:$0xff] }
 0x50c   :  { %4366 = vmatmul.mubr.f32.vlgmr.msra.gmra.mxu0 %v4210_v13  ;;  %v4233_v13 = vld [vmem:[#allocation5 + $0xb8] sm:$0x3] }
 0x50d   :  { %v4003_v46 = vpop.permute.xlu1 %4002  ;;  %v4165_v54 = vpop.permute.xlu0 %4164  ;;  %7522 = vmatpush3.msra.mxu0 %v10480_v12 }
 0x50e   :  { %4026 = vst.msk [vmem:[#allocation5 + $0x18] sm:$0xff] %vm4024_vm8, %v4003_v46  ;;  %4187 = vst.msk [vmem:[#allocation5 + $0x20] sm:$0xff] %vm4024_vm8, %v4165_v54  ;;  %7523 = vmatprep.subr.mxu0 %v4268_v47 }
 0x50f   :  { %7524 = vmatpush3.msra.mxu0 %v4268_v47  ;;  %v4519_v47 = vld [vmem:[%s10906_s8] sm:$0xff] }
 0x510   :  { %7525 = vmatprep.subr.mxu0 %v4267_v16 }
 0x511   :  { %v3905_v27 = vpop.permute.xlu1 %3904  ;;  %v4071_v63 = vpop.permute.xlu0 %4070  ;;  %7526 = vmatpush3.msra.mxu0 %v4267_v16 }
 0x512   :  { %3927 = vst.msk [vmem:[#allocation5 + $0x30] sm:$0xff] %vm3924_vm6, %v3905_v27  ;;  %4092 = vst.msk [vmem:[#allocation5 + $0x38] sm:$0xff] %vm3924_vm6, %v4071_v63  ;;  %7527 = vmatprep.subr.mxu0 %v4266_v23 }
 0x513   :  { %7528 = vmatpush3.msra.mxu0 %v4266_v23 }
 0x515   :  { %v3955_v21 = vpop.permute.xlu1 %3954  ;;  %v4119_v50 = vpop.permute.xlu0 %4118  ;;  %v4214_v1 = vld [vmem:[#allocation5 + $0x20] sm:$0xff]  ;;  %v4213_v20 = vld [vmem:[#allocation5 + $0x18] sm:$0xff] }
 0x516   :  { %3977 = vst.msk [vmem:[#allocation5 + $0x30] sm:$0xff] %vm3974_vm7, %v3955_v21  ;;  %4140 = vst.msk [vmem:[#allocation5 + $0x38] sm:$0xff] %vm3974_vm7, %v4119_v50  ;;  %4370 = vmatprep.mubr.f32.mxu0 %v4214_v1 }
 0x517   :  { %4371 = vmatmul.mubr.f32.gmra.mxu0 %v4213_v20 }
 0x519   :  { %v4005_v55 = vpop.permute.xlu1 %4004  ;;  %v4167_v61 = vpop.permute.xlu0 %4166 }
 0x51a   :  { %4027 = vst.msk [vmem:[#allocation5 + $0x30] sm:$0xff] %vm4024_vm8, %v4005_v55  ;;  %4188 = vst.msk [vmem:[#allocation5 + $0x38] sm:$0xff] %vm4024_vm8, %v4167_v61 }
 0x51d   :  { %v3907_v30 = vpop.permute.xlu1 %3906  ;;  %v4073_v43 = vpop.permute.xlu0 %4072 }
 0x51e   :  { %3928 = vst.msk [vmem:[#allocation5 + $0x48] sm:$0xff] %vm3924_vm6, %v3907_v30  ;;  %4093 = vst.msk [vmem:[#allocation5 + $0x50] sm:$0xff] %vm3924_vm6, %v4073_v43 }
 0x521   :  { %v3957_v19 = vpop.permute.xlu1 %3956  ;;  %v4121_v17 = vpop.permute.xlu0 %4120  ;;  %v4217_v0 = vld [vmem:[#allocation5 + $0x38] sm:$0xff]  ;;  %v4216_v11 = vld [vmem:[#allocation5 + $0x30] sm:$0xff] }
 0x522   :  { %3978 = vst.msk [vmem:[#allocation5 + $0x48] sm:$0xff] %vm3974_vm7, %v3957_v19  ;;  %4141 = vst.msk [vmem:[#allocation5 + $0x50] sm:$0xff] %vm3974_vm7, %v4121_v17  ;;  %4375 = vmatprep.mubr.f32.mxu0 %v4217_v0 }
 0x523   :  { %4376 = vmatmul.mubr.f32.gmra.mxu0 %v4216_v11 }
 0x525   :  { %v4007_v18 = vpop.permute.xlu1 %4006  ;;  %v4169_v22 = vpop.permute.xlu0 %4168 }
 0x526   :  { %4028 = vst.msk [vmem:[#allocation5 + $0x48] sm:$0xff] %vm4024_vm8, %v4007_v18  ;;  %4189 = vst.msk [vmem:[#allocation5 + $0x50] sm:$0xff] %vm4024_vm8, %v4169_v22 }
 0x529   :  { %v3909_v58 = vpop.permute.xlu1 %3908  ;;  %v4075_v42 = vpop.permute.xlu0 %4074 }
 0x52a   :  { %3929 = vst.msk [vmem:[#allocation5 + $0x60] sm:$0xff] %vm3924_vm6, %v3909_v58  ;;  %4094 = vst.msk [vmem:[#allocation5 + $0x68] sm:$0xff] %vm3924_vm6, %v4075_v42 }
 0x52d   :  { %v3959_v4 = vpop.permute.xlu1 %3958  ;;  %v4123_v33 = vpop.permute.xlu0 %4122  ;;  %v4220_v45 = vld [vmem:[#allocation5 + $0x50] sm:$0xff]  ;;  %v4219_v41 = vld [vmem:[#allocation5 + $0x48] sm:$0xff] }
 0x52e   :  { %3979 = vst.msk [vmem:[#allocation5 + $0x60] sm:$0xff] %vm3974_vm7, %v3959_v4  ;;  %4142 = vst.msk [vmem:[#allocation5 + $0x68] sm:$0xff] %vm3974_vm7, %v4123_v33  ;;  %4380 = vmatprep.mubr.f32.mxu0 %v4220_v45  ;;  %v6293_v45 = vld [vmem:[%s10902_s4] ss:$0 sm:$0xff] }
 0x52f   :  { %4381 = vmatmul.mubr.f32.gmra.mxu0 %v4219_v41 }
 0x531   :  { %v4009_v2 = vpop.permute.xlu1 %4008  ;;  %v4171_v28 = vpop.permute.xlu0 %4170 }
 0x532   :  { %4029 = vst.msk [vmem:[#allocation5 + $0x60] sm:$0xff] %vm4024_vm8, %v4009_v2  ;;  %4190 = vst.msk [vmem:[#allocation5 + $0x68] sm:$0xff] %vm4024_vm8, %v4171_v28 }
 0x535   :  { %v3911_v3 = vpop.permute.xlu1 %3910  ;;  %v4077_v5 = vpop.permute.xlu0 %4076 }
 0x536   :  { %3930 = vst.msk [vmem:[#allocation5 + $0x78] sm:$0xff] %vm3924_vm6, %v3911_v3  ;;  %4095 = vst.msk [vmem:[#allocation5 + $0x80] sm:$0xff] %vm3924_vm6, %v4077_v5 }
 0x539   :  { %v3961_v9 = vpop.permute.xlu1 %3960  ;;  %v4125_v6 = vpop.permute.xlu0 %4124  ;;  %v4223_v62 = vld [vmem:[#allocation5 + $0x68] sm:$0xff]  ;;  %v4222_v39 = vld [vmem:[#allocation5 + $0x60] sm:$0xff] }
 0x53a   :  { %3980 = vst.msk [vmem:[#allocation5 + $0x78] sm:$0xff] %vm3974_vm7, %v3961_v9  ;;  %4143 = vst.msk [vmem:[#allocation5 + $0x80] sm:$0xff] %vm3974_vm7, %v4125_v6  ;;  %4385 = vmatprep.mubr.f32.mxu0 %v4223_v62 }
 0x53b   :  { %4386 = vmatmul.mubr.f32.gmra.mxu0 %v4222_v39 }
 0x53d   :  { %v4011_v49 = vpop.permute.xlu1 %4010  ;;  %v4173_v12 = vpop.permute.xlu0 %4172 }
 0x53e   :  { %4030 = vst.msk [vmem:[#allocation5 + $0x78] sm:$0xff] %vm4024_vm8, %v4011_v49  ;;  %4191 = vst.msk [vmem:[#allocation5 + $0x80] sm:$0xff] %vm4024_vm8, %v4173_v12 }
 0x541   :  { %v3913_v36 = vpop.permute.xlu1 %3912  ;;  %v4079_v34 = vpop.permute.xlu0 %4078 }
 0x542   :  { %3931 = vst.msk [vmem:[#allocation5 + $0x90] sm:$0xff] %vm3924_vm6, %v3913_v36  ;;  %4096 = vst.msk [vmem:[#allocation5 + $0x98] sm:$0xff] %vm3924_vm6, %v4079_v34 }
 0x545   :  { %v3963_v25 = vpop.permute.xlu1 %3962  ;;  %v4127_v40 = vpop.permute.xlu0 %4126  ;;  %v4226_v38 = vld [vmem:[#allocation5 + $0x80] sm:$0xff]  ;;  %v4225_v60 = vld [vmem:[#allocation5 + $0x78] sm:$0xff] }
 0x546   :  { %3981 = vst.msk [vmem:[#allocation5 + $0x90] sm:$0xff] %vm3974_vm7, %v3963_v25  ;;  %4144 = vst.msk [vmem:[#allocation5 + $0x98] sm:$0xff] %vm3974_vm7, %v4127_v40  ;;  %4390 = vmatprep.mubr.f32.mxu0 %v4226_v38 }
 0x547   :  { %4391 = vmatmul.mubr.f32.gmra.mxu0 %v4225_v60 }
 0x549   :  { %v4013_v8 = vpop.permute.xlu1 %4012  ;;  %v4175_v26 = vpop.permute.xlu0 %4174 }
 0x54a   :  { %4031 = vst.msk [vmem:[#allocation5 + $0x90] sm:$0xff] %vm4024_vm8, %v4013_v8  ;;  %4192 = vst.msk [vmem:[#allocation5 + $0x98] sm:$0xff] %vm4024_vm8, %v4175_v26 }
 0x54d   :  { %v3915_v48 = vpop.permute.xlu1 %3914  ;;  %v4081_v37 = vpop.permute.xlu0 %4080 }
 0x54e   :  { %3933 = vst.msk [vmem:[#allocation5 + $0xa8] sm:$0x3] %vm3932_vm9, %v3915_v48  ;;  %4097 = vst.msk [vmem:[#allocation5 + $0xb0] sm:$0x3] %vm3932_vm9, %v4081_v37 }
 0x551   :  { %v3965_v57 = vpop.permute.xlu1 %3964  ;;  %v4129_v24 = vpop.permute.xlu0 %4128  ;;  %v4229_v53 = vld [vmem:[#allocation5 + $0x98] sm:$0xff]  ;;  %v4228_v52 = vld [vmem:[#allocation5 + $0x90] sm:$0xff] }
 0x552   :  { %3983 = vst.msk [vmem:[#allocation5 + $0xa8] sm:$0x3] %vm3982_vm10, %v3965_v57  ;;  %4145 = vst.msk [vmem:[#allocation5 + $0xb0] sm:$0x3] %vm3982_vm10, %v4129_v24  ;;  %4395 = vmatprep.mubr.f32.mxu0 %v4229_v53 }
 0x553   :  { %4396 = vmatmul.mubr.f32.gmra.mxu0 %v4228_v52 }
 0x555   :  { %v4015_v31 = vpop.permute.xlu1 %4014  ;;  %v4177_v44 = vpop.permute.xlu0 %4176 }
 0x556   :  { %4033 = vst.msk [vmem:[#allocation5 + $0xa8] sm:$0x3] %vm4032_vm11, %v4015_v31  ;;  %4193 = vst.msk [vmem:[#allocation5 + $0xb0] sm:$0x3] %vm4032_vm11, %v4177_v44 }
 0x55d   :  { %v4232_v32 = vld [vmem:[#allocation5 + $0xb0] sm:$0x3]  ;;  %v4231_v10 = vld [vmem:[#allocation5 + $0xa8] sm:$0x3] }
 0x55e   :  { %4400 = vmatprep.mubr.f32.mxu0 %v4232_v32 }
 0x55f   :  { %4401 = vmatmul.mubr.f32.gmra.mxu0 %v4231_v10 }
 0x560   :  { %7529 = vmatprep.mubr.msk.f32.mxu0 %vm3857_vm4, %v4212_v51 }
 0x563   :  { %7530 = vmatmul.mubr.msk.f32.vlgmr.msra.gmra.mxu0 %vm3857_vm4, %v4215_v35 }
 0x564   :  { %7532 = vmatprep.mubr.msk.f32.mxu0 %vm3857_vm4, %v4218_v29 }
 0x567   :  { %7533 = vmatmul.mubr.msk.f32.gmra.mxu0 %vm3857_vm4, %v4221_v14  ;;  %v4520_v14 = vld [vmem:[%s10906_s8 + $0x8] sm:$0xff] }
 0x568   :  { %7535 = vmatprep.mubr.msk.f32.mxu0 %vm3857_vm4, %v4224_v15  ;;  %v4521_v15 = vld [vmem:[%s10906_s8 + $0x10] sm:$0xff] }
 0x56b   :  { %7536 = vmatmul.mubr.msk.f32.gmra.mxu0 %vm3857_vm4, %v4227_v59  ;;  %v4522_v59 = vld [vmem:[%s10906_s8 + $0x18] sm:$0xff] }
 0x56c   :  { %7538 = vmatprep.mubr.msk.f32.mxu0 %vm3857_vm4, %v4230_v7  ;;  %v4523_v7 = vld [vmem:[%s10906_s8 + $0x20] sm:$0xff] }
 0x56f   :  { %7539 = vmatmul.mubr.msk.f32.gmra.mxu0 %vm3857_vm4, %v4233_v13  ;;  %v4524_v13 = vld [vmem:[%s10906_s8 + $0x28] sm:$0xff] }
 0x570   :  { %7557 = vmatprep.mubr.msk.f32.mxu0 %vm4535_vm12, %v4519_v47  ;;  %v4525_v47 = vld [vmem:[%s10906_s8 + $0x30] sm:$0xff] }
 0x5cc   :  { %v6607_v46 = vpop.f32.mrf.mxu0 }
 0x5ce   :  { %v6608_v54 = vpop.f32.mrf.mxu0 }
 0x5cf   :  { %v6609_v26 = vadd.f32 %v6608_v54, %v6607_v46  ;;  %v4526_v46 = vld [vmem:[%s10906_s8 + $0x38] sm:$0xff]  ;;  %v4527_v54 = vld [vmem:[%s10906_s8 + $0x40] sm:$0xff] }
 0x5d1   :  { %v4368_v44 = vadd.f32 %v6609_v26, %v6293_v45 }
 0x5d7   :  { %v6610_v16 = vpop.f32.mrf.mxu0 }
 0x5d9   :  { %v6611_v23 = vpop.f32.mrf.mxu0 }
 0x5da   :  { %v6612_v40 = vadd.f32 %v6611_v23, %v6610_v16  ;;  %v4528_v16 = vld [vmem:[%s10906_s8 + $0x48] sm:$0xff]  ;;  %v4529_v23 = vld [vmem:[%s10906_s8 + $0x50] sm:$0xff] }
 0x5dc   :  { %v4373_v24 = vadd.f32 %v6612_v40, %v6293_v45 }
 0x5e3   :  { %v6613_v27 = vpop.f32.mrf.mxu0 }
 0x5e5   :  { %v6614_v63 = vpop.f32.mrf.mxu0 }
 0x5e6   :  { %v6615_v39 = vadd.f32 %v6614_v63, %v6613_v27  ;;  %v4530_v27 = vld [vmem:[%s10906_s8 + $0x58] sm:$0xff]  ;;  %v4531_v63 = vld [vmem:[%s10906_s8 + $0x60] sm:$0xff] }
 0x5e8   :  { %v4378_v37 = vadd.f32 %v6615_v39, %v6293_v45 }
 0x5ef   :  { %v6616_v21 = vpop.f32.mrf.mxu0 }
 0x5f1   :  { %v6617_v50 = vpop.f32.mrf.mxu0 }
 0x5f2   :  { %v6618_v5 = vadd.f32 %v6617_v50, %v6616_v21  ;;  %v4532_v21 = vld [vmem:[%s10906_s8 + $0x68] sm:$0xff]  ;;  %v4533_v50 = vld [vmem:[%s10906_s8 + $0x70] sm:$0xff] }
 0x5f4   :  { %v4383_v38 = vadd.f32 %v6618_v5, %v6293_v45 }
 0x5fb   :  { %v6619_v1 = vpop.f32.mrf.mxu0 }
 0x5fd   :  { %v6620_v20 = vpop.f32.mrf.mxu0 }
 0x5fe   :  { %v6621_v2 = vadd.f32 %v6620_v20, %v6619_v1  ;;  %v4534_v1 = vld [vmem:[%s10906_s8 + $0x78] sm:$0xff] }
 0x600   :  { %v4388_v36 = vadd.f32 %v6621_v2, %v6293_v45 }
 0x607   :  { %v6622_v55 = vpop.f32.mrf.mxu0 }
 0x609   :  { %v6623_v61 = vpop.f32.mrf.mxu0 }
 0x60a   :  { %v6624_v4 = vadd.f32 %v6623_v61, %v6622_v55 }
 0x60c   :  { %v4393_v9 = vadd.f32 %v6624_v4, %v6293_v45 }
 0x613   :  { %v6625_v30 = vpop.f32.mrf.mxu0 }
 0x615   :  { %v6626_v43 = vpop.f32.mrf.mxu0 }
 0x616   :  { %v6627_v33 = vadd.f32 %v6626_v43, %v6625_v30 }
 0x618   :  { %v4398_v62 = vadd.f32 %v6627_v33, %v6293_v45 }
 0x61f   :  { %v6628_v19 = vpop.f32.mrf.mxu0 }
 0x621   :  { %v6629_v17 = vpop.f32.mrf.mxu0 }
 0x622   :  { %v6630_v58 = vadd.f32 %v6629_v17, %v6628_v19 }
 0x623   :  { %v7531_v0 = vpop.f32.mrf.mxu0 }
 0x624   :  { %v4403_v28 = vadd.f32 %v6630_v58, %v6293_v45  ;;  %v4478_v31 = vadd.f32 %v7531_v0, %v4373_v24 }
 0x625   :  { %v4472_v11 = vpop.f32.mrf.mxu0 }
 0x626   :  { %v4473_v10 = vadd.f32 %v4472_v11, %v4368_v44  ;;  %v4512_v35 = vmax.f32 %v4478_v31, 0.0 }
 0x627   :  { %v7534_v18 = vpop.f32.mrf.mxu0 }
 0x628   :  { %v4488_v48 = vadd.f32 %v7534_v18, %v4383_v38  ;;  %v4511_v29 = vmax.f32 %v4473_v10, 0.0 }
 0x629   :  { %v4482_v22 = vpop.f32.mrf.mxu0 }
 0x62a   :  { %v4483_v53 = vadd.f32 %v4482_v22, %v4378_v37  ;;  %v4514_v32 = vmax.f32 %v4488_v48, 0.0 }
 0x62b   :  { %v7537_v42 = vpop.f32.mrf.mxu0 }
 0x62c   :  { %v4498_v12 = vadd.f32 %v7537_v42, %v4393_v9  ;;  %v4513_v51 = vmax.f32 %v4483_v53, 0.0 }
 0x62d   :  { %v4492_v41 = vpop.f32.mrf.mxu0 }
 0x62e   :  { %v4493_v60 = vadd.f32 %v4492_v41, %v4388_v36  ;;  %v4516_v57 = vmax.f32 %v4498_v12, 0.0 }
 0x62f   :  { %v7540_v3 = vpop.f32.mrf.mxu0 }
 0x630   :  { %v4508_v6 = vadd.f32 %v7540_v3, %v4403_v28  ;;  %v4515_v52 = vmax.f32 %v4493_v60, 0.0 }
 0x631   :  { %v4502_v49 = vpop.f32.mrf.mxu0 }
 0x632   :  { %v4518_v34 = vmax.f32 %v4508_v6, 0.0  ;;  %v4503_v25 = vadd.f32 %v4502_v49, %v4398_v62 }
 0x634   :  { %v4517_v8 = vmax.f32 %v4503_v25, 0.0  ;;  %7541 = vmatprep.subr.msk.mxu0 %vm794_vm0, %v4518_v34 }
 0x635   :  { %7542 = vmatpush3.msk.msra.mxu0 %vm794_vm0, %v4518_v34 }
 0x636   :  { %7543 = vmatprep.subr.mxu0 %v4517_v8 }
 0x637   :  { %7544 = vmatpush3.msra.mxu0 %v4517_v8 }
 0x638   :  { %7545 = vmatprep.subr.mxu0 %v4516_v57 }
 0x639   :  { %7546 = vmatpush3.msra.mxu0 %v4516_v57 }
 0x63a   :  { %7547 = vmatprep.subr.mxu0 %v4515_v52 }
 0x63b   :  { %7548 = vmatpush3.msra.mxu0 %v4515_v52 }
 0x63c   :  { %7549 = vmatprep.subr.mxu0 %v4514_v32 }
 0x63d   :  { %7550 = vmatpush3.msra.mxu0 %v4514_v32 }
 0x63e   :  { %7551 = vmatprep.subr.mxu0 %v4513_v51 }
 0x63f   :  { %7552 = vmatpush3.msra.mxu0 %v4513_v51 }
 0x640   :  { %7553 = vmatprep.subr.mxu0 %v4512_v35 }
 0x641   :  { %7554 = vmatpush3.msra.mxu0 %v4512_v35 }
 0x642   :  { %7555 = vmatprep.subr.mxu0 %v4511_v29 }
 0x643   :  { %7556 = vmatpush3.msra.mxu0 %v4511_v29 }
 0x644   :  { %7558 = vmatmul.mubr.msk.f32.vlgmr.msra.gmra.mxu0 %vm4535_vm12, %v4520_v14 }
 0x645   :  { %7560 = vmatprep.mubr.msk.f32.mxu0 %vm4535_vm12, %v4521_v15 }
 0x648   :  { %7561 = vmatmul.mubr.msk.f32.gmra.mxu0 %vm4535_vm12, %v4522_v59 }
 0x649   :  { %7563 = vmatprep.mubr.msk.f32.mxu0 %vm4535_vm12, %v4523_v7 }
 0x64c   :  { %7564 = vmatmul.mubr.msk.f32.gmra.mxu0 %vm4535_vm12, %v4524_v13 }
 0x64d   :  { %7566 = vmatprep.mubr.msk.f32.mxu0 %vm4535_vm12, %v4525_v47 }
 0x650   :  { %7567 = vmatmul.mubr.msk.f32.gmra.mxu0 %vm4535_vm12, %v4526_v46 }
 0x651   :  { %7569 = vmatprep.mubr.msk.f32.mxu0 %vm4535_vm12, %v4527_v54 }
 0x654   :  { %7570 = vmatmul.mubr.msk.f32.gmra.mxu0 %vm4535_vm12, %v4528_v16 }
 0x655   :  { %7572 = vmatprep.mubr.msk.f32.mxu0 %vm4535_vm12, %v4529_v23 }
 0x658   :  { %7573 = vmatmul.mubr.msk.f32.gmra.mxu0 %vm4535_vm12, %v4530_v27 }
 0x659   :  { %7575 = vmatprep.mubr.msk.f32.mxu0 %vm4535_vm12, %v4531_v63 }
 0x65c   :  { %7576 = vmatmul.mubr.msk.f32.gmra.mxu0 %vm4535_vm12, %v4532_v21 }
 0x65d   :  { %7578 = vmatprep.mubr.msk.f32.mxu0 %vm4535_vm12, %v4533_v50 }
 0x660   :  { %7579 = vmatmul.mubr.msk.f32.gmra.mxu0 %vm4535_vm12, %v4534_v1 }
 0x704   :  { %v7559_v20 = vpop.f32.mrf.mxu0 }
 0x706   :  { %v4653_v55 = vpop.f32.mrf.mxu0 }
 0x708   :  { %v7562_v61 = vpop.f32.mrf.mxu0 }
 0x70a   :  { %v4663_v30 = vpop.f32.mrf.mxu0 }
 0x70c   :  { %v7565_v43 = vpop.f32.mrf.mxu0 }
 0x70d   :  { %v4733_v4 = vmax.f32 %v7559_v20, %v7565_v43 }
 0x70e   :  { %v4673_v19 = vpop.f32.mrf.mxu0 }
 0x70f   :  { %v4732_v41 = vmax.f32 %v4653_v55, %v4673_v19  ;;  %v11182_v55 = vld [vmem:[#allocation119_spill] sm:$0xff] }
 0x710   :  { %v7568_v17 = vpop.f32.mrf.mxu0  ;;  %6667 = vmatprep.subr.mxu1 %v11182_v55 }
 0x711   :  { %v4735_v5 = vmax.f32 %v7562_v61, %v7568_v17  ;;  %v11183_v61 = vld [vmem:[#allocation151_spill] sm:$0xff] }
 0x712   :  { %v4683_v0 = vpop.f32.mrf.mxu0  ;;  %6708 = vmatprep.subr.mxu0 %v11183_v61 }
 0x713   :  { %v4734_v39 = vmax.f32 %v4663_v30, %v4683_v0 }
 0x714   :  { %v7571_v11 = vpop.f32.mrf.mxu0 }
 0x716   :  { %v4693_v18 = vpop.f32.mrf.mxu0 }
 0x718   :  { %v7574_v22 = vpop.f32.mrf.mxu0 }
 0x71a   :  { %v4703_v58 = vpop.f32.mrf.mxu0 }
 0x71c   :  { %v7577_v42 = vpop.f32.mrf.mxu0 }
 0x71d   :  { %v4737_v33 = vmax.f32 %v7571_v11, %v7577_v42 }
 0x71e   :  { %v4713_v45 = vpop.f32.mrf.mxu0 }
 0x71f   :  { %v4741_v2 = vmax.f32 %v4733_v4, %v4737_v33  ;;  %v4736_v28 = vmax.f32 %v4693_v18, %v4713_v45 }
 0x720   :  { %v7580_v3 = vpop.f32.mrf.mxu0 }
 0x721   :  { %4746 = vst.msk [vmem:[#allocation4 + $0x8] sm:$0xff] %vm4744_vm13, %v4741_v2  ;;  %v4740_v9 = vmax.f32 %v4732_v41, %v4736_v28  ;;  %v4739_v6 = vmax.f32 %v7574_v22, %v7580_v3 }
 0x722   :  { %v4723_v62 = vpop.f32.mrf.mxu0 }
 0x723   :  { %4745 = vst.msk [vmem:[#allocation4] sm:$0xff] %vm4744_vm13, %v4740_v9  ;;  %v4743_v49 = vmax.f32 %v4735_v5, %v4739_v6  ;;  %v4738_v12 = vmax.f32 %v4703_v58, %v4723_v62 }
 0x725   :  { %4748 = vst.msk [vmem:[#allocation4 + $0x18] sm:$0xff] %vm4744_vm13, %v4743_v49  ;;  %v4742_v36 = vmax.f32 %v4734_v39, %v4738_v12 }
 0x727   :  { %4747 = vst.msk [vmem:[#allocation4 + $0x10] sm:$0xff] %vm4744_vm13, %v4742_v36 }
 0x728   :  { %v4750_v34 = vld [vmem:[#allocation4 + $0x8] sm:$0xff] }
 0x729   :  { %4753 = vst.msk [vmem:[#allocation6 + $0x28] sm:$0xff] %vm4744_vm13, %v4750_v34  ;;  %4827 = vst.msk [vmem:[#allocation6 + $0x18] sm:$0xff] %vm4744_vm13, %v4750_v34 }
 0x72a   :  { %v4782_v25 = vld [vmem:[#allocation4 + $0x4] sm:$0xff] }
 0x72b   :  { %v4756_v40 = vld [vmem:[#allocation4 + $0x1] sm:$0xff]  ;;  %4788 = vrot.lane.b32.xlu1 %v4782_v25, %s7710_s23 }
 0x72c   :  { %4762 = vrot.lane.b32.xlu0 %v4756_v40, %s7710_s23  ;;  %v4776_v38 = vld [vmem:[#allocation4 + $0x2] sm:$0xff]  ;;  %v4850_v26 = vld [vmem:[#allocation4 + $0x1a] sm:$0x3f] }
 0x72d   :  { %v4749_v60 = vld [vmem:[#allocation4] sm:$0xff]  ;;  %4779 = vst.msk [vmem:[#allocation6 + $0x8] sm:$0xff] %vm4744_vm13, %v4776_v38  ;;  %v4826_v48 = vld [vmem:[#allocation4 + $0x18] sm:$0x3f] }
 0x72e   :  { %v4800_v8 = vld [vmem:[#allocation4 + $0x5] sm:$0xff]  ;;  %4752 = vst.msk [vmem:[#allocation6] sm:$0xff] %vm4744_vm13, %v4749_v60  ;;  %v4849_v24 = vld [vmem:[#allocation4 + $0x12] sm:$0xff] }
 0x72f   :  { %4803 = vst.msk [vmem:[#allocation6 + $0x10] sm:$0xff] %vm4744_vm13, %v4800_v8  ;;  %v4806_v37 = vld [vmem:[#allocation4 + $0x6] sm:$0xff]  ;;  %4852 = vst.msk [vmem:[#allocation6 + $0x48] sm:$0xff] %vm4744_vm13, %v4849_v24  ;;  %v4758_v52 = vld [vmem:[#allocation4 + $0x11] sm:$0x3f] }
 0x730   :  { %4853 = vst.msk [vmem:[#allocation6 + $0x70] sm:$0x3f] %vm4754_vm14, %v4850_v26  ;;  %4829 = vst.msk [vmem:[#allocation6 + $0x68] sm:$0x3f] %vm4754_vm14, %v4826_v48  ;;  %v4848_v57 = vld [vmem:[#allocation4 + $0xa] sm:$0xff]  ;;  %4812 = vrot.lane.b32.xlu0 %v4806_v37, %s7710_s23 }
 0x731   :  { %v4757_v53 = vld [vmem:[#allocation4 + $0x9] sm:$0xff]  ;;  %4851 = vst.msk [vmem:[#allocation6 + $0x20] sm:$0xff] %vm4744_vm13, %v4848_v57  ;;  %4780 = vst.msk [vmem:[#allocation6 + $0x30] sm:$0xff] %vm4744_vm13, %v4848_v57  ;;  %v4778_v44 = vld [vmem:[#allocation4 + $0x12] sm:$0x3f] }
 0x732   :  { %4764 = vrot.lane.b32.xlu1 %v4757_v53, %s7710_s23  ;;  %v4751_v31 = vld [vmem:[#allocation4 + $0x10] sm:$0x3f]  ;;  %4781 = vst.msk [vmem:[#allocation6 + $0x58] sm:$0x3f] %vm4754_vm14, %v4778_v44  ;;  %v4808_v15 = vld [vmem:[#allocation4 + $0x16] sm:$0x3f] }
 0x733   :  { %v4801_v32 = vld [vmem:[#allocation4 + $0xd] sm:$0xff]  ;;  %4755 = vst.msk [vmem:[#allocation6 + $0x50] sm:$0x3f] %vm4754_vm14, %v4751_v31  ;;  %v4802_v51 = vld [vmem:[#allocation4 + $0x15] sm:$0x3f] }
 0x734   :  { %v4784_v10 = vld [vmem:[#allocation4 + $0x14] sm:$0x3f]  ;;  %4804 = vst.msk [vmem:[#allocation6 + $0x38] sm:$0xff] %vm4744_vm13, %v4801_v32  ;;  %4766 = vrot.lane.b32.xlu0 %v4758_v52, %s7710_s23  ;;  %v4783_v29 = vld [vmem:[#allocation4 + $0xc] sm:$0xff] }
 0x735   :  { %v4825_v35 = vld [vmem:[#allocation4 + $0x10] sm:$0xff]  ;;  %4805 = vst.msk [vmem:[#allocation6 + $0x60] sm:$0x3f] %vm4754_vm14, %v4802_v51  ;;  %v4832_v7 = vld [vmem:[#allocation4 + $0x19] sm:$0x3f] }
 0x736   :  { %4792 = vrot.lane.b32.xlu1 %v4784_v10, %s7710_s23  ;;  %4828 = vst.msk [vmem:[#allocation6 + $0x40] sm:$0xff] %vm4744_vm13, %v4825_v35  ;;  %v4807_v14 = vld [vmem:[#allocation4 + $0xe] sm:$0xff] }
 0x737   :  { %v4831_v59 = vld [vmem:[#allocation4 + $0x11] sm:$0xff] }
 0x738   :  { %4790 = vrot.lane.b32.xlu0 %v4783_v29, %s7710_s23 }
 0x73a   :  { %4814 = vrot.lane.b32.xlu1 %v4807_v14, %s7710_s23 }
 0x73c   :  { %4816 = vrot.lane.b32.xlu0 %v4808_v15, %s7710_s23 }
 0x73e   :  { %4836 = vrot.lane.b32.xlu1 %v4757_v53, %s7710_s23 }
 0x740   :  { %4838 = vrot.lane.b32.xlu0 %v4831_v59, %s7710_s23 }
 0x742   :  { %4840 = vrot.lane.b32.xlu1 %v4832_v7, %s7710_s23 }
 0x79d   :  { %v4789_v13 = vpop.permute.xlu1 %4788 }
 0x79e   :  { %v4763_v47 = vpop.permute.xlu0 %4762  ;;  %4797 = vst.msk [vmem:[#allocation6 + $0x8] sm:$0xff] %vm4771_vm15, %v4789_v13 }
 0x79f   :  { %4772 = vst.msk [vmem:[#allocation6] sm:$0xff] %vm4771_vm15, %v4763_v47 }
 0x7a2   :  { %v4813_v46 = vpop.permute.xlu0 %4812 }
 0x7a3   :  { %4821 = vst.msk [vmem:[#allocation6 + $0x10] sm:$0xff] %vm4771_vm15, %v4813_v46 }
 0x7a4   :  { %v4765_v54 = vpop.permute.xlu1 %4764 }
 0x7a5   :  { %4773 = vst.msk [vmem:[#allocation6 + $0x28] sm:$0xff] %vm4771_vm15, %v4765_v54 }
 0x7a6   :  { %v4767_v16 = vpop.permute.xlu0 %4766 }
 0x7a7   :  { %4775 = vst.msk [vmem:[#allocation6 + $0x50] sm:$0x3f] %vm4774_vm1, %v4767_v16 }
 0x7a8   :  { %v4793_v23 = vpop.permute.xlu1 %4792 }
 0x7a9   :  { %4799 = vst.msk [vmem:[#allocation6 + $0x58] sm:$0x3f] %vm4774_vm1, %v4793_v23 }
 0x7aa   :  { %v4791_v27 = vpop.permute.xlu0 %4790 }
 0x7ab   :  { %4798 = vst.msk [vmem:[#allocation6 + $0x30] sm:$0xff] %vm4771_vm15, %v4791_v27 }
 0x7ac   :  { %v4815_v63 = vpop.permute.xlu1 %4814 }
 0x7ad   :  { %4822 = vst.msk [vmem:[#allocation6 + $0x38] sm:$0xff] %vm4771_vm15, %v4815_v63 }
 0x7ae   :  { %v4817_v21 = vpop.permute.xlu0 %4816 }
 0x7af   :  { %4823 = vst.msk [vmem:[#allocation6 + $0x60] sm:$0x3f] %vm4774_vm1, %v4817_v21 }
 0x7b0   :  { %v4837_v50 = vpop.permute.xlu1 %4836 }
 0x7b1   :  { %4845 = vst.msk [vmem:[#allocation6 + $0x18] sm:$0xff] %vm4771_vm15, %v4837_v50 }
 0x7b2   :  { %v4839_v1 = vpop.permute.xlu0 %4838 }
 0x7b3   :  { %4846 = vst.msk [vmem:[#allocation6 + $0x40] sm:$0xff] %vm4771_vm15, %v4839_v1 }
 0x7b4   :  { %v4841_v20 = vpop.permute.xlu1 %4840 }
 0x7b5   :  { %4847 = vst.msk [vmem:[#allocation6 + $0x68] sm:$0x3f] %vm4774_vm1, %v4841_v20 }
 0x7b6   :  { %7697 = dma.done.wait [#allocation11 + $0x1], 9216 }
 0x7b7   :  { %7698 = vsyncadd [#allocation11 + $0x1], 4294958080  ;;  %v11184_v30 = vld [vmem:[#allocation103_spill] sm:$0xff]  ;;  %v11186_v19 = vld [vmem:[#allocation118_spill] sm:$0xff]  ;;  %vm5208_vm3 = vcmask 1045504   ;;  %vm5204_vm4 = vcmask 179200  }
 0x7b8   :  { %6668 = vmatpush3.msra.mxu1 %v11184_v30  ;;  %v11185_v43 = vld [vmem:[#allocation135_spill] sm:$0xff]  ;;  %v11187_v17 = vld [vmem:[#allocation150_spill] sm:$0xff]  ;;  %v11190_v18 = vld [vmem:[#allocation117_spill] sm:$0xff] }
 0x7b9   :  { %6709 = vmatpush3.msra.mxu0 %v11185_v43  ;;  %6669 = vmatprep.subr.mxu1 %v11186_v19  ;;  %v11188_v0 = vld [vmem:[#allocation102_spill] sm:$0xff]  ;;  %v11191_v22 = vld [vmem:[#allocation149_spill] sm:$0xff]  ;;  %v11194_v4 = vld [vmem:[#allocation116_spill] sm:$0xff] }
 0x7ba   :  { %6710 = vmatprep.subr.mxu0 %v11187_v17  ;;  %6670 = vmatpush3.msra.mxu1 %v11188_v0  ;;  %v11189_v11 = vld [vmem:[#allocation134_spill] sm:$0xff]  ;;  %v11192_v58 = vld [vmem:[#allocation101_spill] sm:$0xff]  ;;  %v11195_v33 = vld [vmem:[#allocation148_spill] sm:$0xff] }
 0x7bb   :  { %6711 = vmatpush3.msra.mxu0 %v11189_v11  ;;  %6671 = vmatprep.subr.mxu1 %v11190_v18  ;;  %v11193_v42 = vld [vmem:[#allocation133_spill] sm:$0xff]  ;;  %v11196_v45 = vld [vmem:[#allocation100_spill] sm:$0xff]  ;;  %v11198_v2 = vld [vmem:[#allocation115_spill] sm:$0xff] }
 0x7bc   :  { %6712 = vmatprep.subr.mxu0 %v11191_v22  ;;  %6672 = vmatpush3.msra.mxu1 %v11192_v58  ;;  %v11197_v41 = vld [vmem:[#allocation132_spill] sm:$0xff]  ;;  %v11199_v28 = vld [vmem:[#allocation147_spill] sm:$0xff]  ;;  %v11202_v9 = vld [vmem:[#allocation114_spill] sm:$0xff] }
 0x7bd   :  { %6713 = vmatpush3.msra.mxu0 %v11193_v42  ;;  %6673 = vmatprep.subr.mxu1 %v11194_v4  ;;  %v11200_v3 = vld [vmem:[#allocation99_spill] sm:$0xff]  ;;  %v11203_v6 = vld [vmem:[#allocation146_spill] sm:$0xff]  ;;  %v11206_v49 = vld [vmem:[#allocation113_spill] sm:$0xff] }
 0x7be   :  { %6714 = vmatprep.subr.mxu0 %v11195_v33  ;;  %6674 = vmatpush3.msra.mxu1 %v11196_v45  ;;  %v11201_v5 = vld [vmem:[#allocation131_spill] sm:$0xff]  ;;  %v11204_v62 = vld [vmem:[#allocation98_spill] sm:$0xff]  ;;  %v11207_v12 = vld [vmem:[#allocation145_spill] sm:$0xff] }
 0x7bf   :  { %6715 = vmatpush3.msra.mxu0 %v11197_v41  ;;  %6675 = vmatprep.subr.mxu1 %v11198_v2  ;;  %v11205_v39 = vld [vmem:[#allocation130_spill] sm:$0xff]  ;;  %v11208_v36 = vld [vmem:[#allocation97_spill] sm:$0xff]  ;;  %v11210_v25 = vld [vmem:[#allocation112_spill] sm:$0xff] }
 0x7c0   :  { %6716 = vmatprep.subr.mxu0 %v11199_v28  ;;  %6676 = vmatpush3.msra.mxu1 %v11200_v3  ;;  %v11209_v34 = vld [vmem:[#allocation129_spill] sm:$0xff]  ;;  %v11211_v40 = vld [vmem:[#allocation144_spill] sm:$0xff]  ;;  %v11214_v8 = vld [vmem:[#allocation111_spill] sm:$0xff] }
 0x7c1   :  { %6717 = vmatpush3.msra.mxu0 %v11201_v5  ;;  %6677 = vmatprep.subr.mxu1 %v11202_v9  ;;  %v11212_v38 = vld [vmem:[#allocation96_spill] sm:$0xff]  ;;  %v11215_v26 = vld [vmem:[#allocation143_spill] sm:$0xff]  ;;  %v11218_v57 = vld [vmem:[#allocation110_spill] sm:$0xff] }
 0x7c2   :  { %6718 = vmatprep.subr.mxu0 %v11203_v6  ;;  %6678 = vmatpush3.msra.mxu1 %v11204_v62  ;;  %v11213_v60 = vld [vmem:[#allocation128_spill] sm:$0xff]  ;;  %v11216_v48 = vld [vmem:[#allocation95_spill] sm:$0xff]  ;;  %v11219_v24 = vld [vmem:[#allocation142_spill] sm:$0xff] }
 0x7c3   :  { %6719 = vmatpush3.msra.mxu0 %v11205_v39  ;;  %6679 = vmatprep.subr.mxu1 %v11206_v49  ;;  %v11217_v37 = vld [vmem:[#allocation127_spill] sm:$0xff]  ;;  %v11220_v53 = vld [vmem:[#allocation94_spill] sm:$0xff]  ;;  %v11222_v31 = vld [vmem:[#allocation109_spill] sm:$0xff] }
 0x7c4   :  { %6720 = vmatprep.subr.mxu0 %v11207_v12  ;;  %6680 = vmatpush3.msra.mxu1 %v11208_v36  ;;  %v11221_v52 = vld [vmem:[#allocation126_spill] sm:$0xff]  ;;  %v11223_v44 = vld [vmem:[#allocation141_spill] sm:$0xff]  ;;  %v11226_v51 = vld [vmem:[#allocation108_spill] sm:$0xff] }
 0x7c5   :  { %6721 = vmatpush3.msra.mxu0 %v11209_v34  ;;  %6681 = vmatprep.subr.mxu1 %v11210_v25  ;;  %v11224_v32 = vld [vmem:[#allocation93_spill] sm:$0xff]  ;;  %v11227_v35 = vld [vmem:[#allocation140_spill] sm:$0xff]  ;;  %v11230_v15 = vld [vmem:[#allocation107_spill] sm:$0xff] }
 0x7c6   :  { %6722 = vmatprep.subr.mxu0 %v11211_v40  ;;  %6682 = vmatpush3.msra.mxu1 %v11212_v38  ;;  %v11225_v10 = vld [vmem:[#allocation125_spill] sm:$0xff]  ;;  %v11228_v29 = vld [vmem:[#allocation92_spill] sm:$0xff]  ;;  %v11231_v59 = vld [vmem:[#allocation139_spill] sm:$0xff] }
 0x7c7   :  { %6723 = vmatpush3.msra.mxu0 %v11213_v60  ;;  %6683 = vmatprep.subr.mxu1 %v11214_v8  ;;  %v11229_v14 = vld [vmem:[#allocation124_spill] sm:$0xff]  ;;  %v11232_v7 = vld [vmem:[#allocation91_spill] sm:$0xff]  ;;  %v11234_v47 = vld [vmem:[#allocation106_spill] sm:$0xff] }
 0x7c8   :  { %6724 = vmatprep.subr.mxu0 %v11215_v26  ;;  %6684 = vmatpush3.msra.mxu1 %v11216_v48  ;;  %v11233_v13 = vld [vmem:[#allocation123_spill] sm:$0xff]  ;;  %v11235_v46 = vld [vmem:[#allocation138_spill] sm:$0xff]  ;;  %v11238_v27 = vld [vmem:[#allocation105_spill] sm:$0xff] }
 0x7c9   :  { %6725 = vmatpush3.msra.mxu0 %v11217_v37  ;;  %6685 = vmatprep.subr.mxu1 %v11218_v57  ;;  %v4858_v54 = vld [vmem:[#allocation6 + $0x8] sm:$0xff]  ;;  %v4857_v50 = vld [vmem:[#allocation6] sm:$0xff]  ;;  %v4860_v55 = vld [vmem:[#allocation6 + $0x18] sm:$0xff] }
 0x7ca   :  { %6726 = vmatprep.subr.mxu0 %v11219_v24  ;;  %6686 = vmatpush3.msra.mxu1 %v11220_v53  ;;  %v11236_v16 = vld [vmem:[#allocation90_spill] sm:$0xff]  ;;  %v11239_v63 = vld [vmem:[#allocation137_spill] sm:$0xff]  ;;  %v11241_v1 = vld [vmem:[#allocation104_spill] sm:$0xff] }
 0x7cb   :  { %6727 = vmatpush3.msra.mxu0 %v11221_v52  ;;  %6687 = vmatprep.subr.mxu1 %v11222_v31  ;;  %v11237_v23 = vld [vmem:[#allocation122_spill] sm:$0xff]  ;;  %v11240_v21 = vld [vmem:[#allocation89_spill] sm:$0xff]  ;;  %v11243_v61 = vld [vmem:[#allocation88_spill] sm:$0xff] }
 0x7cc   :  { %6728 = vmatprep.subr.mxu0 %v11223_v44  ;;  %6688 = vmatpush3.msra.mxu1 %v11224_v32  ;;  %v11242_v20 = vld [vmem:[#allocation121_spill] sm:$0xff]  ;;  %v11244_v30 = vld [vmem:[#allocation136_spill] sm:$0xff]  ;;  %v4859_v43 = vld [vmem:[#allocation6 + $0x10] sm:$0xff] }
 0x7cd   :  { %6729 = vmatpush3.msra.mxu0 %v11225_v10  ;;  %6689 = vmatprep.subr.mxu1 %v11226_v51  ;;  %v4863_v19 = vld [vmem:[#allocation6 + $0x30] sm:$0xff]  ;;  %v11245_v17 = vld [vmem:[#allocation120_spill] sm:$0xff]  ;;  %v4862_v18 = vld [vmem:[#allocation6 + $0x28] sm:$0xff] }
 0x7ce   :  { %6730 = vmatprep.subr.mxu0 %v11227_v35  ;;  %6690 = vmatpush3.msra.mxu1 %v11228_v29  ;;  %v4865_v0 = vld [vmem:[#allocation6 + $0x40] sm:$0xff]  ;;  %v11246_v11 = vld [vmem:[#allocation159_spill] sm:$0xff]  ;;  %v11247_v58 = vld [vmem:[#allocation158_spill] sm:$0xff] }
 0x7cf   :  { %6731 = vmatpush3.msra.mxu0 %v11229_v14  ;;  %6691 = vmatprep.subr.mxu1 %v11230_v15  ;;  %v4864_v22 = vld [vmem:[#allocation6 + $0x38] sm:$0xff]  ;;  %v4870_v4 = vld [vmem:[#allocation6 + $0x68] sm:$0x3f]  ;;  %v4867_v45 = vld [vmem:[#allocation6 + $0x50] sm:$0x3f] }
 0x7d0   :  { %6732 = vmatprep.subr.mxu0 %v11231_v59  ;;  %6692 = vmatpush3.msra.mxu1 %v11232_v7  ;;  %v4868_v42 = vld [vmem:[#allocation6 + $0x58] sm:$0x3f]  ;;  %v11248_v33 = vld [vmem:[#allocation157_spill] sm:$0xff]  ;;  %v11251_v3 = vld [vmem:[#allocation154_spill] sm:$0xff] }
 0x7d1   :  { %6733 = vmatpush3.msra.mxu0 %v11233_v13  ;;  %6693 = vmatprep.subr.mxu1 %v11234_v47  ;;  %v4869_v41 = vld [vmem:[#allocation6 + $0x60] sm:$0x3f]  ;;  %v11250_v28 = vld [vmem:[#allocation155_spill] sm:$0xff]  ;;  %v4866_v62 = vld [vmem:[#allocation6 + $0x48] sm:$0xff] }
 0x7d2   :  { %6734 = vmatprep.subr.mxu0 %v11235_v46  ;;  %6694 = vmatpush3.msra.mxu1 %v11236_v16  ;;  %v11249_v2 = vld [vmem:[#allocation156_spill] sm:$0xff]  ;;  %v11252_v5 = vld [vmem:[#allocation153_spill] sm:$0xff]  ;;  %v4871_v39 = vld [vmem:[#allocation6 + $0x70] sm:$0x3f] }
 0x7d3   :  { %6735 = vmatpush3.msra.mxu0 %v11237_v23  ;;  %6695 = vmatprep.subr.mxu1 %v11238_v27  ;;  %v4861_v9 = vld [vmem:[#allocation6 + $0x20] sm:$0xff]  ;;  %v6319_v31 = vld [vmem:[%s10904_s6] ss:$0 sm:$0xff] }
 0x7d4   :  { %6736 = vmatprep.subr.mxu0 %v11239_v63  ;;  %6696 = vmatpush3.msra.mxu1 %v11240_v21  ;;  %v11253_v6 = vld [vmem:[#allocation152_spill] sm:$0xff] }
 0x7d5   :  { %5024 = vmatprep.mubr.f32.mxu1 %v4858_v54  ;;  %6697 = vmatprep.subr.mxu1 %v11241_v1  ;;  %v5203_v1 = vld [vmem:[%s10907_s9] sm:$0x3] }
 0x7d6   :  { %6737 = vmatpush3.msra.mxu0 %v11242_v20  ;;  %6698 = vmatpush3.msra.mxu1 %v11243_v61  ;;  %v6328_v20 = vld [vmem:[%s10907_s9 + $0x4] sm:$0x3]  ;;  %v6331_v61 = vld [vmem:[%s10907_s9 + $0x6] sm:$0x3] }
 0x7d7   :  { %6738 = vmatprep.subr.mxu0 %v11244_v30  ;;  %5025 = vmatmul.mubr.f32.vlgmr.msra.gmra.mxu1 %v4857_v50 }
 0x7d8   :  { %7581 = vmatprep.subr.mxu1 %v11117_v56  ;;  %6739 = vmatpush3.msra.mxu0 %v11245_v17 }
 0x7d9   :  { %5104 = vmatprep.mubr.f32.mxu0 %v4860_v55  ;;  %7582 = vmatpush3.msra.mxu1 %v11246_v11  ;;  %v6325_v55 = vld [vmem:[%s10907_s9 + $0x2] sm:$0x3] }
 0x7da   :  { %5105 = vmatmul.mubr.f32.vlgmr.msra.gmra.mxu0 %v4859_v43  ;;  %7583 = vmatprep.subr.mxu1 %v11117_v56 }
 0x7db   :  { %5029 = vmatprep.mubr.f32.mxu1 %v4863_v19  ;;  %7584 = vmatpush3.msra.mxu1 %v11247_v58 }
 0x7dc   :  { %5109 = vmatprep.mubr.f32.mxu0 %v4865_v0  ;;  %7585 = vmatprep.subr.mxu1 %v11117_v56 }
 0x7dd   :  { %5030 = vmatmul.mubr.f32.gmra.mxu1 %v4862_v18  ;;  %7624 = vmatprep.subr.mxu0 %v11117_v56 }
 0x7de   :  { %7586 = vmatpush3.msra.mxu1 %v11248_v33  ;;  %5110 = vmatmul.mubr.f32.gmra.mxu0 %v4864_v22  ;;  %v11254_v33 = vld [vmem:[#allocation221_spill] sm:$0xff] }
 0x7df   :  { %7587 = vmatprep.subr.mxu1 %v11117_v56  ;;  %5034 = vmatprep.mubr.f32.mxu1 %v4868_v42 }
 0x7e0   :  { %7588 = vmatpush3.msra.mxu1 %v11249_v2  ;;  %5114 = vmatprep.mubr.f32.mxu0 %v4870_v4 }
 0x7e1   :  { %7589 = vmatprep.subr.mxu1 %v11117_v56  ;;  %5035 = vmatmul.mubr.f32.gmra.mxu1 %v4867_v45  ;;  %v11255_v45 = vld [vmem:[#allocation223_spill] sm:$0xff] }
 0x7e2   :  { %7590 = vmatpush3.msra.mxu1 %v11250_v28  ;;  %5115 = vmatmul.mubr.f32.gmra.mxu0 %v4869_v41 }
 0x7e3   :  { %7591 = vmatprep.subr.mxu1 %v11117_v56  ;;  %7597 = vmatprep.mubr.msk.f32.mxu1 %vm7707_vm2, %v11117_v56 }
 0x7e4   :  { %7592 = vmatpush3.msra.mxu1 %v11251_v3  ;;  %7630 = vmatprep.mubr.msk.f32.mxu0 %vm7707_vm2, %v11117_v56 }
 0x7e5   :  { %7593 = vmatprep.subr.mxu1 %v11117_v56 }
 0x7e6   :  { %7594 = vmatpush3.msra.mxu1 %v11252_v5 }
 0x7e7   :  { %7595 = vmatprep.subr.mxu1 %v11117_v56 }
 0x7e8   :  { %7596 = vmatpush3.msra.mxu1 %v11253_v6 }
 0x7e9   :  { %7598 = vmatmul.mubr.msk.f32.vlgmr.msra.gmra.mxu1 %vm4744_vm13, %v4861_v9  ;;  %7606 = vmatprep.subr.mxu1 %v11117_v56 }
 0x7ea   :  { %7600 = vmatprep.mubr.msk.f32.mxu1 %vm7707_vm2, %v11117_v56 }
 0x7ed   :  { %7601 = vmatmul.mubr.msk.f32.gmra.mxu1 %vm4744_vm13, %v4866_v62 }
 0x7ee   :  { %7603 = vmatprep.mubr.msk.f32.mxu1 %vm7707_vm2, %v11117_v56 }
 0x7f1   :  { %7604 = vmatmul.mubr.msk.f32.gmra.mxu1 %vm4744_vm13, %v4871_v39 }
 0x7f2   :  { %7612 = vmatprep.mubr.msk.f32.mxu1 %vm7707_vm2, %v11117_v56 }
 0x897   :  { %v6699_v49 = vpop.f32.mrf.mxu1 }
 0x899   :  { %v6700_v36 = vpop.f32.mrf.mxu1 }
 0x89a   :  { %v6740_v12 = vpop.f32.mrf.mxu0  ;;  %v6701_v52 = vadd.f32 %v6700_v36, %v6699_v49 }
 0x89c   :  { %v6741_v34 = vpop.f32.mrf.mxu0  ;;  %v5027_v14 = vadd.f32 %v6701_v52, %v6319_v31 }
 0x89d   :  { %v6702_v25 = vpop.f32.mrf.mxu1  ;;  %v6742_v15 = vadd.f32 %v6741_v34, %v6740_v12 }
 0x89e   :  { %v6743_v40 = vpop.f32.mrf.mxu0 }
 0x89f   :  { %v6703_v38 = vpop.f32.mrf.mxu1  ;;  %v5107_v46 = vadd.f32 %v6742_v15, %v5027_v14 }
 0x8a0   :  { %v6744_v8 = vpop.f32.mrf.mxu0  ;;  %v6704_v37 = vadd.f32 %v6703_v38, %v6702_v25 }
 0x8a1   :  { %v6705_v60 = vpop.f32.mrf.mxu1  ;;  %v6745_v10 = vadd.f32 %v6744_v8, %v6743_v40 }
 0x8a2   :  { %v6746_v48 = vpop.f32.mrf.mxu0  ;;  %v5032_v32 = vadd.f32 %v6704_v37, %v6319_v31 }
 0x8a3   :  { %v6706_v26 = vpop.f32.mrf.mxu1 }
 0x8a4   :  { %v6707_v57 = vadd.f32 %v6706_v26, %v6705_v60  ;;  %v6747_v24 = vpop.f32.mrf.mxu0  ;;  %v5112_v7 = vadd.f32 %v6745_v10, %v5032_v32 }
 0x8a5   :  { %v6748_v35 = vadd.f32 %v6747_v24, %v6746_v48 }
 0x8a6   :  { %v5037_v51 = vadd.f32 %v6707_v57, %v6319_v31 }
 0x8a8   :  { %v5117_v13 = vadd.f32 %v6748_v35, %v5037_v51 }
 0x8a9   :  { %v5186_v53 = vpop.f32.mrf.mxu1 }
 0x8aa   :  { %v5187_v27 = vadd.f32 %v5186_v53, %v5107_v46 }
 0x8ab   :  { %v7599_v44 = vpop.f32.mrf.mxu1 }
 0x8ac   :  { %v5200_v50 = vmax.f32 %v5187_v27, 0.0 }
 0x8ad   :  { %v5191_v29 = vpop.f32.mrf.mxu1 }
 0x8ae   :  { %v5192_v54 = vadd.f32 %v5191_v29, %v5112_v7 }
 0x8af   :  { %v7602_v59 = vpop.f32.mrf.mxu1 }
 0x8b0   :  { %v5201_v21 = vmax.f32 %v5192_v54, 0.0 }
 0x8b1   :  { %v5196_v47 = vpop.f32.mrf.mxu1 }
 0x8b2   :  { %v5197_v16 = vadd.f32 %v5196_v47, %v5117_v13 }
 0x8b3   :  { %v7605_v23 = vpop.f32.mrf.mxu1 }
 0x8b4   :  { %v5202_v63 = vmax.f32 %v5197_v16, 0.0 }
 0x8b6   :  { %7607 = vmatpush3.msk.msra.mxu1 %vm5208_vm3, %v5202_v63  ;;  %7625 = vmatpush3.msk.msra.mxu0 %vm5208_vm3, %v5202_v63 }
 0x8b7   :  { %7608 = vmatprep.subr.mxu1 %v11117_v56  ;;  %7626 = vmatprep.subr.mxu0 %v11117_v56 }
 0x8b8   :  { %7609 = vmatpush3.msra.mxu1 %v5201_v21  ;;  %7627 = vmatpush3.msra.mxu0 %v5201_v21 }
 0x8b9   :  { %7610 = vmatprep.subr.mxu1 %v11117_v56  ;;  %7628 = vmatprep.subr.mxu0 %v11117_v56 }
 0x8ba   :  { %7611 = vmatpush3.msra.mxu1 %v5200_v50  ;;  %7629 = vmatpush3.msra.mxu0 %v5200_v50 }
 0x8bb   :  { %7615 = vmatprep.subr.mxu1 %v11117_v56  ;;  %7613 = vmatmul.mubr.msk.f32.vlgmr.msra.gmra.mxu1 %vm5204_vm4, %v5203_v1 }
 0x8bc   :  { %7616 = vmatpush3.msk.msra.mxu1 %vm5208_vm3, %v5202_v63  ;;  %7621 = vmatprep.mubr.msk.f32.mxu1 %vm7707_vm2, %v11117_v56 }
 0x8bd   :  { %7617 = vmatprep.subr.mxu1 %v11117_v56  ;;  %7631 = vmatmul.mubr.msk.f32.vlgmr.msra.gmra.mxu0 %vm5204_vm4, %v6328_v20 }
 0x8be   :  { %7618 = vmatpush3.msra.mxu1 %v5201_v21  ;;  %5600 = vmatprep.subr.mxu0 %v11254_v33 }
 0x8bf   :  { %7619 = vmatprep.subr.mxu1 %v11117_v56 }
 0x8c0   :  { %7620 = vmatpush3.msra.mxu1 %v5200_v50 }
 0x8c1   :  { %7633 = vmatprep.subr.mxu1 %v11117_v56  ;;  %7622 = vmatmul.mubr.msk.f32.vlgmr.msra.gmra.mxu1 %vm5204_vm4, %v6325_v55 }
 0x8c2   :  { %7634 = vmatpush3.msk.msra.mxu1 %vm5208_vm3, %v5202_v63  ;;  %7639 = vmatprep.mubr.msk.f32.mxu1 %vm7707_vm2, %v11117_v56 }
 0x8c3   :  { %7635 = vmatprep.subr.mxu1 %v11117_v56 }
 0x8c4   :  { %7636 = vmatpush3.msra.mxu1 %v5201_v21 }
 0x8c5   :  { %7637 = vmatprep.subr.mxu1 %v11117_v56 }
 0x8c6   :  { %7638 = vmatpush3.msra.mxu1 %v5200_v50 }
 0x8c7   :  { %7640 = vmatmul.mubr.msk.f32.vlgmr.msra.gmra.mxu1 %vm5204_vm4, %v6331_v61  ;;  %5671 = vmatprep.subr.mxu1 %v11255_v45 }
 0x97b   :  { %v5278_v30 = vpop.f32.mrf.mxu1 }
 0x97d   :  { %v7614_v43 = vpop.f32.mrf.mxu1  ;;  %v5429_v19 = vpop.f32.mrf.mxu0 }
 0x97f   :  { %v7632_v17 = vpop.f32.mrf.mxu0 }
 0x981   :  { %v5353_v0 = vpop.f32.mrf.mxu1 }
 0x982   :  { %v5357_v11 = vmax.f32 %v5278_v30, %v5353_v0 }
 0x983   :  { %v7623_v18 = vpop.f32.mrf.mxu1 }
 0x984   :  { %v5433_v22 = vmax.f32 %v5357_v11, %v5429_v19 }
 0x987   :  { %v5505_v58 = vpop.f32.mrf.mxu1 }
 0x988   :  { %v10805_v42 = vmax.f32 %v5433_v22, %v5505_v58 }
 0x989   :  { %v7641_v4 = vpop.f32.mrf.mxu1 }
 0x98a   :  { %7699 = dma.done.wait [#allocation11 + $0x2], 8192 }
 0x98b   :  { %7700 = vsyncadd [#allocation11 + $0x2], 4294959104  ;;  %v11256_v41 = vld [vmem:[#allocation220_spill] sm:$0xff]  ;;  %v11257_v2 = vld [vmem:[#allocation222_spill] sm:$0xff]  ;;  %5664 = vmatprep.mubr.f32.mxu0 %v11117_v56  ;;  %5735 = vmatprep.mubr.f32.mxu1 %v11117_v56 }
 0x98c   :  { %5601 = vmatpush1.msra.mxu0 %v11256_v41  ;;  %5672 = vmatpush1.msra.mxu1 %v11257_v2  ;;  %v11258_v28 = vld [vmem:[#allocation217_spill] sm:$0xff]  ;;  %v11259_v3 = vld [vmem:[#allocation219_spill] sm:$0xff]  ;;  %v11260_v5 = vld [vmem:[#allocation216_spill] sm:$0xff]  ;;  %v5580_v41 = vlaneseq }
 0x98d   :  { %5602 = vmatprep.subr.mxu0 %v11258_v28  ;;  %5673 = vmatprep.subr.mxu1 %v11259_v3  ;;  %v11261_v9 = vld [vmem:[#allocation218_spill] sm:$0xff]  ;;  %v11262_v6 = vld [vmem:[#allocation213_spill] sm:$0xff]  ;;  %v11263_v62 = vld [vmem:[#allocation215_spill] sm:$0xff] }
 0x98e   :  { %5603 = vmatpush1.msra.mxu0 %v11260_v5  ;;  %5674 = vmatpush1.msra.mxu1 %v11261_v9  ;;  %v11264_v39 = vld [vmem:[#allocation212_spill] sm:$0xff]  ;;  %v11265_v49 = vld [vmem:[#allocation214_spill] sm:$0xff]  ;;  %v11266_v12 = vld [vmem:[#allocation209_spill] sm:$0xff]  ;;  %v5581_v2 = vshrl.u32 %v5580_v41, 7 }
 0x98f   :  { %5604 = vmatprep.subr.mxu0 %v11262_v6  ;;  %5675 = vmatprep.subr.mxu1 %v11263_v62  ;;  %v11267_v36 = vld [vmem:[#allocation211_spill] sm:$0xff]  ;;  %v11268_v34 = vld [vmem:[#allocation208_spill] sm:$0xff]  ;;  %v11269_v25 = vld [vmem:[#allocation210_spill] sm:$0xff] }
 0x990   :  { %5605 = vmatpush1.msra.mxu0 %v11264_v39  ;;  %5676 = vmatpush1.msra.mxu1 %v11265_v49  ;;  %v11270_v40 = vld [vmem:[#allocation205_spill] sm:$0xff]  ;;  %v11271_v38 = vld [vmem:[#allocation207_spill] sm:$0xff]  ;;  %v11272_v60 = vld [vmem:[#allocation204_spill] sm:$0xff]  ;;  %v5582_v28 = vsub.s32 0, %v5581_v2  ;;  %v5590_v3 = vsub.s32 2, %v5581_v2  ;;  %v5586_v9 = vsub.s32 1, %v5581_v2 }
 0x991   :  { %5606 = vmatprep.subr.mxu0 %v11266_v12  ;;  %5677 = vmatprep.subr.mxu1 %v11267_v36  ;;  %v11273_v8 = vld [vmem:[#allocation206_spill] sm:$0xff]  ;;  %v11274_v26 = vld [vmem:[#allocation201_spill] sm:$0xff]  ;;  %v11275_v48 = vld [vmem:[#allocation203_spill] sm:$0xff]  ;;  %v5594_v6 = vsub.s32 3, %v5581_v2 }
 0x992   :  { %5607 = vmatpush1.msra.mxu0 %v11268_v34  ;;  %5678 = vmatpush1.msra.mxu1 %v11269_v25  ;;  %v11276_v37 = vld [vmem:[#allocation200_spill] sm:$0xff]  ;;  %v11277_v57 = vld [vmem:[#allocation202_spill] sm:$0xff]  ;;  %v11278_v24 = vld [vmem:[#allocation197_spill] sm:$0xff] }
 0x993   :  { %5608 = vmatprep.subr.mxu0 %v11270_v40  ;;  %5679 = vmatprep.subr.mxu1 %v11271_v38  ;;  %v11279_v53 = vld [vmem:[#allocation199_spill] sm:$0xff]  ;;  %v11280_v52 = vld [vmem:[#allocation196_spill] sm:$0xff]  ;;  %v11281_v31 = vld [vmem:[#allocation198_spill] sm:$0xff] }
 0x994   :  { %5609 = vmatpush1.msra.mxu0 %v11272_v60  ;;  %5680 = vmatpush1.msra.mxu1 %v11273_v8  ;;  %v11282_v44 = vld [vmem:[#allocation193_spill] sm:$0xff]  ;;  %v11283_v32 = vld [vmem:[#allocation195_spill] sm:$0xff]  ;;  %v11284_v10 = vld [vmem:[#allocation192_spill] sm:$0xff] }
 0x995   :  { %5610 = vmatprep.subr.mxu0 %v11274_v26  ;;  %5681 = vmatprep.subr.mxu1 %v11275_v48  ;;  %v11285_v51 = vld [vmem:[#allocation194_spill] sm:$0xff]  ;;  %v11286_v35 = vld [vmem:[#allocation189_spill] sm:$0xff]  ;;  %v11287_v29 = vld [vmem:[#allocation191_spill] sm:$0xff] }
 0x996   :  { %5611 = vmatpush1.msra.mxu0 %v11276_v37  ;;  %5682 = vmatpush1.msra.mxu1 %v11277_v57  ;;  %v11288_v14 = vld [vmem:[#allocation188_spill] sm:$0xff]  ;;  %v11289_v15 = vld [vmem:[#allocation190_spill] sm:$0xff]  ;;  %v11290_v59 = vld [vmem:[#allocation185_spill] sm:$0xff] }
 0x997   :  { %5612 = vmatprep.subr.mxu0 %v11278_v24  ;;  %5683 = vmatprep.subr.mxu1 %v11279_v53  ;;  %v11291_v7 = vld [vmem:[#allocation187_spill] sm:$0xff]  ;;  %v11292_v13 = vld [vmem:[#allocation184_spill] sm:$0xff]  ;;  %v11293_v47 = vld [vmem:[#allocation186_spill] sm:$0xff] }
 0x998   :  { %5613 = vmatpush1.msra.mxu0 %v11280_v52  ;;  %5684 = vmatpush1.msra.mxu1 %v11281_v31  ;;  %v11294_v46 = vld [vmem:[#allocation181_spill] sm:$0xff]  ;;  %v11295_v54 = vld [vmem:[#allocation183_spill] sm:$0xff]  ;;  %v11296_v16 = vld [vmem:[#allocation180_spill] sm:$0xff] }
 0x999   :  { %5614 = vmatprep.subr.mxu0 %v11282_v44  ;;  %5685 = vmatprep.subr.mxu1 %v11283_v32  ;;  %v11297_v23 = vld [vmem:[#allocation182_spill] sm:$0xff]  ;;  %v11298_v27 = vld [vmem:[#allocation177_spill] sm:$0xff]  ;;  %v11299_v63 = vld [vmem:[#allocation179_spill] sm:$0xff] }
 0x99a   :  { %5615 = vmatpush1.msra.mxu0 %v11284_v10  ;;  %5686 = vmatpush1.msra.mxu1 %v11285_v51  ;;  %v11300_v21 = vld [vmem:[#allocation176_spill] sm:$0xff]  ;;  %v11301_v50 = vld [vmem:[#allocation178_spill] sm:$0xff]  ;;  %v11302_v1 = vld [vmem:[#allocation173_spill] sm:$0xff] }
 0x99b   :  { %5616 = vmatprep.subr.mxu0 %v11286_v35  ;;  %5687 = vmatprep.subr.mxu1 %v11287_v29  ;;  %v11303_v20 = vld [vmem:[#allocation175_spill] sm:$0xff]  ;;  %v11304_v55 = vld [vmem:[#allocation172_spill] sm:$0xff]  ;;  %v11305_v61 = vld [vmem:[#allocation174_spill] sm:$0xff] }
 0x99c   :  { %5617 = vmatpush1.msra.mxu0 %v11288_v14  ;;  %5688 = vmatpush1.msra.mxu1 %v11289_v15  ;;  %v11306_v30 = vld [vmem:[#allocation169_spill] sm:$0xff]  ;;  %v11307_v43 = vld [vmem:[#allocation171_spill] sm:$0xff]  ;;  %v11308_v19 = vld [vmem:[#allocation168_spill] sm:$0xff] }
 0x99d   :  { %5618 = vmatprep.subr.mxu0 %v11290_v59  ;;  %5689 = vmatprep.subr.mxu1 %v11291_v7  ;;  %v11309_v17 = vld [vmem:[#allocation170_spill] sm:$0xff]  ;;  %v11310_v0 = vld [vmem:[#allocation165_spill] sm:$0xff]  ;;  %v11311_v11 = vld [vmem:[#allocation167_spill] sm:$0xff] }
 0x99e   :  { %5619 = vmatpush1.msra.mxu0 %v11292_v13  ;;  %5690 = vmatpush1.msra.mxu1 %v11293_v47  ;;  %v11312_v18 = vld [vmem:[#allocation164_spill] sm:$0xff]  ;;  %v11313_v22 = vld [vmem:[#allocation166_spill] sm:$0xff]  ;;  %v11314_v58 = vld [vmem:[#allocation161_spill] sm:$0xff] }
 0x99f   :  { %5620 = vmatprep.subr.mxu0 %v11294_v46  ;;  %5691 = vmatprep.subr.mxu1 %v11295_v54  ;;  %v11315_v4 = vld [vmem:[#allocation163_spill] sm:$0xff]  ;;  %v11316_v33 = vld [vmem:[#allocation160_spill] sm:$0xff]  ;;  %v11317_v45 = vld [vmem:[#allocation162_spill] sm:$0xff] }
 0x9a0   :  { %5621 = vmatpush1.msra.mxu0 %v11296_v16  ;;  %5692 = vmatpush1.msra.mxu1 %v11297_v23  ;;  %v5578_v5 = vld [vmem:[%s10909_s11] sm:$0xf] }
 0x9a1   :  { %5622 = vmatprep.subr.mxu0 %v11298_v27  ;;  %5693 = vmatprep.subr.mxu1 %v11299_v63  ;;  %v5583_v62 = vrot.slane %v5578_v5, %v5582_v28  ;;  %v5591_v39 = vrot.slane %v5578_v5, %v5590_v3  ;;  %v5587_v49 = vrot.slane %v5578_v5, %v5586_v9 }
 0x9a2   :  { %5623 = vmatpush1.msra.mxu0 %v11300_v21  ;;  %5694 = vmatpush1.msra.mxu1 %v11301_v50  ;;  %v5595_v12 = vrot.slane %v5578_v5, %v5594_v6 }
 0x9a3   :  { %5624 = vmatprep.subr.mxu0 %v11302_v1  ;;  %5695 = vmatprep.subr.mxu1 %v11303_v20 }
 0x9a4   :  { %5625 = vmatpush1.msra.mxu0 %v11304_v55  ;;  %5696 = vmatpush1.msra.mxu1 %v11305_v61 }
 0x9a5   :  { %5626 = vmatprep.subr.mxu0 %v11306_v30  ;;  %5697 = vmatprep.subr.mxu1 %v11307_v43 }
 0x9a6   :  { %5627 = vmatpush1.msra.mxu0 %v11308_v19  ;;  %5698 = vmatpush1.msra.mxu1 %v11309_v17 }
 0x9a7   :  { %5628 = vmatprep.subr.mxu0 %v11310_v0  ;;  %5699 = vmatprep.subr.mxu1 %v11311_v11 }
 0x9a8   :  { %5629 = vmatpush1.msra.mxu0 %v11312_v18  ;;  %5700 = vmatpush1.msra.mxu1 %v11313_v22 }
 0x9a9   :  { %5630 = vmatprep.subr.mxu0 %v11314_v58  ;;  %5701 = vmatprep.subr.mxu1 %v11315_v4 }
 0x9aa   :  { %5631 = vmatpush1.msra.mxu0 %v11316_v33  ;;  %5702 = vmatpush1.msra.mxu1 %v11317_v45 }
 0x9ab   :  { %5665 = vmatmul.mubr.f32.vlgmr.msra.gmra.mxu0 %v10805_v42  ;;  %5736 = vmatmul.mubr.f32.vlgmr.msra.gmra.mxu1 %v10805_v42 }
 0xa6b   :  { %v5666_v36 = vpop.f32.mrf.mxu0  ;;  %v5737_v56 = vpop.f32.mrf.mxu1 }
 0xa6c   :  { %v10878_v34 = vadd.f32 %v5666_v36, %v5583_v62  ;;  %v10880_v25 = vadd.f32 %v5737_v56, %v5591_v39 }
 0xa6d   :  { %v5668_v42 = vpop.f32.mrf.mxu0  ;;  %v5739_v40 = vpop.f32.mrf.mxu1 }
 0xa6e   :  { %v5742_v38 = vmax.f32 %v10878_v34, 0.0  ;;  %v5744_v60 = vmax.f32 %v10880_v25, 0.0  ;;  %v5669_v8 = vadd.f32 %v5668_v42, %v5587_v49  ;;  %v5740_v26 = vadd.f32 %v5739_v40, %v5595_v12 }
 0xa70   :  { %v5743_v48 = vmax.f32 %v5669_v8, 0.0  ;;  %v5745_v37 = vmax.f32 %v5740_v26, 0.0 }
 0xa71   :  { %7701 = dma.done.wait [#allocation11 + $0x3], 8192 }
 0xa72   :  { %7702 = vsyncadd [#allocation11 + $0x3], 4294959104  ;;  %5884 = vmatprep.mubr.f32.mxu0 %v5743_v48  ;;  %5954 = vmatprep.mubr.f32.mxu1 %v5745_v37  ;;  %v5780_v57 = vld [vmem:[#allocation10 + $0xf8] sm:$0xff]  ;;  %v5779_v31 = vld [vmem:[#allocation10 + $0xf0] sm:$0xff]  ;;  %vm5981_vm2 = vcmask 1024  }
 0xa73   :  { %v5812_v24 = vld [vmem:[#allocation10 + $0x1f8] sm:$0xff]  ;;  %6776 = vmatprep.subr.mxu0 %v5780_v57  ;;  %v5811_v44 = vld [vmem:[#allocation10 + $0x1f0] sm:$0xff]  ;;  %v5778_v51 = vld [vmem:[#allocation10 + $0xe8] sm:$0xff] }
 0xa74   :  { %v5764_v53 = vld [vmem:[#allocation10 + $0x78] sm:$0xff]  ;;  %6811 = vmatprep.subr.mxu1 %v5812_v24  ;;  %v5763_v32 = vld [vmem:[#allocation10 + $0x70] sm:$0xff]  ;;  %v5810_v35 = vld [vmem:[#allocation10 + $0x1e8] sm:$0xff] }
 0xa75   :  { %v5796_v52 = vld [vmem:[#allocation10 + $0x178] sm:$0xff]  ;;  %6777 = vmatpush3.msra.mxu0 %v5764_v53  ;;  %v5795_v10 = vld [vmem:[#allocation10 + $0x170] sm:$0xff]  ;;  %v5762_v29 = vld [vmem:[#allocation10 + $0x68] sm:$0xff] }
 0xa76   :  { %6812 = vmatpush3.msra.mxu1 %v5796_v52  ;;  %6778 = vmatprep.subr.mxu0 %v5779_v31  ;;  %v5794_v14 = vld [vmem:[#allocation10 + $0x168] sm:$0xff]  ;;  %v5777_v15 = vld [vmem:[#allocation10 + $0xe0] sm:$0xff]  ;;  %v5776_v47 = vld [vmem:[#allocation10 + $0xd8] sm:$0xff] }
 0xa77   :  { %6813 = vmatprep.subr.mxu1 %v5811_v44  ;;  %6779 = vmatpush3.msra.mxu0 %v5763_v32  ;;  %v5809_v59 = vld [vmem:[#allocation10 + $0x1e0] sm:$0xff]  ;;  %v5808_v46 = vld [vmem:[#allocation10 + $0x1d8] sm:$0xff]  ;;  %v5775_v23 = vld [vmem:[#allocation10 + $0xd0] sm:$0xff] }
 0xa78   :  { %6814 = vmatpush3.msra.mxu1 %v5795_v10  ;;  %6780 = vmatprep.subr.mxu0 %v5778_v51  ;;  %v5761_v7 = vld [vmem:[#allocation10 + $0x60] sm:$0xff]  ;;  %v5760_v54 = vld [vmem:[#allocation10 + $0x58] sm:$0xff]  ;;  %v5807_v27 = vld [vmem:[#allocation10 + $0x1d0] sm:$0xff] }
 0xa79   :  { %6815 = vmatprep.subr.mxu1 %v5810_v35  ;;  %v5793_v13 = vld [vmem:[#allocation10 + $0x160] sm:$0xff]  ;;  %6781 = vmatpush3.msra.mxu0 %v5762_v29  ;;  %v5792_v16 = vld [vmem:[#allocation10 + $0x158] sm:$0xff]  ;;  %v5759_v63 = vld [vmem:[#allocation10 + $0x50] sm:$0xff] }
 0xa7a   :  { %6816 = vmatpush3.msra.mxu1 %v5794_v14  ;;  %6782 = vmatprep.subr.mxu0 %v5777_v15  ;;  %v5791_v21 = vld [vmem:[#allocation10 + $0x150] sm:$0xff]  ;;  %v5774_v50 = vld [vmem:[#allocation10 + $0xc8] sm:$0xff]  ;;  %v5773_v61 = vld [vmem:[#allocation10 + $0xc0] sm:$0xff] }
 0xa7b   :  { %6817 = vmatprep.subr.mxu1 %v5809_v59  ;;  %6783 = vmatpush3.msra.mxu0 %v5761_v7  ;;  %v5806_v1 = vld [vmem:[#allocation10 + $0x1c8] sm:$0xff]  ;;  %v5805_v30 = vld [vmem:[#allocation10 + $0x1c0] sm:$0xff]  ;;  %v5772_v17 = vld [vmem:[#allocation10 + $0xb8] sm:$0xff] }
 0xa7c   :  { %6818 = vmatpush3.msra.mxu1 %v5793_v13  ;;  %6784 = vmatprep.subr.mxu0 %v5776_v47  ;;  %v5758_v20 = vld [vmem:[#allocation10 + $0x48] sm:$0xff]  ;;  %v5757_v43 = vld [vmem:[#allocation10 + $0x40] sm:$0xff]  ;;  %v5804_v0 = vld [vmem:[#allocation10 + $0x1b8] sm:$0xff] }
 0xa7d   :  { %6819 = vmatprep.subr.mxu1 %v5808_v46  ;;  %6785 = vmatpush3.msra.mxu0 %v5760_v54  ;;  %v5790_v55 = vld [vmem:[#allocation10 + $0x148] sm:$0xff]  ;;  %v5789_v19 = vld [vmem:[#allocation10 + $0x140] sm:$0xff]  ;;  %v5756_v11 = vld [vmem:[#allocation10 + $0x38] sm:$0xff] }
 0xa7e   :  { %6820 = vmatpush3.msra.mxu1 %v5792_v16  ;;  %6786 = vmatprep.subr.mxu0 %v5775_v23  ;;  %v5788_v18 = vld [vmem:[#allocation10 + $0x138] sm:$0xff]  ;;  %v5771_v22 = vld [vmem:[#allocation10 + $0xb0] sm:$0xff]  ;;  %v5770_v45 = vld [vmem:[#allocation10 + $0xa8] sm:$0xff] }
 0xa7f   :  { %6821 = vmatprep.subr.mxu1 %v5807_v27  ;;  %6787 = vmatpush3.msra.mxu0 %v5759_v63  ;;  %v5803_v58 = vld [vmem:[#allocation10 + $0x1b0] sm:$0xff]  ;;  %v5802_v41 = vld [vmem:[#allocation10 + $0x1a8] sm:$0xff]  ;;  %v5769_v3 = vld [vmem:[#allocation10 + $0xa0] sm:$0xff] }
 0xa80   :  { %6822 = vmatpush3.msra.mxu1 %v5791_v21  ;;  %6788 = vmatprep.subr.mxu0 %v5774_v50  ;;  %v5755_v4 = vld [vmem:[#allocation10 + $0x30] sm:$0xff]  ;;  %v5754_v2 = vld [vmem:[#allocation10 + $0x28] sm:$0xff]  ;;  %v5801_v5 = vld [vmem:[#allocation10 + $0x1a0] sm:$0xff] }
 0xa81   :  { %6823 = vmatprep.subr.mxu1 %v5806_v1  ;;  %6789 = vmatpush3.msra.mxu0 %v5758_v20  ;;  %v5787_v33 = vld [vmem:[#allocation10 + $0x130] sm:$0xff]  ;;  %v5786_v28 = vld [vmem:[#allocation10 + $0x128] sm:$0xff]  ;;  %v5753_v9 = vld [vmem:[#allocation10 + $0x20] sm:$0xff] }
 0xa82   :  { %6824 = vmatpush3.msra.mxu1 %v5790_v55  ;;  %6790 = vmatprep.subr.mxu0 %v5773_v61  ;;  %v5785_v6 = vld [vmem:[#allocation10 + $0x120] sm:$0xff]  ;;  %v5768_v62 = vld [vmem:[#allocation10 + $0x98] sm:$0xff]  ;;  %v5767_v36 = vld [vmem:[#allocation10 + $0x90] sm:$0xff] }
 0xa83   :  { %6825 = vmatprep.subr.mxu1 %v5805_v30  ;;  %6791 = vmatpush3.msra.mxu0 %v5757_v43  ;;  %v5800_v39 = vld [vmem:[#allocation10 + $0x198] sm:$0xff]  ;;  %v5799_v56 = vld [vmem:[#allocation10 + $0x190] sm:$0xff]  ;;  %v5766_v8 = vld [vmem:[#allocation10 + $0x88] sm:$0xff] }
 0xa84   :  { %6826 = vmatpush3.msra.mxu1 %v5789_v19  ;;  %6792 = vmatprep.subr.mxu0 %v5772_v17  ;;  %v5752_v49 = vld [vmem:[#allocation10 + $0x18] sm:$0xff]  ;;  %v5751_v42 = vld [vmem:[#allocation10 + $0x10] sm:$0xff]  ;;  %v5798_v26 = vld [vmem:[#allocation10 + $0x188] sm:$0xff] }
 0xa85   :  { %6827 = vmatprep.subr.mxu1 %v5804_v0  ;;  %6793 = vmatpush3.msra.mxu0 %v5756_v11  ;;  %v5784_v12 = vld [vmem:[#allocation10 + $0x118] sm:$0xff]  ;;  %v5783_v40 = vld [vmem:[#allocation10 + $0x110] sm:$0xff]  ;;  %v5750_v48 = vld [vmem:[#allocation10 + $0x8] sm:$0xff] }
 0xa86   :  { %6828 = vmatpush3.msra.mxu1 %v5788_v18  ;;  %6794 = vmatprep.subr.mxu0 %v5771_v22  ;;  %v5782_v37 = vld [vmem:[#allocation10 + $0x108] sm:$0xff]  ;;  %v5765_v57 = vld [vmem:[#allocation10 + $0x80] sm:$0xff]  ;;  %v6334_v32 = vld [vmem:[%s10911_s13] ss:$0 sm:$0xff] }
 0xa87   :  { %6829 = vmatprep.subr.mxu1 %v5803_v58  ;;  %6795 = vmatpush3.msra.mxu0 %v5755_v4  ;;  %v5797_v24 = vld [vmem:[#allocation10 + $0x180] sm:$0xff]  ;;  %v6335_v34 = vld [vmem:[%s10912_s14] ss:$0 sm:$0xff] }
 0xa88   :  { %6830 = vmatpush3.msra.mxu1 %v5787_v33  ;;  %6796 = vmatprep.subr.mxu0 %v5770_v45  ;;  %v5749_v53 = vld [vmem:[#allocation10] sm:$0xff] }
 0xa89   :  { %6831 = vmatprep.subr.mxu1 %v5802_v41  ;;  %6797 = vmatpush3.msra.mxu0 %v5754_v2  ;;  %v5781_v52 = vld [vmem:[#allocation10 + $0x100] sm:$0xff] }
 0xa8a   :  { %6832 = vmatpush3.msra.mxu1 %v5786_v28  ;;  %6798 = vmatprep.subr.mxu0 %v5769_v3 }
 0xa8b   :  { %6833 = vmatprep.subr.mxu1 %v5801_v5  ;;  %6799 = vmatpush3.msra.mxu0 %v5753_v9 }
 0xa8c   :  { %6834 = vmatpush3.msra.mxu1 %v5785_v6  ;;  %6800 = vmatprep.subr.mxu0 %v5768_v62 }
 0xa8d   :  { %6835 = vmatprep.subr.mxu1 %v5800_v39  ;;  %6801 = vmatpush3.msra.mxu0 %v5752_v49 }
 0xa8e   :  { %6836 = vmatpush3.msra.mxu1 %v5784_v12  ;;  %6802 = vmatprep.subr.mxu0 %v5767_v36 }
 0xa8f   :  { %6837 = vmatprep.subr.mxu1 %v5799_v56  ;;  %6803 = vmatpush3.msra.mxu0 %v5751_v42 }
 0xa90   :  { %6838 = vmatpush3.msra.mxu1 %v5783_v40  ;;  %6804 = vmatprep.subr.mxu0 %v5766_v8 }
 0xa91   :  { %6839 = vmatprep.subr.mxu1 %v5798_v26  ;;  %6805 = vmatpush3.msra.mxu0 %v5750_v48 }
 0xa92   :  { %6840 = vmatpush3.msra.mxu1 %v5782_v37  ;;  %6806 = vmatprep.subr.mxu0 %v5765_v57 }
 0xa93   :  { %6841 = vmatprep.subr.mxu1 %v5797_v24  ;;  %6807 = vmatpush3.msra.mxu0 %v5749_v53 }
 0xa94   :  { %6842 = vmatpush3.msra.mxu1 %v5781_v52  ;;  %5885 = vmatmul.mubr.f32.vlgmr.msra.gmra.mxu0 %v5742_v38 }
 0xa95   :  { %5955 = vmatmul.mubr.f32.vlgmr.msra.gmra.mxu1 %v5744_v60  ;;  %v6336_v60 = vld [vmem:[#allocation12] ss:$0 sm:$0xff] }
 0xb54   :  { %v6808_v31 = vpop.f32.mrf.mxu0 }
 0xb55   :  { %v6843_v44 = vpop.f32.mrf.mxu1 }
 0xb56   :  { %v6809_v10 = vpop.f32.mrf.mxu0 }
 0xb57   :  { %v6844_v51 = vpop.f32.mrf.mxu1  ;;  %v6810_v35 = vadd.f32 %v6809_v10, %v6808_v31 }
 0xb58   :  { %v6845_v14 = vadd.f32 %v6844_v51, %v6843_v44 }
 0xb59   :  { %v5887_v29 = vadd.f32 %v6810_v35, %v6334_v32 }
 0xb5b   :  { %v5957_v15 = vadd.f32 %v6845_v14, %v5887_v29 }
 0xb5d   :  { %v5960_v38 = vmax.f32 %v5957_v15, 0.0 }
 0xb5f   :  { %v5968_v59 = vmul.f32 %v6335_v34, %v5960_v38 }
 0xb61   :  { %v5969_v25 = vsel %vm794_vm0, %v5968_v59, 0.0 }
 0xb62   :  { %5970 = vadd.xlane.f32.xlu0 %v5969_v25 }
 0xbeb   :  { %v5971_v7 = vpop.xlane.xlu0 %5970 }
 0xbec   :  { %v5979_v13 = vadd.f32 %v6336_v60, %v5971_v7 }
 0xbee   :  { %7651 = vtanh.f32 %v5979_v13 }
 0xbfb   :  { %v7652_v47 = vpop.eup %7651 }
 0xbfc   :  { %5982 = vst.msk [vmem:[%s10914_s16] sm:$0x3] %vm5981_vm2, %v7652_v47 }
 0xbfd   :  { %5987 = vsyncpa [#allocation14], 1 }
 0xbfe   :  { %5988 = vsyncmov [#allocation11] }
 0xc01   :  { %s5989_s3 = vpop.sfrf %5988 }
 0xc02   :  { %p6337_p10 = scmp.ne.s32.totalorder %s5989_s3, 0 }
 0xc04   :  { %5993 = shalt.err (%p6337_p10)  }
 0xc05   :  { %5995 = vsyncmov [#allocation11 + $0x1] }
 0xc08   :  { %s5996_s14 = vpop.sfrf %5995 }
 0xc09   :  { %p6338_p11 = scmp.ne.s32.totalorder %s5996_s14, 0 }
 0xc0b   :  { %6000 = shalt.err (%p6338_p11)  }
 0xc0c   :  { %6002 = vsyncmov [#allocation11 + $0x2] }
 0xc0f   :  { %s6003_s24 = vpop.sfrf %6002 }
 0xc10   :  { %p6339_p12 = scmp.ne.s32.totalorder %s6003_s24, 0 }
 0xc12   :  { %6007 = shalt.err (%p6339_p12)  }
 0xc13   :  { %6009 = vsyncmov [#allocation11 + $0x3] }
 0xc16   :  { %s6010_s25 = vpop.sfrf %6009 }
 0xc17   :  { %p6340_p13 = scmp.ne.s32.totalorder %s6010_s25, 0 }
 0xc19   :  { %6014 = shalt.err (%p6340_p13)  }

</bundles_post_ra>
